<compile_context>
chip_gen: v7x
topology: tpu7x:2x2x1
jax: 0.10.0
libtpu: 0.0.40
codegen_flags: <defaults>
</compile_context>

<pallas_src>
import functools
import numpy as np
import jax
import jax.numpy as jnp
from jax.experimental import pallas as pl
from jax.experimental.pallas import tpu as pltpu

BN_EPS = 1e-5
BN_EVAL_SCALE = 1.0 / np.sqrt(1.0 + BN_EPS)   # gamma=1, beta=0, mean=0, var=1
MATMUL_DTYPE = jnp.bfloat16                   # MXU-native operands, f32 accum


# ----------------------------------------------------------------------------
# In-kernel helpers (traced inside the fused kernel)
# ----------------------------------------------------------------------------
def _pad_rows(x, c, R):
    """[Hc, N, Wc*c] -> [(R*N), (Wc+2)*c] zero-padded conv input.

    Row-outer / frame-inner 2-D layout: global sublane g = r*N + n, where
    r=0 is the top zero-pad row, r=1..Hc the data rows, r=Hc+1 the bottom
    zero-pad row and r>=Hc+2 zero filler rows so that R is a multiple of 8.
    """
    Hc, N, L = x.shape
    zc = jnp.zeros((Hc, N, c), jnp.float32)
    x = jnp.concatenate([zc, x, zc], axis=2)          # pad x (lanes)
    x = x.reshape(Hc * N, L + 2 * c)                  # trivial: N % 8 == 0
    zrow = jnp.zeros((N, L + 2 * c), jnp.float32)
    pieces = [zrow, x, zrow] + [zrow] * (R - Hc - 2)
    return jnp.concatenate(pieces, axis=0)            # [(R*N), (Wc+2)*c]


def _conv_bn_relu_pool(x2d, wb_ref, bias_ref, N, R, H, W, cout):
    """Conv3x3(pad=1) + eval-BN + ReLU + MaxPool(3,2,1) for all frames at once.

    x2d      : [(R*N), (W+2)*cin]   padded input, rows (r, n), lanes (x, ci)
    wb_ref   : [(W+2)*cin, 3*W*cout] banded weights (bf16); the 3 dy blocks are
               concatenated along the output dim, and within each block output
               columns are parity-permuted: col = (x%2)*half + (x//2)*cout + co
    bias_ref : [1, W*cout]           conv bias (BN folded), f32
    returns  : [H//2, N, (W//2)*cout] pooled output, lanes in natural (x, c).
    """
    WC = W * cout
    Ho, Wo = H // 2, W // 2
    half = Wo * cout

    # One matmul for all frames, all rows, all 3 dy taps.
    p = jnp.dot(x2d.astype(wb_ref.dtype), wb_ref[...],
                preferred_element_type=jnp.float32)   # [(R*N), 3*WC]
    p = p.reshape(R, N, 3 * WC)                       # trivial: N % 8 == 0

    # Apply the dy shift on the OUTPUT rows (leading-dim slices, no relayout).
    acc = (p[0:H, :, 0:WC]
           + p[1:H + 1, :, WC:2 * WC]
           + p[2:H + 2, :, 2 * WC:3 * WC])
    conv = jnp.maximum(acc + bias_ref[...], 0.0)      # [H, N, WC]

    # MaxPool along x: columns are parity-permuted so stride-2 selection is
    # static lane slices; zero pad tap is safe because values are post-ReLU.
    even = conv[:, :, :half]                          # x = 2j
    odd = conv[:, :, half:]                           # x = 2j + 1
    odd_sh = jnp.concatenate(
        [jnp.zeros((H, N, cout), jnp.float32), odd[:, :, :half - cout]],
        axis=2)                                       # x = 2j - 1
    wpool = jnp.maximum(jnp.maximum(even, odd), odd_sh)   # [H, N, half]

    # MaxPool along y: rows {2i-1, 2i, 2i+1}; leading-dim indexing only.
    rows = []
    for i in range(Ho):
        r = jnp.maximum(wpool[2 * i], wpool[2 * i + 1])
        if i > 0:
            r = jnp.maximum(r, wpool[2 * i - 1])
        rows.append(r[None])
    return jnp.concatenate(rows, axis=0)              # [Ho, N, half]


# ----------------------------------------------------------------------------
# Fused whole-network kernel
# ----------------------------------------------------------------------------
def _make_fused_kernel(conv_cfgs, T, B, hd):
    def kernel(fr_ref,
               wb1_ref, cb1_ref, wb2_ref, cb2_ref, wb3_ref, cb3_ref,
               w1p_ref, b1_ref, wih_ref, whh_ref, bl_ref, w2_ref, b2_ref,
               o_ref):
        N = T * B
        wb_refs = (wb1_ref, wb2_ref, wb3_ref)
        cb_refs = (cb1_ref, cb2_ref, cb3_ref)

        cur = fr_ref[...]                             # [H1, N, W1], cin = 1
        for li, (H, W, cin, cout, R) in enumerate(conv_cfgs):
            x2d = _pad_rows(cur, cin, R)              # [(R*N), (W+2)*cin]
            cur = _conv_bn_relu_pool(x2d, wb_refs[li], cb_refs[li],
                                     N, R, H, W, cout)

        # ----- fc1 + eval BN + ReLU (split over the Ho3 row blocks) ---------
        Ho3 = cur.shape[0]
        acc = None
        for i in range(Ho3):
            t_i = jnp.dot(cur[i].astype(w1p_ref.dtype), w1p_ref[i],
                          preferred_element_type=jnp.float32)
            acc = t_i if acc is None else acc + t_i
        feat = jnp.maximum(acc + b1_ref[...], 0.0)    # [N, F]

        # ----- LSTM: input projection for all T steps, then unrolled rec ----
        xg = jnp.dot(feat.astype(wih_ref.dtype), wih_ref[...],
                     preferred_element_type=jnp.float32) + bl_ref[...]
        whh = whh_ref[...]                            # hoisted; bf16 [hd, 4hd]
        h = jnp.zeros((B, hd), jnp.float32)
        c = jnp.zeros((B, hd), jnp.float32)
        for t in range(T):                            # T = 8, unrolled
            z = xg[t * B:(t + 1) * B, :] + jnp.dot(
                h.astype(whh.dtype), whh, preferred_element_type=jnp.float32)
            i_g = jax.nn.sigmoid(z[:, 0 * hd:1 * hd])
            f_g = jax.nn.sigmoid(z[:, 1 * hd:2 * hd])
            g_g = jnp.tanh(z[:, 2 * hd:3 * hd])
            o_g = jax.nn.sigmoid(z[:, 3 * hd:4 * hd])
            c = f_g * c + i_g * g_g
            h = o_g * jnp.tanh(c)

        # ----- fc2 + eval BN (folded) + softmax ------------------------------
        logits = jnp.dot(h.astype(w2_ref.dtype), w2_ref[...],
                         preferred_element_type=jnp.float32) + b2_ref[...]
        m = jnp.max(logits, axis=-1, keepdims=True)
        e = jnp.exp(logits - m)
        o_ref[...] = e / jnp.sum(e, axis=-1, keepdims=True)

    return kernel


# ----------------------------------------------------------------------------
# Host-side parameter preparation (banded conv weights, packed LSTM gates, ...)
# ----------------------------------------------------------------------------
def prepare_params(params, img_size=16):
    prep = {"conv": []}
    H = img_size
    cin = 1
    for (w, b) in params["conv"]:
        w = np.asarray(w, np.float32)                 # [3, 3, cin, cout] HWIO
        b = np.asarray(b, np.float32)
        cout = w.shape[-1]
        W = H                                         # square images
        Wp, Wo = W + 2, W // 2
        half = Wo * cout
        WB = np.zeros((3, Wp * cin, W * cout), np.float32)
        for dy in range(3):
            for xo in range(W):
                col = (xo % 2) * half + (xo // 2) * cout
                for dx in range(3):
                    row = (xo + dx) * cin
                    WB[dy, row:row + cin, col:col + cout] = \
                        w[dy, dx] * BN_EVAL_SCALE
        WBcat = np.concatenate([WB[0], WB[1], WB[2]], axis=1)  # [Wp*cin, 3*W*cout]
        bias = np.tile(b * BN_EVAL_SCALE, W).reshape(1, W * cout)
        R = ((H + 2 + 7) // 8) * 8                    # padded row count per frame
        prep["conv"].append(dict(WB=jnp.asarray(WBcat, MATMUL_DTYPE),
                                 bias=jnp.asarray(bias.astype(np.float32)),
                                 H=H, W=W, cin=cin, cout=cout, R=R))
        H //= 2
        cin = cout

    Ho3 = Wo3 = H
    C3 = cin
    fc1_w = np.asarray(params["fc1_w"], np.float32)   # rows in torch (c,h,w) order
    F = fc1_w.shape[1]
    # rows -> (h)(w, c) blocks so fc1 can consume pooled row blocks directly
    w1p = (fc1_w.reshape(C3, Ho3, Wo3, F).transpose(1, 2, 0, 3)
           .reshape(Ho3, Wo3 * C3, F)) * BN_EVAL_SCALE
    prep["w1p"] = jnp.asarray(w1p, MATMUL_DTYPE)
    prep["b1"] = jnp.asarray((np.asarray(params["fc1_b"], np.float32)
                              * BN_EVAL_SCALE).reshape(1, F))

    w_ih = np.asarray(params["lstm_w_ih"], np.float32)       # [4*hd, F]
    w_hh = np.asarray(params["lstm_w_hh"], np.float32)       # [4*hd, hd]
    b_l = (np.asarray(params["lstm_b_ih"], np.float32)
           + np.asarray(params["lstm_b_hh"], np.float32))
    hd = w_hh.shape[1]
    prep["wih"] = jnp.asarray(np.ascontiguousarray(w_ih.T), MATMUL_DTYPE)
    prep["whh"] = jnp.asarray(np.ascontiguousarray(w_hh.T), MATMUL_DTYPE)
    prep["bl"] = jnp.asarray(b_l.reshape(1, 4 * hd))
    prep["hd"] = hd

    w2 = np.asarray(params["fc2_w"], np.float32)
    nc = w2.shape[1]
    prep["w2"] = jnp.asarray(w2 * BN_EVAL_SCALE, MATMUL_DTYPE)
    prep["b2"] = jnp.asarray((np.asarray(params["fc2_b"], np.float32)
                              * BN_EVAL_SCALE).reshape(1, nc))
    prep["nc"] = nc
    return prep


# ----------------------------------------------------------------------------
# Full CRNN forward: one fused pallas_call
# ----------------------------------------------------------------------------
def crnn_forward(x, prep):
    """x: [B, 1, H, W, T] float32 -> class probabilities [B, num_classes]."""
    B, _, H, W, T = x.shape
    N = T * B
    # Rows-outer / frames-inner layout: frames[h, t*B + b, w] = x[b, 0, h, w, t]
    frames = jnp.transpose(x, (2, 4, 0, 3, 1)).reshape(H, N, W)

    conv_cfgs = tuple((l["H"], l["W"], l["cin"], l["cout"], l["R"])
                      for l in prep["conv"])
    kernel = _make_fused_kernel(conv_cfgs, T, B, prep["hd"])

    args = [frames]
    for l in prep["conv"]:
        args += [l["WB"], l["bias"]]
    args += [prep["w1p"], prep["b1"], prep["wih"], prep["whh"], prep["bl"],
             prep["w2"], prep["b2"]]

    def full_spec(a):
        nd = a.ndim
        return pl.BlockSpec(a.shape, lambda i, _nd=nd: (0,) * _nd)

    return pl.pallas_call(
        kernel,
        out_shape=jax.ShapeDtypeStruct((B, prep["nc"]), jnp.float32),
        grid=(1,),
        in_specs=[full_spec(a) for a in args],
        out_specs=pl.BlockSpec((B, prep["nc"]), lambda i: (0, 0)),
        compiler_params=pltpu.CompilerParams(
            dimension_semantics=("arbitrary",)),
    )(*args)


# ----------------------------------------------------------------------------
# Deterministic parameter initialization (mirrors module shapes / init style)
# ----------------------------------------------------------------------------
def init_params(key, img_size=16, depth_c=3, cnn_features=128,
                rnn_features=64, num_classes=2):
    ks = jax.random.split(key, 8)
    params = {}

    conv = []
    cin, cout = 1, 16
    for i in range(depth_c):
        kw, kb = jax.random.split(ks[i])
        fan_out = cout * 9
        fan_in = cin * 9
        w = jax.random.normal(kw, (3, 3, cin, cout),
                              jnp.float32) * np.sqrt(2.0 / fan_out)
        bnd = 1.0 / np.sqrt(fan_in)
        b = jax.random.uniform(kb, (cout,), jnp.float32, -bnd, bnd)
        conv.append((w, b))
        cin, cout = cout, cout + 4
    params["conv"] = conv

    flat = cin * (img_size // 2 ** depth_c) ** 2
    kw, kb = jax.random.split(ks[3])
    params["fc1_w"] = jax.random.normal(
        kw, (flat, cnn_features), jnp.float32) * np.sqrt(2.0 / cnn_features)
    bnd = 1.0 / np.sqrt(flat)
    params["fc1_b"] = jax.random.uniform(kb, (cnn_features,), jnp.float32,
                                         -bnd, bnd)

    # LSTM(cnn_features -> rnn_features), torch gate order (i, f, g, o)
    kk = jax.random.split(ks[4], 4)
    hd = rnn_features
    bnd = 1.0 / np.sqrt(hd)
    params["lstm_w_ih"] = jax.random.uniform(kk[0], (4 * hd, cnn_features),
                                             jnp.float32, -bnd, bnd)
    params["lstm_w_hh"] = jax.random.uniform(kk[1], (4 * hd, hd), jnp.float32,
                                             -bnd, bnd)
    params["lstm_b_ih"] = jax.random.uniform(kk[2], (4 * hd,), jnp.float32,
                                             -bnd, bnd)
    params["lstm_b_hh"] = jax.random.uniform(kk[3], (4 * hd,), jnp.float32,
                                             -bnd, bnd)

    kw, kb = jax.random.split(ks[5])
    params["fc2_w"] = jax.random.normal(
        kw, (rnn_features, num_classes),
        jnp.float32) * np.sqrt(2.0 / num_classes)
    bnd = 1.0 / np.sqrt(rnn_features)
    params["fc2_b"] = jax.random.uniform(kb, (num_classes,), jnp.float32,
                                         -bnd, bnd)
    return params


# ----------------------------------------------------------------------------
if __name__ == "__main__":
    key = jax.random.PRNGKey(0)
    kp, kx = jax.random.split(key)

    B, H, W, T = 2, 16, 16, 8          # small shapes: img_size=16, seq len 8
    params = init_params(kp, img_size=H, depth_c=3, cnn_features=128,
                         rnn_features=64, num_classes=2)
    prep = prepare_params(params, img_size=H)

    x = jax.random.normal(kx, (B, 1, H, W, T), jnp.float32)

    fwd = jax.jit(functools.partial(crnn_forward, prep=prep))
    out = jax.block_until_ready(fwd(x))

    assert out.shape == (B, 2), out.shape
    assert bool(jnp.all(jnp.isfinite(out)))
    assert bool(jnp.allclose(jnp.sum(out, axis=-1), 1.0, atol=1e-5))
    print("KERNEL_OK")
</pallas_src>

<mosaic_0001>
module attributes {stable_mosaic.version = 11 : i64} {
  func.func @kernel(%arg0: i32, %arg1: memref<16x16x16xf32, #tpu.memory_space<vmem>>, %arg2: memref<18x768xbf16, #tpu.memory_space<vmem>>, %arg3: memref<1x256xf32, #tpu.memory_space<vmem>>, %arg4: memref<160x480xbf16, #tpu.memory_space<vmem>>, %arg5: memref<1x160xf32, #tpu.memory_space<vmem>>, %arg6: memref<120x288xbf16, #tpu.memory_space<vmem>>, %arg7: memref<1x96xf32, #tpu.memory_space<vmem>>, %arg8: memref<2x48x128xbf16, #tpu.memory_space<vmem>>, %arg9: memref<1x128xf32, #tpu.memory_space<vmem>>, %arg10: memref<128x256xbf16, #tpu.memory_space<vmem>>, %arg11: memref<64x256xbf16, #tpu.memory_space<vmem>>, %arg12: memref<1x256xf32, #tpu.memory_space<vmem>>, %arg13: memref<64x2xbf16, #tpu.memory_space<vmem>>, %arg14: memref<1x2xf32, #tpu.memory_space<vmem>>, %arg15: memref<2x2xf32, #tpu.memory_space<vmem>>) attributes {dimension_semantics = [#tpu.dimension_semantics<arbitrary>], iteration_bounds = array<i64: 1>, scalar_prefetch = 0 : i64, scratch_operands = 0 : i64, tpu.core_type = #tpu.core_type<tc>, window_params = [{pipeline_mode = #tpu.pipeline_mode<synchronous>, transform_indices = @transform_0, window_bounds = array<i64: 16, 16, 16>}, {pipeline_mode = #tpu.pipeline_mode<synchronous>, transform_indices = @transform_1, window_bounds = array<i64: 18, 768>}, {pipeline_mode = #tpu.pipeline_mode<synchronous>, transform_indices = @transform_2, window_bounds = array<i64: 1, 256>}, {pipeline_mode = #tpu.pipeline_mode<synchronous>, transform_indices = @transform_3, window_bounds = array<i64: 160, 480>}, {pipeline_mode = #tpu.pipeline_mode<synchronous>, transform_indices = @transform_4, window_bounds = array<i64: 1, 160>}, {pipeline_mode = #tpu.pipeline_mode<synchronous>, transform_indices = @transform_5, window_bounds = array<i64: 120, 288>}, {pipeline_mode = #tpu.pipeline_mode<synchronous>, transform_indices = @transform_6, window_bounds = array<i64: 1, 96>}, {pipeline_mode = #tpu.pipeline_mode<synchronous>, transform_indices = @transform_7, window_bounds = array<i64: 2, 48, 128>}, {pipeline_mode = #tpu.pipeline_mode<synchronous>, transform_indices = @transform_8, window_bounds = array<i64: 1, 128>}, {pipeline_mode = #tpu.pipeline_mode<synchronous>, transform_indices = @transform_9, window_bounds = array<i64: 128, 256>}, {pipeline_mode = #tpu.pipeline_mode<synchronous>, transform_indices = @transform_10, window_bounds = array<i64: 64, 256>}, {pipeline_mode = #tpu.pipeline_mode<synchronous>, transform_indices = @transform_11, window_bounds = array<i64: 1, 256>}, {pipeline_mode = #tpu.pipeline_mode<synchronous>, transform_indices = @transform_12, window_bounds = array<i64: 64, 2>}, {pipeline_mode = #tpu.pipeline_mode<synchronous>, transform_indices = @transform_13, window_bounds = array<i64: 1, 2>}, {pipeline_mode = #tpu.pipeline_mode<synchronous>, transform_indices = @transform_14, window_bounds = array<i64: 2, 2>}]} {
    %c0 = arith.constant 0 : index
    %c0_0 = arith.constant 0 : index
    %c0_1 = arith.constant 0 : index
    %0 = vector.load %arg1[%c0, %c0_0, %c0_1] : memref<16x16x16xf32, #tpu.memory_space<vmem>>, vector<16x16x16xf32>
    %cst = arith.constant 0.000000e+00 : f32
    %1 = vector.broadcast %cst : f32 to vector<16x16x1xf32>
    %2 = tpu.concatenate %1, %0, %1 in 2 : vector<16x16x1xf32>, vector<16x16x16xf32>, vector<16x16x1xf32> -> vector<16x16x18xf32>
    %3 = vector.shape_cast %2 : vector<16x16x18xf32> to vector<256x18xf32>
    %cst_2 = arith.constant 0.000000e+00 : f32
    %4 = vector.broadcast %cst_2 : f32 to vector<16x18xf32>
    %5 = tpu.concatenate %4, %3, %4, %4, %4, %4, %4, %4, %4 in 0 : vector<16x18xf32>, vector<256x18xf32>, vector<16x18xf32>, vector<16x18xf32>, vector<16x18xf32>, vector<16x18xf32>, vector<16x18xf32>, vector<16x18xf32>, vector<16x18xf32> -> vector<384x18xf32>
    %6 = arith.truncf %5 : vector<384x18xf32> to vector<384x18xbf16>
    %c0_3 = arith.constant 0 : index
    %c0_4 = arith.constant 0 : index
    %7 = vector.load %arg2[%c0_3, %c0_4] : memref<18x768xbf16, #tpu.memory_space<vmem>>, vector<18x768xbf16>
    %cst_5 = arith.constant dense<0.000000e+00> : vector<384x768xf32>
    %8 = tpu.matmul %6, %7, %cst_5 {dimension_numbers = #tpu.dot_dimension_numbers<[1], [0], [0], [1], [0, 0, 1, 1], [], []>} : vector<384x18xbf16>, vector<18x768xbf16>, vector<384x768xf32> -> vector<384x768xf32>
    %9 = vector.shape_cast %8 : vector<384x768xf32> to vector<24x16x768xf32>
    %10 = vector.extract_strided_slice %9 {offsets = [0, 0, 0], sizes = [16, 16, 256], strides = [1, 1, 1]} : vector<24x16x768xf32> to vector<16x16x256xf32>
    %11 = vector.extract_strided_slice %9 {offsets = [1, 0, 256], sizes = [16, 16, 256], strides = [1, 1, 1]} : vector<24x16x768xf32> to vector<16x16x256xf32>
    %12 = arith.addf %10, %11 : vector<16x16x256xf32>
    %13 = vector.extract_strided_slice %9 {offsets = [2, 0, 512], sizes = [16, 16, 256], strides = [1, 1, 1]} : vector<24x16x768xf32> to vector<16x16x256xf32>
    %14 = arith.addf %12, %13 : vector<16x16x256xf32>
    %c0_6 = arith.constant 0 : index
    %c0_7 = arith.constant 0 : index
    %15 = vector.load %arg3[%c0_6, %c0_7] : memref<1x256xf32, #tpu.memory_space<vmem>>, vector<1x256xf32>
    %16 = vector.shape_cast %15 : vector<1x256xf32> to vector<1x1x256xf32>
    %17 = vector.broadcast %16 : vector<1x1x256xf32> to vector<16x16x256xf32>
    %18 = arith.addf %14, %17 : vector<16x16x256xf32>
    %cst_8 = arith.constant 0.000000e+00 : f32
    %19 = vector.broadcast %cst_8 : f32 to vector<16x16x256xf32>
    %20 = arith.maximumf %18, %19 : vector<16x16x256xf32>
    %21 = vector.extract_strided_slice %20 {offsets = [0, 0, 0], sizes = [16, 16, 128], strides = [1, 1, 1]} : vector<16x16x256xf32> to vector<16x16x128xf32>
    %22 = vector.extract_strided_slice %20 {offsets = [0, 0, 128], sizes = [16, 16, 128], strides = [1, 1, 1]} : vector<16x16x256xf32> to vector<16x16x128xf32>
    %cst_9 = arith.constant 0.000000e+00 : f32
    %23 = vector.broadcast %cst_9 : f32 to vector<16x16x16xf32>
    %24 = vector.extract_strided_slice %22 {offsets = [0, 0, 0], sizes = [16, 16, 112], strides = [1, 1, 1]} : vector<16x16x128xf32> to vector<16x16x112xf32>
    %25 = tpu.concatenate %23, %24 in 2 : vector<16x16x16xf32>, vector<16x16x112xf32> -> vector<16x16x128xf32>
    %26 = arith.maximumf %21, %22 : vector<16x16x128xf32>
    %27 = arith.maximumf %26, %25 : vector<16x16x128xf32>
    %28 = vector.extract_strided_slice %27 {offsets = [0, 0, 0], sizes = [1, 16, 128], strides = [1, 1, 1]} : vector<16x16x128xf32> to vector<1x16x128xf32>
    %29 = vector.shape_cast %28 : vector<1x16x128xf32> to vector<16x128xf32>
    %30 = vector.extract_strided_slice %27 {offsets = [1, 0, 0], sizes = [1, 16, 128], strides = [1, 1, 1]} : vector<16x16x128xf32> to vector<1x16x128xf32>
    %31 = vector.shape_cast %30 : vector<1x16x128xf32> to vector<16x128xf32>
    %32 = arith.maximumf %29, %31 : vector<16x128xf32>
    %33 = vector.shape_cast %32 : vector<16x128xf32> to vector<1x16x128xf32>
    %34 = vector.extract_strided_slice %27 {offsets = [2, 0, 0], sizes = [1, 16, 128], strides = [1, 1, 1]} : vector<16x16x128xf32> to vector<1x16x128xf32>
    %35 = vector.shape_cast %34 : vector<1x16x128xf32> to vector<16x128xf32>
    %36 = vector.extract_strided_slice %27 {offsets = [3, 0, 0], sizes = [1, 16, 128], strides = [1, 1, 1]} : vector<16x16x128xf32> to vector<1x16x128xf32>
    %37 = vector.shape_cast %36 : vector<1x16x128xf32> to vector<16x128xf32>
    %38 = arith.maximumf %35, %37 : vector<16x128xf32>
    %39 = vector.extract_strided_slice %27 {offsets = [1, 0, 0], sizes = [1, 16, 128], strides = [1, 1, 1]} : vector<16x16x128xf32> to vector<1x16x128xf32>
    %40 = vector.shape_cast %39 : vector<1x16x128xf32> to vector<16x128xf32>
    %41 = arith.maximumf %38, %40 : vector<16x128xf32>
    %42 = vector.shape_cast %41 : vector<16x128xf32> to vector<1x16x128xf32>
    %43 = vector.extract_strided_slice %27 {offsets = [4, 0, 0], sizes = [1, 16, 128], strides = [1, 1, 1]} : vector<16x16x128xf32> to vector<1x16x128xf32>
    %44 = vector.shape_cast %43 : vector<1x16x128xf32> to vector<16x128xf32>
    %45 = vector.extract_strided_slice %27 {offsets = [5, 0, 0], sizes = [1, 16, 128], strides = [1, 1, 1]} : vector<16x16x128xf32> to vector<1x16x128xf32>
    %46 = vector.shape_cast %45 : vector<1x16x128xf32> to vector<16x128xf32>
    %47 = arith.maximumf %44, %46 : vector<16x128xf32>
    %48 = vector.extract_strided_slice %27 {offsets = [3, 0, 0], sizes = [1, 16, 128], strides = [1, 1, 1]} : vector<16x16x128xf32> to vector<1x16x128xf32>
    %49 = vector.shape_cast %48 : vector<1x16x128xf32> to vector<16x128xf32>
    %50 = arith.maximumf %47, %49 : vector<16x128xf32>
    %51 = vector.shape_cast %50 : vector<16x128xf32> to vector<1x16x128xf32>
    %52 = vector.extract_strided_slice %27 {offsets = [6, 0, 0], sizes = [1, 16, 128], strides = [1, 1, 1]} : vector<16x16x128xf32> to vector<1x16x128xf32>
    %53 = vector.shape_cast %52 : vector<1x16x128xf32> to vector<16x128xf32>
    %54 = vector.extract_strided_slice %27 {offsets = [7, 0, 0], sizes = [1, 16, 128], strides = [1, 1, 1]} : vector<16x16x128xf32> to vector<1x16x128xf32>
    %55 = vector.shape_cast %54 : vector<1x16x128xf32> to vector<16x128xf32>
    %56 = arith.maximumf %53, %55 : vector<16x128xf32>
    %57 = vector.extract_strided_slice %27 {offsets = [5, 0, 0], sizes = [1, 16, 128], strides = [1, 1, 1]} : vector<16x16x128xf32> to vector<1x16x128xf32>
    %58 = vector.shape_cast %57 : vector<1x16x128xf32> to vector<16x128xf32>
    %59 = arith.maximumf %56, %58 : vector<16x128xf32>
    %60 = vector.shape_cast %59 : vector<16x128xf32> to vector<1x16x128xf32>
    %61 = vector.extract_strided_slice %27 {offsets = [8, 0, 0], sizes = [1, 16, 128], strides = [1, 1, 1]} : vector<16x16x128xf32> to vector<1x16x128xf32>
    %62 = vector.shape_cast %61 : vector<1x16x128xf32> to vector<16x128xf32>
    %63 = vector.extract_strided_slice %27 {offsets = [9, 0, 0], sizes = [1, 16, 128], strides = [1, 1, 1]} : vector<16x16x128xf32> to vector<1x16x128xf32>
    %64 = vector.shape_cast %63 : vector<1x16x128xf32> to vector<16x128xf32>
    %65 = arith.maximumf %62, %64 : vector<16x128xf32>
    %66 = vector.extract_strided_slice %27 {offsets = [7, 0, 0], sizes = [1, 16, 128], strides = [1, 1, 1]} : vector<16x16x128xf32> to vector<1x16x128xf32>
    %67 = vector.shape_cast %66 : vector<1x16x128xf32> to vector<16x128xf32>
    %68 = arith.maximumf %65, %67 : vector<16x128xf32>
    %69 = vector.shape_cast %68 : vector<16x128xf32> to vector<1x16x128xf32>
    %70 = vector.extract_strided_slice %27 {offsets = [10, 0, 0], sizes = [1, 16, 128], strides = [1, 1, 1]} : vector<16x16x128xf32> to vector<1x16x128xf32>
    %71 = vector.shape_cast %70 : vector<1x16x128xf32> to vector<16x128xf32>
    %72 = vector.extract_strided_slice %27 {offsets = [11, 0, 0], sizes = [1, 16, 128], strides = [1, 1, 1]} : vector<16x16x128xf32> to vector<1x16x128xf32>
    %73 = vector.shape_cast %72 : vector<1x16x128xf32> to vector<16x128xf32>
    %74 = arith.maximumf %71, %73 : vector<16x128xf32>
    %75 = vector.extract_strided_slice %27 {offsets = [9, 0, 0], sizes = [1, 16, 128], strides = [1, 1, 1]} : vector<16x16x128xf32> to vector<1x16x128xf32>
    %76 = vector.shape_cast %75 : vector<1x16x128xf32> to vector<16x128xf32>
    %77 = arith.maximumf %74, %76 : vector<16x128xf32>
    %78 = vector.shape_cast %77 : vector<16x128xf32> to vector<1x16x128xf32>
    %79 = vector.extract_strided_slice %27 {offsets = [12, 0, 0], sizes = [1, 16, 128], strides = [1, 1, 1]} : vector<16x16x128xf32> to vector<1x16x128xf32>
    %80 = vector.shape_cast %79 : vector<1x16x128xf32> to vector<16x128xf32>
    %81 = vector.extract_strided_slice %27 {offsets = [13, 0, 0], sizes = [1, 16, 128], strides = [1, 1, 1]} : vector<16x16x128xf32> to vector<1x16x128xf32>
    %82 = vector.shape_cast %81 : vector<1x16x128xf32> to vector<16x128xf32>
    %83 = arith.maximumf %80, %82 : vector<16x128xf32>
    %84 = vector.extract_strided_slice %27 {offsets = [11, 0, 0], sizes = [1, 16, 128], strides = [1, 1, 1]} : vector<16x16x128xf32> to vector<1x16x128xf32>
    %85 = vector.shape_cast %84 : vector<1x16x128xf32> to vector<16x128xf32>
    %86 = arith.maximumf %83, %85 : vector<16x128xf32>
    %87 = vector.shape_cast %86 : vector<16x128xf32> to vector<1x16x128xf32>
    %88 = vector.extract_strided_slice %27 {offsets = [14, 0, 0], sizes = [1, 16, 128], strides = [1, 1, 1]} : vector<16x16x128xf32> to vector<1x16x128xf32>
    %89 = vector.shape_cast %88 : vector<1x16x128xf32> to vector<16x128xf32>
    %90 = vector.extract_strided_slice %27 {offsets = [15, 0, 0], sizes = [1, 16, 128], strides = [1, 1, 1]} : vector<16x16x128xf32> to vector<1x16x128xf32>
    %91 = vector.shape_cast %90 : vector<1x16x128xf32> to vector<16x128xf32>
    %92 = arith.maximumf %89, %91 : vector<16x128xf32>
    %93 = vector.extract_strided_slice %27 {offsets = [13, 0, 0], sizes = [1, 16, 128], strides = [1, 1, 1]} : vector<16x16x128xf32> to vector<1x16x128xf32>
    %94 = vector.shape_cast %93 : vector<1x16x128xf32> to vector<16x128xf32>
    %95 = arith.maximumf %92, %94 : vector<16x128xf32>
    %96 = vector.shape_cast %95 : vector<16x128xf32> to vector<1x16x128xf32>
    %97 = tpu.concatenate %33, %42, %51, %60, %69, %78, %87, %96 in 0 : vector<1x16x128xf32>, vector<1x16x128xf32>, vector<1x16x128xf32>, vector<1x16x128xf32>, vector<1x16x128xf32>, vector<1x16x128xf32>, vector<1x16x128xf32>, vector<1x16x128xf32> -> vector<8x16x128xf32>
    %cst_10 = arith.constant 0.000000e+00 : f32
    %98 = vector.broadcast %cst_10 : f32 to vector<8x16x16xf32>
    %99 = tpu.concatenate %98, %97, %98 in 2 : vector<8x16x16xf32>, vector<8x16x128xf32>, vector<8x16x16xf32> -> vector<8x16x160xf32>
    %100 = vector.shape_cast %99 : vector<8x16x160xf32> to vector<128x160xf32>
    %cst_11 = arith.constant 0.000000e+00 : f32
    %101 = vector.broadcast %cst_11 : f32 to vector<16x160xf32>
    %102 = tpu.concatenate %101, %100, %101, %101, %101, %101, %101, %101, %101 in 0 : vector<16x160xf32>, vector<128x160xf32>, vector<16x160xf32>, vector<16x160xf32>, vector<16x160xf32>, vector<16x160xf32>, vector<16x160xf32>, vector<16x160xf32>, vector<16x160xf32> -> vector<256x160xf32>
    %103 = arith.truncf %102 : vector<256x160xf32> to vector<256x160xbf16>
    %c0_12 = arith.constant 0 : index
    %c0_13 = arith.constant 0 : index
    %104 = vector.load %arg4[%c0_12, %c0_13] : memref<160x480xbf16, #tpu.memory_space<vmem>>, vector<160x480xbf16>
    %cst_14 = arith.constant dense<0.000000e+00> : vector<256x480xf32>
    %105 = tpu.matmul %103, %104, %cst_14 {dimension_numbers = #tpu.dot_dimension_numbers<[1], [0], [0], [1], [0, 0, 1, 1], [], []>} : vector<256x160xbf16>, vector<160x480xbf16>, vector<256x480xf32> -> vector<256x480xf32>
    %106 = vector.shape_cast %105 : vector<256x480xf32> to vector<16x16x480xf32>
    %107 = vector.extract_strided_slice %106 {offsets = [0, 0, 0], sizes = [8, 16, 160], strides = [1, 1, 1]} : vector<16x16x480xf32> to vector<8x16x160xf32>
    %108 = vector.extract_strided_slice %106 {offsets = [1, 0, 160], sizes = [8, 16, 160], strides = [1, 1, 1]} : vector<16x16x480xf32> to vector<8x16x160xf32>
    %109 = arith.addf %107, %108 : vector<8x16x160xf32>
    %110 = vector.extract_strided_slice %106 {offsets = [2, 0, 320], sizes = [8, 16, 160], strides = [1, 1, 1]} : vector<16x16x480xf32> to vector<8x16x160xf32>
    %111 = arith.addf %109, %110 : vector<8x16x160xf32>
    %c0_15 = arith.constant 0 : index
    %c0_16 = arith.constant 0 : index
    %112 = vector.load %arg5[%c0_15, %c0_16] : memref<1x160xf32, #tpu.memory_space<vmem>>, vector<1x160xf32>
    %113 = vector.shape_cast %112 : vector<1x160xf32> to vector<1x1x160xf32>
    %114 = vector.broadcast %113 : vector<1x1x160xf32> to vector<8x16x160xf32>
    %115 = arith.addf %111, %114 : vector<8x16x160xf32>
    %cst_17 = arith.constant 0.000000e+00 : f32
    %116 = vector.broadcast %cst_17 : f32 to vector<8x16x160xf32>
    %117 = arith.maximumf %115, %116 : vector<8x16x160xf32>
    %118 = vector.extract_strided_slice %117 {offsets = [0, 0, 0], sizes = [8, 16, 80], strides = [1, 1, 1]} : vector<8x16x160xf32> to vector<8x16x80xf32>
    %119 = vector.extract_strided_slice %117 {offsets = [0, 0, 80], sizes = [8, 16, 80], strides = [1, 1, 1]} : vector<8x16x160xf32> to vector<8x16x80xf32>
    %cst_18 = arith.constant 0.000000e+00 : f32
    %120 = vector.broadcast %cst_18 : f32 to vector<8x16x20xf32>
    %121 = vector.extract_strided_slice %119 {offsets = [0, 0, 0], sizes = [8, 16, 60], strides = [1, 1, 1]} : vector<8x16x80xf32> to vector<8x16x60xf32>
    %122 = tpu.concatenate %120, %121 in 2 : vector<8x16x20xf32>, vector<8x16x60xf32> -> vector<8x16x80xf32>
    %123 = arith.maximumf %118, %119 : vector<8x16x80xf32>
    %124 = arith.maximumf %123, %122 : vector<8x16x80xf32>
    %125 = vector.extract_strided_slice %124 {offsets = [0, 0, 0], sizes = [1, 16, 80], strides = [1, 1, 1]} : vector<8x16x80xf32> to vector<1x16x80xf32>
    %126 = vector.shape_cast %125 : vector<1x16x80xf32> to vector<16x80xf32>
    %127 = vector.extract_strided_slice %124 {offsets = [1, 0, 0], sizes = [1, 16, 80], strides = [1, 1, 1]} : vector<8x16x80xf32> to vector<1x16x80xf32>
    %128 = vector.shape_cast %127 : vector<1x16x80xf32> to vector<16x80xf32>
    %129 = arith.maximumf %126, %128 : vector<16x80xf32>
    %130 = vector.shape_cast %129 : vector<16x80xf32> to vector<1x16x80xf32>
    %131 = vector.extract_strided_slice %124 {offsets = [2, 0, 0], sizes = [1, 16, 80], strides = [1, 1, 1]} : vector<8x16x80xf32> to vector<1x16x80xf32>
    %132 = vector.shape_cast %131 : vector<1x16x80xf32> to vector<16x80xf32>
    %133 = vector.extract_strided_slice %124 {offsets = [3, 0, 0], sizes = [1, 16, 80], strides = [1, 1, 1]} : vector<8x16x80xf32> to vector<1x16x80xf32>
    %134 = vector.shape_cast %133 : vector<1x16x80xf32> to vector<16x80xf32>
    %135 = arith.maximumf %132, %134 : vector<16x80xf32>
    %136 = vector.extract_strided_slice %124 {offsets = [1, 0, 0], sizes = [1, 16, 80], strides = [1, 1, 1]} : vector<8x16x80xf32> to vector<1x16x80xf32>
    %137 = vector.shape_cast %136 : vector<1x16x80xf32> to vector<16x80xf32>
    %138 = arith.maximumf %135, %137 : vector<16x80xf32>
    %139 = vector.shape_cast %138 : vector<16x80xf32> to vector<1x16x80xf32>
    %140 = vector.extract_strided_slice %124 {offsets = [4, 0, 0], sizes = [1, 16, 80], strides = [1, 1, 1]} : vector<8x16x80xf32> to vector<1x16x80xf32>
    %141 = vector.shape_cast %140 : vector<1x16x80xf32> to vector<16x80xf32>
    %142 = vector.extract_strided_slice %124 {offsets = [5, 0, 0], sizes = [1, 16, 80], strides = [1, 1, 1]} : vector<8x16x80xf32> to vector<1x16x80xf32>
    %143 = vector.shape_cast %142 : vector<1x16x80xf32> to vector<16x80xf32>
    %144 = arith.maximumf %141, %143 : vector<16x80xf32>
    %145 = vector.extract_strided_slice %124 {offsets = [3, 0, 0], sizes = [1, 16, 80], strides = [1, 1, 1]} : vector<8x16x80xf32> to vector<1x16x80xf32>
    %146 = vector.shape_cast %145 : vector<1x16x80xf32> to vector<16x80xf32>
    %147 = arith.maximumf %144, %146 : vector<16x80xf32>
    %148 = vector.shape_cast %147 : vector<16x80xf32> to vector<1x16x80xf32>
    %149 = vector.extract_strided_slice %124 {offsets = [6, 0, 0], sizes = [1, 16, 80], strides = [1, 1, 1]} : vector<8x16x80xf32> to vector<1x16x80xf32>
    %150 = vector.shape_cast %149 : vector<1x16x80xf32> to vector<16x80xf32>
    %151 = vector.extract_strided_slice %124 {offsets = [7, 0, 0], sizes = [1, 16, 80], strides = [1, 1, 1]} : vector<8x16x80xf32> to vector<1x16x80xf32>
    %152 = vector.shape_cast %151 : vector<1x16x80xf32> to vector<16x80xf32>
    %153 = arith.maximumf %150, %152 : vector<16x80xf32>
    %154 = vector.extract_strided_slice %124 {offsets = [5, 0, 0], sizes = [1, 16, 80], strides = [1, 1, 1]} : vector<8x16x80xf32> to vector<1x16x80xf32>
    %155 = vector.shape_cast %154 : vector<1x16x80xf32> to vector<16x80xf32>
    %156 = arith.maximumf %153, %155 : vector<16x80xf32>
    %157 = vector.shape_cast %156 : vector<16x80xf32> to vector<1x16x80xf32>
    %158 = tpu.concatenate %130, %139, %148, %157 in 0 : vector<1x16x80xf32>, vector<1x16x80xf32>, vector<1x16x80xf32>, vector<1x16x80xf32> -> vector<4x16x80xf32>
    %cst_19 = arith.constant 0.000000e+00 : f32
    %159 = vector.broadcast %cst_19 : f32 to vector<4x16x20xf32>
    %160 = tpu.concatenate %159, %158, %159 in 2 : vector<4x16x20xf32>, vector<4x16x80xf32>, vector<4x16x20xf32> -> vector<4x16x120xf32>
    %161 = vector.shape_cast %160 : vector<4x16x120xf32> to vector<64x120xf32>
    %cst_20 = arith.constant 0.000000e+00 : f32
    %162 = vector.broadcast %cst_20 : f32 to vector<16x120xf32>
    %163 = tpu.concatenate %162, %161, %162, %162, %162 in 0 : vector<16x120xf32>, vector<64x120xf32>, vector<16x120xf32>, vector<16x120xf32>, vector<16x120xf32> -> vector<128x120xf32>
    %164 = arith.truncf %163 : vector<128x120xf32> to vector<128x120xbf16>
    %c0_21 = arith.constant 0 : index
    %c0_22 = arith.constant 0 : index
    %165 = vector.load %arg6[%c0_21, %c0_22] : memref<120x288xbf16, #tpu.memory_space<vmem>>, vector<120x288xbf16>
    %cst_23 = arith.constant dense<0.000000e+00> : vector<128x288xf32>
    %166 = tpu.matmul %164, %165, %cst_23 {dimension_numbers = #tpu.dot_dimension_numbers<[1], [0], [0], [1], [0, 0, 1, 1], [], []>} : vector<128x120xbf16>, vector<120x288xbf16>, vector<128x288xf32> -> vector<128x288xf32>
    %167 = vector.shape_cast %166 : vector<128x288xf32> to vector<8x16x288xf32>
    %168 = vector.extract_strided_slice %167 {offsets = [0, 0, 0], sizes = [4, 16, 96], strides = [1, 1, 1]} : vector<8x16x288xf32> to vector<4x16x96xf32>
    %169 = vector.extract_strided_slice %167 {offsets = [1, 0, 96], sizes = [4, 16, 96], strides = [1, 1, 1]} : vector<8x16x288xf32> to vector<4x16x96xf32>
    %170 = arith.addf %168, %169 : vector<4x16x96xf32>
    %171 = vector.extract_strided_slice %167 {offsets = [2, 0, 192], sizes = [4, 16, 96], strides = [1, 1, 1]} : vector<8x16x288xf32> to vector<4x16x96xf32>
    %172 = arith.addf %170, %171 : vector<4x16x96xf32>
    %c0_24 = arith.constant 0 : index
    %c0_25 = arith.constant 0 : index
    %173 = vector.load %arg7[%c0_24, %c0_25] : memref<1x96xf32, #tpu.memory_space<vmem>>, vector<1x96xf32>
    %174 = vector.shape_cast %173 : vector<1x96xf32> to vector<1x1x96xf32>
    %175 = vector.broadcast %174 : vector<1x1x96xf32> to vector<4x16x96xf32>
    %176 = arith.addf %172, %175 : vector<4x16x96xf32>
    %cst_26 = arith.constant 0.000000e+00 : f32
    %177 = vector.broadcast %cst_26 : f32 to vector<4x16x96xf32>
    %178 = arith.maximumf %176, %177 : vector<4x16x96xf32>
    %179 = vector.extract_strided_slice %178 {offsets = [0, 0, 0], sizes = [4, 16, 48], strides = [1, 1, 1]} : vector<4x16x96xf32> to vector<4x16x48xf32>
    %180 = vector.extract_strided_slice %178 {offsets = [0, 0, 48], sizes = [4, 16, 48], strides = [1, 1, 1]} : vector<4x16x96xf32> to vector<4x16x48xf32>
    %cst_27 = arith.constant 0.000000e+00 : f32
    %181 = vector.broadcast %cst_27 : f32 to vector<4x16x24xf32>
    %182 = vector.extract_strided_slice %180 {offsets = [0, 0, 0], sizes = [4, 16, 24], strides = [1, 1, 1]} : vector<4x16x48xf32> to vector<4x16x24xf32>
    %183 = tpu.concatenate %181, %182 in 2 : vector<4x16x24xf32>, vector<4x16x24xf32> -> vector<4x16x48xf32>
    %184 = arith.maximumf %179, %180 : vector<4x16x48xf32>
    %185 = arith.maximumf %184, %183 : vector<4x16x48xf32>
    %186 = vector.extract_strided_slice %185 {offsets = [0, 0, 0], sizes = [1, 16, 48], strides = [1, 1, 1]} : vector<4x16x48xf32> to vector<1x16x48xf32>
    %187 = vector.shape_cast %186 : vector<1x16x48xf32> to vector<16x48xf32>
    %188 = vector.extract_strided_slice %185 {offsets = [1, 0, 0], sizes = [1, 16, 48], strides = [1, 1, 1]} : vector<4x16x48xf32> to vector<1x16x48xf32>
    %189 = vector.shape_cast %188 : vector<1x16x48xf32> to vector<16x48xf32>
    %190 = arith.maximumf %187, %189 : vector<16x48xf32>
    %191 = vector.shape_cast %190 : vector<16x48xf32> to vector<1x16x48xf32>
    %192 = vector.extract_strided_slice %185 {offsets = [2, 0, 0], sizes = [1, 16, 48], strides = [1, 1, 1]} : vector<4x16x48xf32> to vector<1x16x48xf32>
    %193 = vector.shape_cast %192 : vector<1x16x48xf32> to vector<16x48xf32>
    %194 = vector.extract_strided_slice %185 {offsets = [3, 0, 0], sizes = [1, 16, 48], strides = [1, 1, 1]} : vector<4x16x48xf32> to vector<1x16x48xf32>
    %195 = vector.shape_cast %194 : vector<1x16x48xf32> to vector<16x48xf32>
    %196 = arith.maximumf %193, %195 : vector<16x48xf32>
    %197 = vector.extract_strided_slice %185 {offsets = [1, 0, 0], sizes = [1, 16, 48], strides = [1, 1, 1]} : vector<4x16x48xf32> to vector<1x16x48xf32>
    %198 = vector.shape_cast %197 : vector<1x16x48xf32> to vector<16x48xf32>
    %199 = arith.maximumf %196, %198 : vector<16x48xf32>
    %200 = vector.shape_cast %199 : vector<16x48xf32> to vector<1x16x48xf32>
    %201 = tpu.concatenate %191, %200 in 0 : vector<1x16x48xf32>, vector<1x16x48xf32> -> vector<2x16x48xf32>
    %202 = vector.extract_strided_slice %201 {offsets = [0, 0, 0], sizes = [1, 16, 48], strides = [1, 1, 1]} : vector<2x16x48xf32> to vector<1x16x48xf32>
    %203 = vector.shape_cast %202 : vector<1x16x48xf32> to vector<16x48xf32>
    %204 = arith.truncf %203 : vector<16x48xf32> to vector<16x48xbf16>
    %c0_28 = arith.constant 0 : index
    %c0_29 = arith.constant 0 : index
    %c0_30 = arith.constant 0 : index
    %205 = vector.load %arg8[%c0_28, %c0_29, %c0_30] : memref<2x48x128xbf16, #tpu.memory_space<vmem>>, vector<1x48x128xbf16>
    %206 = vector.shape_cast %205 : vector<1x48x128xbf16> to vector<48x128xbf16>
    %cst_31 = arith.constant dense<0.000000e+00> : vector<16x128xf32>
    %207 = tpu.matmul %204, %206, %cst_31 {dimension_numbers = #tpu.dot_dimension_numbers<[1], [0], [0], [1], [0, 0, 1, 1], [], []>} : vector<16x48xbf16>, vector<48x128xbf16>, vector<16x128xf32> -> vector<16x128xf32>
    %208 = vector.extract_strided_slice %201 {offsets = [1, 0, 0], sizes = [1, 16, 48], strides = [1, 1, 1]} : vector<2x16x48xf32> to vector<1x16x48xf32>
    %209 = vector.shape_cast %208 : vector<1x16x48xf32> to vector<16x48xf32>
    %210 = arith.truncf %209 : vector<16x48xf32> to vector<16x48xbf16>
    %c1 = arith.constant 1 : index
    %c0_32 = arith.constant 0 : index
    %c0_33 = arith.constant 0 : index
    %211 = vector.load %arg8[%c1, %c0_32, %c0_33] : memref<2x48x128xbf16, #tpu.memory_space<vmem>>, vector<1x48x128xbf16>
    %212 = vector.shape_cast %211 : vector<1x48x128xbf16> to vector<48x128xbf16>
    %cst_34 = arith.constant dense<0.000000e+00> : vector<16x128xf32>
    %213 = tpu.matmul %210, %212, %cst_34 {dimension_numbers = #tpu.dot_dimension_numbers<[1], [0], [0], [1], [0, 0, 1, 1], [], []>} : vector<16x48xbf16>, vector<48x128xbf16>, vector<16x128xf32> -> vector<16x128xf32>
    %214 = arith.addf %207, %213 : vector<16x128xf32>
    %c0_35 = arith.constant 0 : index
    %c0_36 = arith.constant 0 : index
    %215 = vector.load %arg9[%c0_35, %c0_36] : memref<1x128xf32, #tpu.memory_space<vmem>>, vector<1x128xf32>
    %216 = vector.broadcast %215 : vector<1x128xf32> to vector<16x128xf32>
    %217 = arith.addf %214, %216 : vector<16x128xf32>
    %cst_37 = arith.constant 0.000000e+00 : f32
    %218 = vector.broadcast %cst_37 : f32 to vector<16x128xf32>
    %219 = arith.maximumf %217, %218 : vector<16x128xf32>
    %220 = arith.truncf %219 : vector<16x128xf32> to vector<16x128xbf16>
    %c0_38 = arith.constant 0 : index
    %c0_39 = arith.constant 0 : index
    %221 = vector.load %arg10[%c0_38, %c0_39] : memref<128x256xbf16, #tpu.memory_space<vmem>>, vector<128x256xbf16>
    %cst_40 = arith.constant dense<0.000000e+00> : vector<16x256xf32>
    %222 = tpu.matmul %220, %221, %cst_40 {dimension_numbers = #tpu.dot_dimension_numbers<[1], [0], [0], [1], [0, 0, 1, 1], [], []>} : vector<16x128xbf16>, vector<128x256xbf16>, vector<16x256xf32> -> vector<16x256xf32>
    %c0_41 = arith.constant 0 : index
    %c0_42 = arith.constant 0 : index
    %223 = vector.load %arg12[%c0_41, %c0_42] : memref<1x256xf32, #tpu.memory_space<vmem>>, vector<1x256xf32>
    %224 = vector.broadcast %223 : vector<1x256xf32> to vector<16x256xf32>
    %225 = arith.addf %222, %224 : vector<16x256xf32>
    %c0_43 = arith.constant 0 : index
    %c0_44 = arith.constant 0 : index
    %226 = vector.load %arg11[%c0_43, %c0_44] : memref<64x256xbf16, #tpu.memory_space<vmem>>, vector<64x256xbf16>
    %cst_45 = arith.constant 0.000000e+00 : f32
    %227 = vector.broadcast %cst_45 : f32 to vector<2x64xf32>
    %cst_46 = arith.constant 0.000000e+00 : f32
    %228 = vector.broadcast %cst_46 : f32 to vector<2x64xf32>
    %229 = vector.extract_strided_slice %225 {offsets = [0, 0], sizes = [2, 256], strides = [1, 1]} : vector<16x256xf32> to vector<2x256xf32>
    %230 = arith.truncf %227 : vector<2x64xf32> to vector<2x64xbf16>
    %cst_47 = arith.constant dense<0.000000e+00> : vector<2x256xf32>
    %231 = tpu.matmul %230, %226, %cst_47 {dimension_numbers = #tpu.dot_dimension_numbers<[1], [0], [0], [1], [0, 0, 1, 1], [], []>} : vector<2x64xbf16>, vector<64x256xbf16>, vector<2x256xf32> -> vector<2x256xf32>
    %232 = arith.addf %229, %231 : vector<2x256xf32>
    %233 = vector.extract_strided_slice %232 {offsets = [0, 0], sizes = [2, 64], strides = [1, 1]} : vector<2x256xf32> to vector<2x64xf32>
    %234 = arith.negf %233 : vector<2x64xf32>
    %235 = math.exp %234 : vector<2x64xf32>
    %cst_48 = arith.constant 1.000000e+00 : f32
    %236 = vector.broadcast %cst_48 : f32 to vector<2x64xf32>
    %237 = arith.addf %236, %235 : vector<2x64xf32>
    %238 = arith.divf %236, %237 : vector<2x64xf32>
    %239 = vector.extract_strided_slice %232 {offsets = [0, 64], sizes = [2, 64], strides = [1, 1]} : vector<2x256xf32> to vector<2x64xf32>
    %240 = arith.negf %239 : vector<2x64xf32>
    %241 = math.exp %240 : vector<2x64xf32>
    %cst_49 = arith.constant 1.000000e+00 : f32
    %242 = vector.broadcast %cst_49 : f32 to vector<2x64xf32>
    %243 = arith.addf %242, %241 : vector<2x64xf32>
    %244 = arith.divf %242, %243 : vector<2x64xf32>
    %245 = vector.extract_strided_slice %232 {offsets = [0, 128], sizes = [2, 64], strides = [1, 1]} : vector<2x256xf32> to vector<2x64xf32>
    %246 = math.tanh %245 : vector<2x64xf32>
    %247 = vector.extract_strided_slice %232 {offsets = [0, 192], sizes = [2, 64], strides = [1, 1]} : vector<2x256xf32> to vector<2x64xf32>
    %248 = arith.negf %247 : vector<2x64xf32>
    %249 = math.exp %248 : vector<2x64xf32>
    %cst_50 = arith.constant 1.000000e+00 : f32
    %250 = vector.broadcast %cst_50 : f32 to vector<2x64xf32>
    %251 = arith.addf %250, %249 : vector<2x64xf32>
    %252 = arith.divf %250, %251 : vector<2x64xf32>
    %253 = arith.mulf %244, %228 : vector<2x64xf32>
    %254 = arith.mulf %238, %246 : vector<2x64xf32>
    %255 = arith.addf %253, %254 : vector<2x64xf32>
    %256 = math.tanh %255 : vector<2x64xf32>
    %257 = arith.mulf %252, %256 : vector<2x64xf32>
    %258 = vector.extract_strided_slice %225 {offsets = [2, 0], sizes = [2, 256], strides = [1, 1]} : vector<16x256xf32> to vector<2x256xf32>
    %259 = arith.truncf %257 : vector<2x64xf32> to vector<2x64xbf16>
    %cst_51 = arith.constant dense<0.000000e+00> : vector<2x256xf32>
    %260 = tpu.matmul %259, %226, %cst_51 {dimension_numbers = #tpu.dot_dimension_numbers<[1], [0], [0], [1], [0, 0, 1, 1], [], []>} : vector<2x64xbf16>, vector<64x256xbf16>, vector<2x256xf32> -> vector<2x256xf32>
    %261 = arith.addf %258, %260 : vector<2x256xf32>
    %262 = vector.extract_strided_slice %261 {offsets = [0, 0], sizes = [2, 64], strides = [1, 1]} : vector<2x256xf32> to vector<2x64xf32>
    %263 = arith.negf %262 : vector<2x64xf32>
    %264 = math.exp %263 : vector<2x64xf32>
    %cst_52 = arith.constant 1.000000e+00 : f32
    %265 = vector.broadcast %cst_52 : f32 to vector<2x64xf32>
    %266 = arith.addf %265, %264 : vector<2x64xf32>
    %267 = arith.divf %265, %266 : vector<2x64xf32>
    %268 = vector.extract_strided_slice %261 {offsets = [0, 64], sizes = [2, 64], strides = [1, 1]} : vector<2x256xf32> to vector<2x64xf32>
    %269 = arith.negf %268 : vector<2x64xf32>
    %270 = math.exp %269 : vector<2x64xf32>
    %cst_53 = arith.constant 1.000000e+00 : f32
    %271 = vector.broadcast %cst_53 : f32 to vector<2x64xf32>
    %272 = arith.addf %271, %270 : vector<2x64xf32>
    %273 = arith.divf %271, %272 : vector<2x64xf32>
    %274 = vector.extract_strided_slice %261 {offsets = [0, 128], sizes = [2, 64], strides = [1, 1]} : vector<2x256xf32> to vector<2x64xf32>
    %275 = math.tanh %274 : vector<2x64xf32>
    %276 = vector.extract_strided_slice %261 {offsets = [0, 192], sizes = [2, 64], strides = [1, 1]} : vector<2x256xf32> to vector<2x64xf32>
    %277 = arith.negf %276 : vector<2x64xf32>
    %278 = math.exp %277 : vector<2x64xf32>
    %cst_54 = arith.constant 1.000000e+00 : f32
    %279 = vector.broadcast %cst_54 : f32 to vector<2x64xf32>
    %280 = arith.addf %279, %278 : vector<2x64xf32>
    %281 = arith.divf %279, %280 : vector<2x64xf32>
    %282 = arith.mulf %273, %255 : vector<2x64xf32>
    %283 = arith.mulf %267, %275 : vector<2x64xf32>
    %284 = arith.addf %282, %283 : vector<2x64xf32>
    %285 = math.tanh %284 : vector<2x64xf32>
    %286 = arith.mulf %281, %285 : vector<2x64xf32>
    %287 = vector.extract_strided_slice %225 {offsets = [4, 0], sizes = [2, 256], strides = [1, 1]} : vector<16x256xf32> to vector<2x256xf32>
    %288 = arith.truncf %286 : vector<2x64xf32> to vector<2x64xbf16>
    %cst_55 = arith.constant dense<0.000000e+00> : vector<2x256xf32>
    %289 = tpu.matmul %288, %226, %cst_55 {dimension_numbers = #tpu.dot_dimension_numbers<[1], [0], [0], [1], [0, 0, 1, 1], [], []>} : vector<2x64xbf16>, vector<64x256xbf16>, vector<2x256xf32> -> vector<2x256xf32>
    %290 = arith.addf %287, %289 : vector<2x256xf32>
    %291 = vector.extract_strided_slice %290 {offsets = [0, 0], sizes = [2, 64], strides = [1, 1]} : vector<2x256xf32> to vector<2x64xf32>
    %292 = arith.negf %291 : vector<2x64xf32>
    %293 = math.exp %292 : vector<2x64xf32>
    %cst_56 = arith.constant 1.000000e+00 : f32
    %294 = vector.broadcast %cst_56 : f32 to vector<2x64xf32>
    %295 = arith.addf %294, %293 : vector<2x64xf32>
    %296 = arith.divf %294, %295 : vector<2x64xf32>
    %297 = vector.extract_strided_slice %290 {offsets = [0, 64], sizes = [2, 64], strides = [1, 1]} : vector<2x256xf32> to vector<2x64xf32>
    %298 = arith.negf %297 : vector<2x64xf32>
    %299 = math.exp %298 : vector<2x64xf32>
    %cst_57 = arith.constant 1.000000e+00 : f32
    %300 = vector.broadcast %cst_57 : f32 to vector<2x64xf32>
    %301 = arith.addf %300, %299 : vector<2x64xf32>
    %302 = arith.divf %300, %301 : vector<2x64xf32>
    %303 = vector.extract_strided_slice %290 {offsets = [0, 128], sizes = [2, 64], strides = [1, 1]} : vector<2x256xf32> to vector<2x64xf32>
    %304 = math.tanh %303 : vector<2x64xf32>
    %305 = vector.extract_strided_slice %290 {offsets = [0, 192], sizes = [2, 64], strides = [1, 1]} : vector<2x256xf32> to vector<2x64xf32>
    %306 = arith.negf %305 : vector<2x64xf32>
    %307 = math.exp %306 : vector<2x64xf32>
    %cst_58 = arith.constant 1.000000e+00 : f32
    %308 = vector.broadcast %cst_58 : f32 to vector<2x64xf32>
    %309 = arith.addf %308, %307 : vector<2x64xf32>
    %310 = arith.divf %308, %309 : vector<2x64xf32>
    %311 = arith.mulf %302, %284 : vector<2x64xf32>
    %312 = arith.mulf %296, %304 : vector<2x64xf32>
    %313 = arith.addf %311, %312 : vector<2x64xf32>
    %314 = math.tanh %313 : vector<2x64xf32>
    %315 = arith.mulf %310, %314 : vector<2x64xf32>
    %316 = vector.extract_strided_slice %225 {offsets = [6, 0], sizes = [2, 256], strides = [1, 1]} : vector<16x256xf32> to vector<2x256xf32>
    %317 = arith.truncf %315 : vector<2x64xf32> to vector<2x64xbf16>
    %cst_59 = arith.constant dense<0.000000e+00> : vector<2x256xf32>
    %318 = tpu.matmul %317, %226, %cst_59 {dimension_numbers = #tpu.dot_dimension_numbers<[1], [0], [0], [1], [0, 0, 1, 1], [], []>} : vector<2x64xbf16>, vector<64x256xbf16>, vector<2x256xf32> -> vector<2x256xf32>
    %319 = arith.addf %316, %318 : vector<2x256xf32>
    %320 = vector.extract_strided_slice %319 {offsets = [0, 0], sizes = [2, 64], strides = [1, 1]} : vector<2x256xf32> to vector<2x64xf32>
    %321 = arith.negf %320 : vector<2x64xf32>
    %322 = math.exp %321 : vector<2x64xf32>
    %cst_60 = arith.constant 1.000000e+00 : f32
    %323 = vector.broadcast %cst_60 : f32 to vector<2x64xf32>
    %324 = arith.addf %323, %322 : vector<2x64xf32>
    %325 = arith.divf %323, %324 : vector<2x64xf32>
    %326 = vector.extract_strided_slice %319 {offsets = [0, 64], sizes = [2, 64], strides = [1, 1]} : vector<2x256xf32> to vector<2x64xf32>
    %327 = arith.negf %326 : vector<2x64xf32>
    %328 = math.exp %327 : vector<2x64xf32>
    %cst_61 = arith.constant 1.000000e+00 : f32
    %329 = vector.broadcast %cst_61 : f32 to vector<2x64xf32>
    %330 = arith.addf %329, %328 : vector<2x64xf32>
    %331 = arith.divf %329, %330 : vector<2x64xf32>
    %332 = vector.extract_strided_slice %319 {offsets = [0, 128], sizes = [2, 64], strides = [1, 1]} : vector<2x256xf32> to vector<2x64xf32>
    %333 = math.tanh %332 : vector<2x64xf32>
    %334 = vector.extract_strided_slice %319 {offsets = [0, 192], sizes = [2, 64], strides = [1, 1]} : vector<2x256xf32> to vector<2x64xf32>
    %335 = arith.negf %334 : vector<2x64xf32>
    %336 = math.exp %335 : vector<2x64xf32>
    %cst_62 = arith.constant 1.000000e+00 : f32
    %337 = vector.broadcast %cst_62 : f32 to vector<2x64xf32>
    %338 = arith.addf %337, %336 : vector<2x64xf32>
    %339 = arith.divf %337, %338 : vector<2x64xf32>
    %340 = arith.mulf %331, %313 : vector<2x64xf32>
    %341 = arith.mulf %325, %333 : vector<2x64xf32>
    %342 = arith.addf %340, %341 : vector<2x64xf32>
    %343 = math.tanh %342 : vector<2x64xf32>
    %344 = arith.mulf %339, %343 : vector<2x64xf32>
    %345 = vector.extract_strided_slice %225 {offsets = [8, 0], sizes = [2, 256], strides = [1, 1]} : vector<16x256xf32> to vector<2x256xf32>
    %346 = arith.truncf %344 : vector<2x64xf32> to vector<2x64xbf16>
    %cst_63 = arith.constant dense<0.000000e+00> : vector<2x256xf32>
    %347 = tpu.matmul %346, %226, %cst_63 {dimension_numbers = #tpu.dot_dimension_numbers<[1], [0], [0], [1], [0, 0, 1, 1], [], []>} : vector<2x64xbf16>, vector<64x256xbf16>, vector<2x256xf32> -> vector<2x256xf32>
    %348 = arith.addf %345, %347 : vector<2x256xf32>
    %349 = vector.extract_strided_slice %348 {offsets = [0, 0], sizes = [2, 64], strides = [1, 1]} : vector<2x256xf32> to vector<2x64xf32>
    %350 = arith.negf %349 : vector<2x64xf32>
    %351 = math.exp %350 : vector<2x64xf32>
    %cst_64 = arith.constant 1.000000e+00 : f32
    %352 = vector.broadcast %cst_64 : f32 to vector<2x64xf32>
    %353 = arith.addf %352, %351 : vector<2x64xf32>
    %354 = arith.divf %352, %353 : vector<2x64xf32>
    %355 = vector.extract_strided_slice %348 {offsets = [0, 64], sizes = [2, 64], strides = [1, 1]} : vector<2x256xf32> to vector<2x64xf32>
    %356 = arith.negf %355 : vector<2x64xf32>
    %357 = math.exp %356 : vector<2x64xf32>
    %cst_65 = arith.constant 1.000000e+00 : f32
    %358 = vector.broadcast %cst_65 : f32 to vector<2x64xf32>
    %359 = arith.addf %358, %357 : vector<2x64xf32>
    %360 = arith.divf %358, %359 : vector<2x64xf32>
    %361 = vector.extract_strided_slice %348 {offsets = [0, 128], sizes = [2, 64], strides = [1, 1]} : vector<2x256xf32> to vector<2x64xf32>
    %362 = math.tanh %361 : vector<2x64xf32>
    %363 = vector.extract_strided_slice %348 {offsets = [0, 192], sizes = [2, 64], strides = [1, 1]} : vector<2x256xf32> to vector<2x64xf32>
    %364 = arith.negf %363 : vector<2x64xf32>
    %365 = math.exp %364 : vector<2x64xf32>
    %cst_66 = arith.constant 1.000000e+00 : f32
    %366 = vector.broadcast %cst_66 : f32 to vector<2x64xf32>
    %367 = arith.addf %366, %365 : vector<2x64xf32>
    %368 = arith.divf %366, %367 : vector<2x64xf32>
    %369 = arith.mulf %360, %342 : vector<2x64xf32>
    %370 = arith.mulf %354, %362 : vector<2x64xf32>
    %371 = arith.addf %369, %370 : vector<2x64xf32>
    %372 = math.tanh %371 : vector<2x64xf32>
    %373 = arith.mulf %368, %372 : vector<2x64xf32>
    %374 = vector.extract_strided_slice %225 {offsets = [10, 0], sizes = [2, 256], strides = [1, 1]} : vector<16x256xf32> to vector<2x256xf32>
    %375 = arith.truncf %373 : vector<2x64xf32> to vector<2x64xbf16>
    %cst_67 = arith.constant dense<0.000000e+00> : vector<2x256xf32>
    %376 = tpu.matmul %375, %226, %cst_67 {dimension_numbers = #tpu.dot_dimension_numbers<[1], [0], [0], [1], [0, 0, 1, 1], [], []>} : vector<2x64xbf16>, vector<64x256xbf16>, vector<2x256xf32> -> vector<2x256xf32>
    %377 = arith.addf %374, %376 : vector<2x256xf32>
    %378 = vector.extract_strided_slice %377 {offsets = [0, 0], sizes = [2, 64], strides = [1, 1]} : vector<2x256xf32> to vector<2x64xf32>
    %379 = arith.negf %378 : vector<2x64xf32>
    %380 = math.exp %379 : vector<2x64xf32>
    %cst_68 = arith.constant 1.000000e+00 : f32
    %381 = vector.broadcast %cst_68 : f32 to vector<2x64xf32>
    %382 = arith.addf %381, %380 : vector<2x64xf32>
    %383 = arith.divf %381, %382 : vector<2x64xf32>
    %384 = vector.extract_strided_slice %377 {offsets = [0, 64], sizes = [2, 64], strides = [1, 1]} : vector<2x256xf32> to vector<2x64xf32>
    %385 = arith.negf %384 : vector<2x64xf32>
    %386 = math.exp %385 : vector<2x64xf32>
    %cst_69 = arith.constant 1.000000e+00 : f32
    %387 = vector.broadcast %cst_69 : f32 to vector<2x64xf32>
    %388 = arith.addf %387, %386 : vector<2x64xf32>
    %389 = arith.divf %387, %388 : vector<2x64xf32>
    %390 = vector.extract_strided_slice %377 {offsets = [0, 128], sizes = [2, 64], strides = [1, 1]} : vector<2x256xf32> to vector<2x64xf32>
    %391 = math.tanh %390 : vector<2x64xf32>
    %392 = vector.extract_strided_slice %377 {offsets = [0, 192], sizes = [2, 64], strides = [1, 1]} : vector<2x256xf32> to vector<2x64xf32>
    %393 = arith.negf %392 : vector<2x64xf32>
    %394 = math.exp %393 : vector<2x64xf32>
    %cst_70 = arith.constant 1.000000e+00 : f32
    %395 = vector.broadcast %cst_70 : f32 to vector<2x64xf32>
    %396 = arith.addf %395, %394 : vector<2x64xf32>
    %397 = arith.divf %395, %396 : vector<2x64xf32>
    %398 = arith.mulf %389, %371 : vector<2x64xf32>
    %399 = arith.mulf %383, %391 : vector<2x64xf32>
    %400 = arith.addf %398, %399 : vector<2x64xf32>
    %401 = math.tanh %400 : vector<2x64xf32>
    %402 = arith.mulf %397, %401 : vector<2x64xf32>
    %403 = vector.extract_strided_slice %225 {offsets = [12, 0], sizes = [2, 256], strides = [1, 1]} : vector<16x256xf32> to vector<2x256xf32>
    %404 = arith.truncf %402 : vector<2x64xf32> to vector<2x64xbf16>
    %cst_71 = arith.constant dense<0.000000e+00> : vector<2x256xf32>
    %405 = tpu.matmul %404, %226, %cst_71 {dimension_numbers = #tpu.dot_dimension_numbers<[1], [0], [0], [1], [0, 0, 1, 1], [], []>} : vector<2x64xbf16>, vector<64x256xbf16>, vector<2x256xf32> -> vector<2x256xf32>
    %406 = arith.addf %403, %405 : vector<2x256xf32>
    %407 = vector.extract_strided_slice %406 {offsets = [0, 0], sizes = [2, 64], strides = [1, 1]} : vector<2x256xf32> to vector<2x64xf32>
    %408 = arith.negf %407 : vector<2x64xf32>
    %409 = math.exp %408 : vector<2x64xf32>
    %cst_72 = arith.constant 1.000000e+00 : f32
    %410 = vector.broadcast %cst_72 : f32 to vector<2x64xf32>
    %411 = arith.addf %410, %409 : vector<2x64xf32>
    %412 = arith.divf %410, %411 : vector<2x64xf32>
    %413 = vector.extract_strided_slice %406 {offsets = [0, 64], sizes = [2, 64], strides = [1, 1]} : vector<2x256xf32> to vector<2x64xf32>
    %414 = arith.negf %413 : vector<2x64xf32>
    %415 = math.exp %414 : vector<2x64xf32>
    %cst_73 = arith.constant 1.000000e+00 : f32
    %416 = vector.broadcast %cst_73 : f32 to vector<2x64xf32>
    %417 = arith.addf %416, %415 : vector<2x64xf32>
    %418 = arith.divf %416, %417 : vector<2x64xf32>
    %419 = vector.extract_strided_slice %406 {offsets = [0, 128], sizes = [2, 64], strides = [1, 1]} : vector<2x256xf32> to vector<2x64xf32>
    %420 = math.tanh %419 : vector<2x64xf32>
    %421 = vector.extract_strided_slice %406 {offsets = [0, 192], sizes = [2, 64], strides = [1, 1]} : vector<2x256xf32> to vector<2x64xf32>
    %422 = arith.negf %421 : vector<2x64xf32>
    %423 = math.exp %422 : vector<2x64xf32>
    %cst_74 = arith.constant 1.000000e+00 : f32
    %424 = vector.broadcast %cst_74 : f32 to vector<2x64xf32>
    %425 = arith.addf %424, %423 : vector<2x64xf32>
    %426 = arith.divf %424, %425 : vector<2x64xf32>
    %427 = arith.mulf %418, %400 : vector<2x64xf32>
    %428 = arith.mulf %412, %420 : vector<2x64xf32>
    %429 = arith.addf %427, %428 : vector<2x64xf32>
    %430 = math.tanh %429 : vector<2x64xf32>
    %431 = arith.mulf %426, %430 : vector<2x64xf32>
    %432 = vector.extract_strided_slice %225 {offsets = [14, 0], sizes = [2, 256], strides = [1, 1]} : vector<16x256xf32> to vector<2x256xf32>
    %433 = arith.truncf %431 : vector<2x64xf32> to vector<2x64xbf16>
    %cst_75 = arith.constant dense<0.000000e+00> : vector<2x256xf32>
    %434 = tpu.matmul %433, %226, %cst_75 {dimension_numbers = #tpu.dot_dimension_numbers<[1], [0], [0], [1], [0, 0, 1, 1], [], []>} : vector<2x64xbf16>, vector<64x256xbf16>, vector<2x256xf32> -> vector<2x256xf32>
    %435 = arith.addf %432, %434 : vector<2x256xf32>
    %436 = vector.extract_strided_slice %435 {offsets = [0, 0], sizes = [2, 64], strides = [1, 1]} : vector<2x256xf32> to vector<2x64xf32>
    %437 = arith.negf %436 : vector<2x64xf32>
    %438 = math.exp %437 : vector<2x64xf32>
    %cst_76 = arith.constant 1.000000e+00 : f32
    %439 = vector.broadcast %cst_76 : f32 to vector<2x64xf32>
    %440 = arith.addf %439, %438 : vector<2x64xf32>
    %441 = arith.divf %439, %440 : vector<2x64xf32>
    %442 = vector.extract_strided_slice %435 {offsets = [0, 64], sizes = [2, 64], strides = [1, 1]} : vector<2x256xf32> to vector<2x64xf32>
    %443 = arith.negf %442 : vector<2x64xf32>
    %444 = math.exp %443 : vector<2x64xf32>
    %cst_77 = arith.constant 1.000000e+00 : f32
    %445 = vector.broadcast %cst_77 : f32 to vector<2x64xf32>
    %446 = arith.addf %445, %444 : vector<2x64xf32>
    %447 = arith.divf %445, %446 : vector<2x64xf32>
    %448 = vector.extract_strided_slice %435 {offsets = [0, 128], sizes = [2, 64], strides = [1, 1]} : vector<2x256xf32> to vector<2x64xf32>
    %449 = math.tanh %448 : vector<2x64xf32>
    %450 = vector.extract_strided_slice %435 {offsets = [0, 192], sizes = [2, 64], strides = [1, 1]} : vector<2x256xf32> to vector<2x64xf32>
    %451 = arith.negf %450 : vector<2x64xf32>
    %452 = math.exp %451 : vector<2x64xf32>
    %cst_78 = arith.constant 1.000000e+00 : f32
    %453 = vector.broadcast %cst_78 : f32 to vector<2x64xf32>
    %454 = arith.addf %453, %452 : vector<2x64xf32>
    %455 = arith.divf %453, %454 : vector<2x64xf32>
    %456 = arith.mulf %447, %429 : vector<2x64xf32>
    %457 = arith.mulf %441, %449 : vector<2x64xf32>
    %458 = arith.addf %456, %457 : vector<2x64xf32>
    %459 = math.tanh %458 : vector<2x64xf32>
    %460 = arith.mulf %455, %459 : vector<2x64xf32>
    %461 = arith.truncf %460 : vector<2x64xf32> to vector<2x64xbf16>
    %c0_79 = arith.constant 0 : index
    %c0_80 = arith.constant 0 : index
    %462 = vector.load %arg13[%c0_79, %c0_80] : memref<64x2xbf16, #tpu.memory_space<vmem>>, vector<64x2xbf16>
    %cst_81 = arith.constant dense<0.000000e+00> : vector<2x2xf32>
    %463 = tpu.matmul %461, %462, %cst_81 {dimension_numbers = #tpu.dot_dimension_numbers<[1], [0], [0], [1], [0, 0, 1, 1], [], []>} : vector<2x64xbf16>, vector<64x2xbf16>, vector<2x2xf32> -> vector<2x2xf32>
    %c0_82 = arith.constant 0 : index
    %c0_83 = arith.constant 0 : index
    %464 = vector.load %arg14[%c0_82, %c0_83] : memref<1x2xf32, #tpu.memory_space<vmem>>, vector<1x2xf32>
    %465 = vector.broadcast %464 : vector<1x2xf32> to vector<2x2xf32>
    %466 = arith.addf %463, %465 : vector<2x2xf32>
    %cst_84 = arith.constant dense<0xFF800000> : vector<2xf32>
    %467 = vector.multi_reduction <maximumf>, %466, %cst_84 [1] : vector<2x2xf32> to vector<2xf32>
    %468 = vector.shape_cast %467 : vector<2xf32> to vector<2x1xf32>
    %469 = vector.broadcast %468 : vector<2x1xf32> to vector<2x2xf32>
    %470 = arith.subf %466, %469 : vector<2x2xf32>
    %471 = math.exp %470 : vector<2x2xf32>
    %cst_85 = arith.constant dense<0.000000e+00> : vector<2xf32>
    %472 = vector.multi_reduction <add>, %471, %cst_85 [1] : vector<2x2xf32> to vector<2xf32>
    %473 = vector.shape_cast %472 : vector<2xf32> to vector<2x1xf32>
    %474 = vector.broadcast %473 : vector<2x1xf32> to vector<2x2xf32>
    %475 = arith.divf %471, %474 : vector<2x2xf32>
    %c0_86 = arith.constant 0 : index
    %c0_87 = arith.constant 0 : index
    %476 = vector.load %arg15[%c0_86, %c0_87] : memref<2x2xf32, #tpu.memory_space<vmem>>, vector<2x2xf32>
    tpu.vector_store %arg15[%c0_86, %c0_87], %475 {strides = array<i32>} : memref<2x2xf32, #tpu.memory_space<vmem>>, vector<2x2xf32>,
    return
  }
  func.func @transform_0(%arg0: i32) -> (i32, i32, i32) {
    %c0_i32 = arith.constant 0 : i32
    %c0_i32_0 = arith.constant 0 : i32
    %c0_i32_1 = arith.constant 0 : i32
    %c0_i32_2 = arith.constant 0 : i32
    return %c0_i32, %c0_i32_0, %c0_i32_1 : i32, i32, i32
  }
  func.func @transform_1(%arg0: i32) -> (i32, i32) {
    %c0_i32 = arith.constant 0 : i32
    %c0_i32_0 = arith.constant 0 : i32
    %c0_i32_1 = arith.constant 0 : i32
    return %c0_i32, %c0_i32_0 : i32, i32
  }
  func.func @transform_2(%arg0: i32) -> (i32, i32) {
    %c0_i32 = arith.constant 0 : i32
    %c0_i32_0 = arith.constant 0 : i32
    %c0_i32_1 = arith.constant 0 : i32
    return %c0_i32, %c0_i32_0 : i32, i32
  }
  func.func @transform_3(%arg0: i32) -> (i32, i32) {
    %c0_i32 = arith.constant 0 : i32
    %c0_i32_0 = arith.constant 0 : i32
    %c0_i32_1 = arith.constant 0 : i32
    return %c0_i32, %c0_i32_0 : i32, i32
  }
  func.func @transform_4(%arg0: i32) -> (i32, i32) {
    %c0_i32 = arith.constant 0 : i32
    %c0_i32_0 = arith.constant 0 : i32
    %c0_i32_1 = arith.constant 0 : i32
    return %c0_i32, %c0_i32_0 : i32, i32
  }
  func.func @transform_5(%arg0: i32) -> (i32, i32) {
    %c0_i32 = arith.constant 0 : i32
    %c0_i32_0 = arith.constant 0 : i32
    %c0_i32_1 = arith.constant 0 : i32
    return %c0_i32, %c0_i32_0 : i32, i32
  }
  func.func @transform_6(%arg0: i32) -> (i32, i32) {
    %c0_i32 = arith.constant 0 : i32
    %c0_i32_0 = arith.constant 0 : i32
    %c0_i32_1 = arith.constant 0 : i32
    return %c0_i32, %c0_i32_0 : i32, i32
  }
  func.func @transform_7(%arg0: i32) -> (i32, i32, i32) {
    %c0_i32 = arith.constant 0 : i32
    %c0_i32_0 = arith.constant 0 : i32
    %c0_i32_1 = arith.constant 0 : i32
    %c0_i32_2 = arith.constant 0 : i32
    return %c0_i32, %c0_i32_0, %c0_i32_1 : i32, i32, i32
  }
  func.func @transform_8(%arg0: i32) -> (i32, i32) {
    %c0_i32 = arith.constant 0 : i32
    %c0_i32_0 = arith.constant 0 : i32
    %c0_i32_1 = arith.constant 0 : i32
    return %c0_i32, %c0_i32_0 : i32, i32
  }
  func.func @transform_9(%arg0: i32) -> (i32, i32) {
    %c0_i32 = arith.constant 0 : i32
    %c0_i32_0 = arith.constant 0 : i32
    %c0_i32_1 = arith.constant 0 : i32
    return %c0_i32, %c0_i32_0 : i32, i32
  }
  func.func @transform_10(%arg0: i32) -> (i32, i32) {
    %c0_i32 = arith.constant 0 : i32
    %c0_i32_0 = arith.constant 0 : i32
    %c0_i32_1 = arith.constant 0 : i32
    return %c0_i32, %c0_i32_0 : i32, i32
  }
  func.func @transform_11(%arg0: i32) -> (i32, i32) {
    %c0_i32 = arith.constant 0 : i32
    %c0_i32_0 = arith.constant 0 : i32
    %c0_i32_1 = arith.constant 0 : i32
    return %c0_i32, %c0_i32_0 : i32, i32
  }
  func.func @transform_12(%arg0: i32) -> (i32, i32) {
    %c0_i32 = arith.constant 0 : i32
    %c0_i32_0 = arith.constant 0 : i32
    %c0_i32_1 = arith.constant 0 : i32
    return %c0_i32, %c0_i32_0 : i32, i32
  }
  func.func @transform_13(%arg0: i32) -> (i32, i32) {
    %c0_i32 = arith.constant 0 : i32
    %c0_i32_0 = arith.constant 0 : i32
    %c0_i32_1 = arith.constant 0 : i32
    return %c0_i32, %c0_i32_0 : i32, i32
  }
  func.func @transform_14(%arg0: i32) -> (i32, i32) {
    %c0_i32 = arith.constant 0 : i32
    %c0_i32_0 = arith.constant 0 : i32
    %c0_i32_1 = arith.constant 0 : i32
    return %c0_i32, %c0_i32_0 : i32, i32
  }
}

</mosaic_0001>

<bundles_post_ra>
// kernel: crnn_forward.1
= control target key start
LH: loop header
LB: loop body
LE: loop exit
PB: predicated region body
PF: predicated region fallthrough
CT: control target
= control target key end

     0   :  { %v8141_v7 = vmov 0   ;;  %v8143_v11 = vmov 0.0|0.0   ;;  %s6073_s29 = smov 1   ;;  %vm398_vm0 = vcmask 1040384   ;;  %s8126_s0 = inlined_call_operand.vmem [shape: f32[16,16,16], index: 0, kind: input, shape index: {}]   ;;  %s8127_s1 = inlined_call_operand.vmem [shape: bf16[18,768], index: 1, kind: input, shape index: {}]   ;;  %s8128_s2 = inlined_call_operand.vmem [shape: f32[1,256], index: 2, kind: input, shape index: {}]   ;;  %s8129_s3 = inlined_call_operand.vmem [shape: bf16[160,480], index: 3, kind: input, shape index: {}]   ;;  %s8130_s4 = inlined_call_operand.vmem [shape: f32[1,160], index: 4, kind: input, shape index: {}]   ;;  %s8131_s5 = inlined_call_operand.vmem [shape: bf16[120,288], index: 5, kind: input, shape index: {}]   ;;  %s8132_s6 = inlined_call_operand.vmem [shape: f32[1,96], index: 6, kind: input, shape index: {}]   ;;  %s8133_s7 = inlined_call_operand.vmem [shape: bf16[2,48,128], index: 7, kind: input, shape index: {}]   ;;  %s8134_s8 = inlined_call_operand.vmem [shape: f32[1,128], index: 8, kind: input, shape index: {}]   ;;  %s8135_s9 = inlined_call_operand.vmem [shape: bf16[128,256], index: 9, kind: input, shape index: {}]   ;;  %s8136_s10 = inlined_call_operand.vmem [shape: bf16[64,256], index: 10, kind: input, shape index: {}]   ;;  %s8137_s11 = inlined_call_operand.vmem [shape: f32[1,256], index: 11, kind: input, shape index: {}]   ;;  %s8138_s12 = inlined_call_operand.vmem [shape: bf16[64,2], index: 12, kind: input, shape index: {}]   ;;  %s8139_s13 = inlined_call_operand.vmem [shape: f32[1,2], index: 13, kind: input, shape index: {}]   ;;  %s8140_s14 = inlined_call_operand.hbm [shape: f32[2,2], index: 14, kind: output, shape index: {}]  }
   0x1   :  { %v49_v0 = vld [vmem:[%s8126_s0] sm:$0xff]  ;;  %v50_v1 = vld [vmem:[%s8126_s0 + $0x8] sm:$0xff]  ;;  %v51_v2 = vld [vmem:[%s8126_s0 + $0x10] sm:$0xff]  ;;  %449 = vmatprep.mubr.bf16.mxu0 %v8141_v7  ;;  %2074 = vmatprep.mubr.bf16.mxu1 %v8143_v11 }
   0x2   :  { %v5375_v3 = vpack.i.bf16 %v50_v1, %v49_v0  ;;  %v52_v4 = vld [vmem:[%s8126_s0 + $0x18] sm:$0xff]  ;;  %v53_v5 = vld [vmem:[%s8126_s0 + $0x20] sm:$0xff]  ;;  %v54_v6 = vld [vmem:[%s8126_s0 + $0x28] sm:$0xff] }
   0x3   :  { %v5385_v8 = vpack.i.bf16 %v54_v6, %v53_v5  ;;  %v55_v9 = vld [vmem:[%s8126_s0 + $0x30] sm:$0xff]  ;;  %v56_v10 = vld [vmem:[%s8126_s0 + $0x38] sm:$0xff]  ;;  %v5380_v12 = vpack.i.bf16 %v52_v4, %v51_v2  ;;  %v57_v14 = vld [vmem:[%s8126_s0 + $0x40] sm:$0xff] }
   0x4   :  { %5376 = vrot.lane.b32.xlu0 %v5375_v3, %s6073_s29  ;;  %v5390_v13 = vpack.i.bf16 %v56_v10, %v55_v9  ;;  %v58_v15 = vld [vmem:[%s8126_s0 + $0x48] sm:$0xff]  ;;  %v59_v16 = vld [vmem:[%s8126_s0 + $0x50] sm:$0xff]  ;;  %v60_v17 = vld [vmem:[%s8126_s0 + $0x58] sm:$0xff] }
   0x5   :  { %5386 = vrot.lane.b32.xlu1 %v5385_v8, %s6073_s29  ;;  %v5395_v18 = vpack.i.bf16 %v58_v15, %v57_v14  ;;  %v61_v19 = vld [vmem:[%s8126_s0 + $0x60] sm:$0xff]  ;;  %v5400_v20 = vpack.i.bf16 %v60_v17, %v59_v16  ;;  %v62_v21 = vld [vmem:[%s8126_s0 + $0x68] sm:$0xff]  ;;  %v63_v22 = vld [vmem:[%s8126_s0 + $0x70] sm:$0xff] }
   0x6   :  { %v64_v23 = vld [vmem:[%s8126_s0 + $0x78] sm:$0xff]  ;;  %v298_v26 = vld [vmem:[%s8127_s1 + $0x30] sm:$0x11]  ;;  %v5405_v27 = vpack.i.bf16 %v62_v21, %v61_v19  ;;  %v65_v31 = vld [vmem:[%s8126_s0 + $0x80] sm:$0xff] }
   0x7   :  { %v5795_v24 = vld [vmem:[%s8127_s1 + $0x4] ss:$24 sps:$4 sm:$0xff]   ;;  %v5797_v25 = vld [vmem:[%s8127_s1] ss:$24 sps:$4 sm:$0xff]   ;;  %v4844_v28 = vcombine.high %v298_v26, %v298_v26  ;;  %v4843_v29 = vcombine.low %v298_v26, %v298_v26  ;;  %v5410_v30 = vpack.i.bf16 %v64_v23, %v63_v22  ;;  %v66_v32 = vld [vmem:[%s8126_s0 + $0x88] sm:$0xff] }
   0x8   :  { %5381 = vrot.lane.b32.xlu0 %v5380_v12, %s6073_s29  ;;  %417 = vmatprep.subr.bf16.mxu0 %v5795_v24  ;;  %v67_v33 = vld [vmem:[%s8126_s0 + $0x90] sm:$0xff]  ;;  %v68_v34 = vld [vmem:[%s8126_s0 + $0x98] sm:$0xff]  ;;  %v5802_v36 = vld [vmem:[%s8127_s1 + $0xc] ss:$24 sps:$4 sm:$0xff]   ;;  %v5415_v40 = vpack.i.bf16 %v66_v32, %v65_v31 }
   0x9   :  { %5391 = vrot.lane.b32.xlu1 %v5390_v13, %s6073_s29  ;;  %418 = vmatpush1.bf16.msra.mxu0 %v5797_v25  ;;  %v400_v35 = vsel %vm398_vm0, %v4843_v29, 0  ;;  %v69_v37 = vld [vmem:[%s8126_s0 + $0xa0] sm:$0xff]  ;;  %v70_v38 = vld [vmem:[%s8126_s0 + $0xa8] sm:$0xff]  ;;  %v71_v41 = vld [vmem:[%s8126_s0 + $0xb0] sm:$0xff]  ;;  %v5420_v43 = vpack.i.bf16 %v68_v34, %v67_v33 }
   0xa   :  { %4849 = vmatprep.subr.msk.bf16.mxu0 %vm398_vm0, %v4844_v28  ;;  %v5800_v39 = vld [vmem:[%s8127_s1 + $0x8] ss:$24 sps:$4 sm:$0xff]   ;;  %v72_v42 = vld [vmem:[%s8126_s0 + $0xb8] sm:$0xff]  ;;  %v5425_v46 = vpack.i.bf16 %v70_v38, %v69_v37  ;;  %v75_v47 = vld [vmem:[%s8126_s0 + $0xd0] sm:$0xff] }
   0xb   :  { %v73_v44 = vld [vmem:[%s8126_s0 + $0xc0] sm:$0xff]  ;;  %v74_v45 = vld [vmem:[%s8126_s0 + $0xc8] sm:$0xff]  ;;  %v76_v48 = vld [vmem:[%s8126_s0 + $0xd8] sm:$0xff]  ;;  %v5430_v49 = vpack.i.bf16 %v72_v42, %v71_v41 }
   0xc   :  { %5396 = vrot.lane.b32.xlu0 %v5395_v18, %s6073_s29  ;;  %v77_v50 = vld [vmem:[%s8126_s0 + $0xe0] sm:$0xff]  ;;  %v78_v51 = vld [vmem:[%s8126_s0 + $0xe8] sm:$0xff]  ;;  %v5435_v52 = vpack.i.bf16 %v74_v45, %v73_v44  ;;  %v79_v53 = vld [vmem:[%s8126_s0 + $0xf0] sm:$0xff]  ;;  %v5440_v55 = vpack.i.bf16 %v76_v48, %v75_v47 }
   0xd   :  { %5401 = vrot.lane.b32.xlu1 %v5400_v20, %s6073_s29  ;;  %420 = vmatpush1.bf16.msra.mxu0 %v400_v35  ;;  %v80_v54 = vld [vmem:[%s8126_s0 + $0xf8] sm:$0xff]  ;;  %v5445_v56 = vpack.i.bf16 %v78_v51, %v77_v50 }
   0xe   :  { %658 = vmatprep.subr.bf16.mxu0 %v5802_v36  ;;  %v5450_v57 = vpack.i.bf16 %v80_v54, %v79_v53 }
  0x10   :  { %5406 = vrot.lane.b32.xlu0 %v5405_v27, %s6073_s29  ;;  %450 = vmatmul.mubr.bf16.vlgmr.msra.gmra.mrb[0].mxu0 %v8143_v11 }
  0x11   :  { %5411 = vrot.lane.b32.xlu1 %v5410_v30, %s6073_s29  ;;  %659 = vmatpush1.bf16.msra.mxu0 %v5800_v39 }
  0x12   :  { %459 = vmatprep.mubr.bf16.mxu0 %v8141_v7 }
  0x14   :  { %5416 = vrot.lane.b32.xlu0 %v5415_v40, %s6073_s29 }
  0x15   :  { %5421 = vrot.lane.b32.xlu1 %v5420_v43, %s6073_s29 }
  0x18   :  { %5426 = vrot.lane.b32.xlu0 %v5425_v46, %s6073_s29 }
  0x19   :  { %5431 = vrot.lane.b32.xlu1 %v5430_v49, %s6073_s29 }
  0x1c   :  { %5436 = vrot.lane.b32.xlu0 %v5435_v52, %s6073_s29 }
  0x1d   :  { %5441 = vrot.lane.b32.xlu1 %v5440_v55, %s6073_s29 }
  0x20   :  { %5446 = vrot.lane.b32.xlu0 %v5445_v56, %s6073_s29 }
  0x21   :  { %5451 = vrot.lane.b32.xlu1 %v5450_v57, %s6073_s29 }
  0x22   :  { %19 = vsyncpa [#allocation3], 0  ;;  %v299_v58 = vld [vmem:[%s8127_s1 + $0x38] sm:$0x11]  ;;  %vm209_vm1 = vcmask 7168   ;;  %vm242_vm2 = vcmask 138240  }
  0x23   :  { %v4846_v59 = vcombine.high %v299_v58, %v299_v58  ;;  %v4845_v60 = vcombine.low %v299_v58, %v299_v58  ;;  %vm346_vm3 = vcmask 146432   ;;  %vm1536_vm4 = vcmask 130048   ;;  %s6076_s26 = smov 64   ;;  %s6078_s0 = smov 68  }
  0x24   :  { %vm4941_vm5 = vmneg %vm1536_vm4  ;;  %vm2015_vm6 = vcmask 261120   ;;  %vm2464_vm8 = vcmask 785408   ;;  %vm2627_vm9 = vcmask 523264   ;;  %vm3291_vm10 = vcmask 1043456   ;;  %s6079_s21 = smov 20   ;;  %s6083_s24 = smov 104  }
  0x25   :  { %4866 = vmatprep.subr.msk.bf16.mxu0 %vm398_vm0, %v4846_v59  ;;  %v406_v61 = vsel %vm398_vm0, %v4845_v60, 0  ;;  %vm6948_vm7 = vmpackc.low %vm4941_vm5, %vm4941_vm5  ;;  %vm2994_vm11 = vcmask 392192   ;;  %vm2880_vm12 = vcmask 556032   ;;  %vm2913_vm13 = vcmask 162816  }
  0x26   :  { %661 = vmatpush1.bf16.msra.mxu0 %v406_v61  ;;  %vm3113_vm14 = vcmask 818176   ;;  %vm3276_vm15 = vcmask 982016  }
  0x76   :  { %v5377_v62 = vpop.permute.xlu0 %5376 }
  0x77   :  { %v5379_v63 = vunpack.i.h.bf16 %v5377_v62  ;;  %v5378_v0 = vunpack.i.l.bf16 %v5377_v62  ;;  %v5387_v1 = vpop.permute.xlu1 %5386 }
  0x78   :  { %v5389_v18 = vunpack.i.h.bf16 %v5387_v1  ;;  %v5388_v19 = vunpack.i.l.bf16 %v5387_v1 }
  0x79   :  { %v211_v2 = vsel %vm209_vm1, 0.0, %v5379_v63  ;;  %v210_v3 = vsel %vm209_vm1, 0.0, %v5378_v0 }
  0x7a   :  { %v244_v4 = vsel %vm242_vm2, %v211_v2, 0.0  ;;  %v243_v5 = vsel %vm242_vm2, %v210_v3, 0.0  ;;  %v5382_v6 = vpop.permute.xlu0 %5381  ;;  %v215_v25 = vsel %vm209_vm1, 0.0, %v5389_v18  ;;  %v214_v26 = vsel %vm209_vm1, 0.0, %v5388_v19 }
  0x7b   :  { %v6303_v8 = vpack.c.bf16 %v244_v4, %v243_v5  ;;  %v5384_v9 = vunpack.i.h.bf16 %v5382_v6  ;;  %v5383_v10 = vunpack.i.l.bf16 %v5382_v6  ;;  %v5392_v12 = vpop.permute.xlu1 %5391  ;;  %v248_v30 = vsel %vm242_vm2, %v215_v25, 0.0 }
  0x7c   :  { %v5394_v21 = vunpack.i.h.bf16 %v5392_v12  ;;  %v5393_v22 = vunpack.i.l.bf16 %v5392_v12  ;;  %v247_v31 = vsel %vm242_vm2, %v214_v26, 0.0 }
  0x7d   :  { %4850 = vmatmul.mubr.msk.bf16.gmra.mrb[4].mxu0 %vm346_vm3, %v6303_v8  ;;  %v213_v13 = vsel %vm209_vm1, 0.0, %v5384_v9  ;;  %v212_v14 = vsel %vm209_vm1, 0.0, %v5383_v10  ;;  %v6333_v39 = vpack.c.bf16 %v248_v30, %v247_v31 }
  0x7e   :  { %v246_v15 = vsel %vm242_vm2, %v213_v13, 0.0  ;;  %v245_v16 = vsel %vm242_vm2, %v212_v14, 0.0  ;;  %469 = vmatprep.mubr.bf16.mxu0 %v8141_v7  ;;  %v6312_v17 = vpop.permute.xlu0 %5396  ;;  %v217_v28 = vsel %vm209_vm1, 0.0, %v5394_v21  ;;  %v216_v29 = vsel %vm209_vm1, 0.0, %v5393_v22 }
  0x7f   :  { %v6314_v20 = vpop.permute.xlu1 %5401  ;;  %v6316_v23 = vpack.c.bf16 %v246_v15, %v245_v16  ;;  %v250_v33 = vsel %vm242_vm2, %v217_v28, 0.0  ;;  %v249_v34 = vsel %vm242_vm2, %v216_v29, 0.0  ;;  %v5399_v40 = vunpack.i.h.bf16 %v6312_v17 }
  0x80   :  { %v6337_v43 = vpack.c.bf16 %v250_v33, %v249_v34  ;;  %v5398_v57 = vunpack.i.l.bf16 %v6312_v17  ;;  %v5404_v61 = vunpack.i.h.bf16 %v6314_v20 }
  0x81   :  { %v219_v14 = vsel %vm209_vm1, 0.0, %v5399_v40 }
  0x82   :  { %v6318_v24 = vpop.permute.xlu0 %5406  ;;  %v218_v18 = vsel %vm209_vm1, 0.0, %v5398_v57 }
  0x83   :  { %v6322_v27 = vpop.permute.xlu1 %5411 }
  0x85   :  { %4851 = vmatmul.mubr.msk.bf16.gmra.mrb[8].mxu0 %vm346_vm3, %v6316_v23 }
  0x86   :  { %479 = vmatprep.mubr.bf16.mxu0 %v8141_v7  ;;  %v5417_v32 = vpop.permute.xlu0 %5416 }
  0x87   :  { %v5419_v35 = vunpack.i.h.bf16 %v5417_v32  ;;  %v5422_v36 = vpop.permute.xlu1 %5421  ;;  %v5418_v37 = vunpack.i.l.bf16 %v5417_v32 }
  0x88   :  { %v5424_v38 = vunpack.i.h.bf16 %v5422_v36  ;;  %v5423_v42 = vunpack.i.l.bf16 %v5422_v36  ;;  %v252_v36 = vsel %vm242_vm2, %v219_v14, 0.0  ;;  %v5805_v14 = vld [vmem:[%s8127_s1 + $0x10] ss:$24 sps:$4 sm:$0xff]  }
  0x89   :  { %v227_v41 = vsel %vm209_vm1, 0.0, %v5419_v35  ;;  %v226_v45 = vsel %vm209_vm1, 0.0, %v5418_v37 }
  0x8a   :  { %v260_v44 = vsel %vm242_vm2, %v227_v41, 0.0  ;;  %v229_v46 = vsel %vm209_vm1, 0.0, %v5424_v38  ;;  %v5427_v47 = vpop.permute.xlu0 %5426  ;;  %v259_v48 = vsel %vm242_vm2, %v226_v45, 0.0  ;;  %v228_v50 = vsel %vm209_vm1, 0.0, %v5423_v42 }
  0x8b   :  { %v262_v49 = vsel %vm242_vm2, %v229_v46, 0.0  ;;  %v5429_v51 = vunpack.i.h.bf16 %v5427_v47  ;;  %v5432_v52 = vpop.permute.xlu1 %5431  ;;  %v6345_v53 = vpack.c.bf16 %v260_v44, %v259_v48  ;;  %v261_v54 = vsel %vm242_vm2, %v228_v50, 0.0 }
  0x8c   :  { %v5428_v55 = vunpack.i.l.bf16 %v5427_v47  ;;  %v5434_v56 = vunpack.i.h.bf16 %v5432_v52  ;;  %v6351_v58 = vpack.c.bf16 %v262_v49, %v261_v54  ;;  %v5433_v60 = vunpack.i.l.bf16 %v5432_v52 }
  0x8d   :  { %4852 = vmatmul.mubr.msk.bf16.gmra.mrb[12].mxu0 %vm346_vm3, %v6333_v39  ;;  %v231_v59 = vsel %vm209_vm1, 0.0, %v5429_v51  ;;  %v251_v41 = vsel %vm242_vm2, %v218_v18, 0.0  ;;  %v5403_v46 = vunpack.i.l.bf16 %v6314_v20 }
  0x8e   :  { %489 = vmatprep.mubr.bf16.mxu0 %v8141_v7  ;;  %v264_v62 = vsel %vm242_vm2, %v231_v59, 0.0  ;;  %v230_v63 = vsel %vm209_vm1, 0.0, %v5428_v55  ;;  %v233_v0 = vsel %vm209_vm1, 0.0, %v5434_v56  ;;  %v5437_v1 = vpop.permute.xlu0 %5436  ;;  %v232_v4 = vsel %vm209_vm1, 0.0, %v5433_v60 }
  0x8f   :  { %v263_v2 = vsel %vm242_vm2, %v230_v63, 0.0  ;;  %v266_v3 = vsel %vm242_vm2, %v233_v0, 0.0  ;;  %v5439_v5 = vunpack.i.h.bf16 %v5437_v1  ;;  %v5442_v6 = vpop.permute.xlu1 %5441  ;;  %v265_v10 = vsel %vm242_vm2, %v232_v4, 0.0 }
  0x90   :  { %v6362_v9 = vpack.c.bf16 %v264_v62, %v263_v2  ;;  %v5438_v12 = vunpack.i.l.bf16 %v5437_v1  ;;  %v5444_v13 = vunpack.i.h.bf16 %v5442_v6  ;;  %v6366_v15 = vpack.c.bf16 %v266_v3, %v265_v10 }
  0x91   :  { %v235_v16 = vsel %vm209_vm1, 0.0, %v5439_v5  ;;  %v5443_v17 = vunpack.i.l.bf16 %v5442_v6  ;;  %v6397_v52 = vpack.c.bf16 %v252_v36, %v251_v41  ;;  %v221_v55 = vsel %vm209_vm1, 0.0, %v5404_v61 }
  0x92   :  { %v268_v19 = vsel %vm242_vm2, %v235_v16, 0.0  ;;  %v234_v21 = vsel %vm209_vm1, 0.0, %v5438_v12  ;;  %v237_v22 = vsel %vm209_vm1, 0.0, %v5444_v13  ;;  %v5447_v25 = vpop.permute.xlu0 %5446  ;;  %v220_v56 = vsel %vm209_vm1, 0.0, %v5403_v46  ;;  %v5807_v12 = vld [vmem:[%s8127_s1 + $0x14] ss:$24 sps:$4 sm:$0xff]  }
  0x93   :  { %v267_v26 = vsel %vm242_vm2, %v234_v21, 0.0  ;;  %v270_v28 = vsel %vm242_vm2, %v237_v22, 0.0  ;;  %v236_v29 = vsel %vm209_vm1, 0.0, %v5443_v17  ;;  %v5449_v30 = vunpack.i.h.bf16 %v5447_v25  ;;  %v5452_v31 = vpop.permute.xlu1 %5451  ;;  %899 = vmatprep.subr.bf16.mxu0 %v5807_v12  ;;  %v300_v13 = vld [vmem:[%s8127_s1 + $0x40] sm:$0x11] }
  0x94   :  { %v6376_v32 = vpack.c.bf16 %v268_v19, %v267_v26  ;;  %v269_v33 = vsel %vm242_vm2, %v236_v29, 0.0  ;;  %v5448_v34 = vunpack.i.l.bf16 %v5447_v25  ;;  %v5454_v35 = vunpack.i.h.bf16 %v5452_v31 }
  0x95   :  { %4853 = vmatmul.mubr.msk.bf16.gmra.mrb[16].mxu0 %vm346_vm3, %v6337_v43  ;;  %v6382_v37 = vpack.c.bf16 %v270_v28, %v269_v33  ;;  %v239_v38 = vsel %vm209_vm1, 0.0, %v5449_v30  ;;  %v5453_v40 = vunpack.i.l.bf16 %v5452_v31  ;;  %v254_v20 = vsel %vm242_vm2, %v221_v55, 0.0 }
  0x96   :  { %499 = vmatprep.mubr.bf16.mxu0 %v8141_v7  ;;  %v272_v42 = vsel %vm242_vm2, %v239_v38, 0.0  ;;  %v238_v44 = vsel %vm209_vm1, 0.0, %v5448_v34  ;;  %v241_v45 = vsel %vm209_vm1, 0.0, %v5454_v35  ;;  %v253_v57 = vsel %vm242_vm2, %v220_v56, 0.0 }
  0x97   :  { %v271_v47 = vsel %vm242_vm2, %v238_v44, 0.0  ;;  %v274_v48 = vsel %vm242_vm2, %v241_v45, 0.0  ;;  %v240_v49 = vsel %vm209_vm1, 0.0, %v5453_v40  ;;  %v5409_v59 = vunpack.i.h.bf16 %v6318_v24 }
  0x98   :  { %v6394_v50 = vpack.c.bf16 %v272_v42, %v271_v47  ;;  %v273_v51 = vsel %vm242_vm2, %v240_v49, 0.0  ;;  %v5408_v60 = vunpack.i.l.bf16 %v6318_v24  ;;  %v6410_v62 = vpack.c.bf16 %v254_v20, %v253_v57 }
  0x99   :  { %v6399_v54 = vpack.c.bf16 %v274_v48, %v273_v51  ;;  %v223_v63 = vsel %vm209_vm1, 0.0, %v5409_v59  ;;  %v5414_v2 = vunpack.i.h.bf16 %v6322_v27  ;;  %v5413_v3 = vunpack.i.l.bf16 %v6322_v27 }
  0x9a   :  { %v222_v61 = vsel %vm209_vm1, 0.0, %v5408_v60  ;;  %v256_v0 = vsel %vm242_vm2, %v223_v63, 0.0  ;;  %v4848_v16 = vcombine.high %v300_v13, %v300_v13  ;;  %v4847_v17 = vcombine.low %v300_v13, %v300_v13 }
  0x9b   :  { %v255_v1 = vsel %vm242_vm2, %v222_v61, 0.0  ;;  %v225_v4 = vsel %vm209_vm1, 0.0, %v5414_v2  ;;  %v224_v5 = vsel %vm209_vm1, 0.0, %v5413_v3  ;;  %vm3684_vm1 = vcmask 195584  }
  0x9c   :  { %v6421_v24 = vpack.c.bf16 %v256_v0, %v255_v1  ;;  %v258_v6 = vsel %vm242_vm2, %v225_v4, 0.0  ;;  %v257_v10 = vsel %vm242_vm2, %v224_v5, 0.0  ;;  %v412_v18 = vsel %vm398_vm0, %v4847_v17, 0 }
  0x9d   :  { %4854 = vmatmul.mubr.msk.bf16.gmra.mrb[20].mxu0 %vm346_vm3, %v6397_v52  ;;  %v6433_v27 = vpack.c.bf16 %v258_v6, %v257_v10  ;;  %vm4810_vm2 = vcmask 9216  }
  0x9e   :  { %509 = vmatprep.mubr.bf16.mxu0 %v8141_v7 }
  0xa5   :  { %4855 = vmatmul.mubr.msk.bf16.gmra.mrb[24].mxu0 %vm346_vm3, %v6410_v62 }
  0xa6   :  { %519 = vmatprep.mubr.bf16.mxu0 %v8141_v7 }
  0xad   :  { %4856 = vmatmul.mubr.msk.bf16.gmra.mrb[28].mxu0 %vm346_vm3, %v6421_v24 }
  0xae   :  { %529 = vmatprep.mubr.bf16.mxu0 %v8141_v7 }
  0xb5   :  { %4857 = vmatmul.mubr.msk.bf16.gmra.mrb[32].mxu0 %vm346_vm3, %v6433_v27 }
  0xb6   :  { %539 = vmatprep.mubr.bf16.mxu0 %v8141_v7 }
  0xbd   :  { %4858 = vmatmul.mubr.msk.bf16.gmra.mrb[36].mxu0 %vm346_vm3, %v6345_v53 }
  0xbe   :  { %549 = vmatprep.mubr.bf16.mxu0 %v8141_v7 }
  0xc5   :  { %4859 = vmatmul.mubr.msk.bf16.gmra.mrb[40].mxu0 %vm346_vm3, %v6351_v58 }
  0xc6   :  { %559 = vmatprep.mubr.bf16.mxu0 %v8141_v7 }
  0xcd   :  { %4860 = vmatmul.mubr.msk.bf16.gmra.mrb[44].mxu0 %vm346_vm3, %v6362_v9 }
  0xce   :  { %569 = vmatprep.mubr.bf16.mxu0 %v8141_v7 }
  0xd5   :  { %4861 = vmatmul.mubr.msk.bf16.gmra.mrb[48].mxu0 %vm346_vm3, %v6366_v15 }
  0xd6   :  { %579 = vmatprep.mubr.bf16.mxu0 %v8141_v7 }
  0xdd   :  { %4862 = vmatmul.mubr.msk.bf16.gmra.mrb[52].mxu0 %vm346_vm3, %v6376_v32 }
  0xde   :  { %589 = vmatprep.mubr.bf16.mxu0 %v8141_v7 }
  0xe5   :  { %4863 = vmatmul.mubr.msk.bf16.gmra.mrb[56].mxu0 %vm346_vm3, %v6382_v37 }
  0xe6   :  { %599 = vmatprep.mubr.bf16.mxu0 %v8141_v7 }
  0xed   :  { %4864 = vmatmul.mubr.msk.bf16.gmra.mrb[60].mxu0 %vm346_vm3, %v6394_v50 }
  0xee   :  { %609 = vmatprep.mubr.bf16.mxu0 %v8141_v7 }
  0xf5   :  { %4865 = vmatmul.mubr.msk.bf16.gmra.mrb[64].mxu0 %vm346_vm3, %v6399_v54 }
  0xf6   :  { %615 = vmatprep.mubr.bf16.mxu0 %v8141_v7 }
  0xfd   :  { %616 = vmatmul.mubr.bf16.gmra.mrb[68].mxu0 %v8143_v11 }
  0xfe   :  { %621 = vmatprep.mubr.bf16.mxu0 %v8141_v7 }
 0x105   :  { %622 = vmatmul.mubr.bf16.gmra.mrb[72].mxu0 %v8143_v11 }
 0x106   :  { %627 = vmatprep.mubr.bf16.mxu0 %v8141_v7 }
 0x10d   :  { %628 = vmatmul.mubr.bf16.gmra.mrb[76].mxu0 %v8143_v11 }
 0x10e   :  { %633 = vmatprep.mubr.bf16.mxu0 %v8141_v7 }
 0x115   :  { %634 = vmatmul.mubr.bf16.gmra.mrb[80].mxu0 %v8143_v11 }
 0x116   :  { %639 = vmatprep.mubr.bf16.mxu0 %v8141_v7 }
 0x11d   :  { %640 = vmatmul.mubr.bf16.gmra.mrb[84].mxu0 %v8143_v11 }
 0x11e   :  { %645 = vmatprep.mubr.bf16.mxu0 %v8141_v7 }
 0x125   :  { %646 = vmatmul.mubr.bf16.gmra.mrb[88].mxu0 %v8143_v11 }
 0x126   :  { %651 = vmatprep.mubr.bf16.mxu0 %v8141_v7 }
 0x12d   :  { %652 = vmatmul.mubr.bf16.gmra.mrb[92].mxu0 %v8143_v11 }
 0x12e   :  { %690 = vmatprep.mubr.bf16.mxu0 %v8141_v7 }
 0x135   :  { %691 = vmatmul.mubr.bf16.vlgmr.msra.gmra.mrb[96].mxu0 %v8143_v11 }
 0x136   :  { %900 = vmatpush1.bf16.msra.mxu0 %v5805_v14  ;;  %696 = vmatprep.mubr.bf16.mxu0 %v8141_v7 }
 0x137   :  { %4883 = vmatprep.subr.msk.bf16.mxu0 %vm398_vm0, %v4848_v16  ;;  %vm6084_vm0 = vmmov 0  }
 0x13a   :  { %902 = vmatpush1.bf16.msra.mxu0 %v412_v18 }
 0x13d   :  { %4867 = vmatmul.mubr.msk.bf16.gmra.mrb[0].mxu0 %vm346_vm3, %v6303_v8 }
 0x13e   :  { %706 = vmatprep.mubr.bf16.mxu0 %v8141_v7 }
 0x145   :  { %4868 = vmatmul.mubr.msk.bf16.gmra.mrb[4].mxu0 %vm346_vm3, %v6316_v23 }
 0x146   :  { %716 = vmatprep.mubr.bf16.mxu0 %v8141_v7 }
 0x14d   :  { %4869 = vmatmul.mubr.msk.bf16.gmra.mrb[8].mxu0 %vm346_vm3, %v6333_v39 }
 0x14e   :  { %726 = vmatprep.mubr.bf16.mxu0 %v8141_v7 }
 0x155   :  { %4870 = vmatmul.mubr.msk.bf16.gmra.mrb[12].mxu0 %vm346_vm3, %v6337_v43 }
 0x156   :  { %736 = vmatprep.mubr.bf16.mxu0 %v8141_v7 }
 0x15d   :  { %4871 = vmatmul.mubr.msk.bf16.gmra.mrb[16].mxu0 %vm346_vm3, %v6397_v52 }
 0x15e   :  { %746 = vmatprep.mubr.bf16.mxu0 %v8141_v7 }
 0x165   :  { %4872 = vmatmul.mubr.msk.bf16.gmra.mrb[20].mxu0 %vm346_vm3, %v6410_v62 }
 0x166   :  { %756 = vmatprep.mubr.bf16.mxu0 %v8141_v7 }
 0x16d   :  { %4873 = vmatmul.mubr.msk.bf16.gmra.mrb[24].mxu0 %vm346_vm3, %v6421_v24 }
 0x16e   :  { %766 = vmatprep.mubr.bf16.mxu0 %v8141_v7 }
 0x175   :  { %4874 = vmatmul.mubr.msk.bf16.gmra.mrb[28].mxu0 %vm346_vm3, %v6433_v27 }
 0x176   :  { %776 = vmatprep.mubr.bf16.mxu0 %v8141_v7 }
 0x17d   :  { %4875 = vmatmul.mubr.msk.bf16.gmra.mrb[32].mxu0 %vm346_vm3, %v6345_v53 }
 0x17e   :  { %786 = vmatprep.mubr.bf16.mxu0 %v8141_v7 }
 0x185   :  { %4876 = vmatmul.mubr.msk.bf16.gmra.mrb[36].mxu0 %vm346_vm3, %v6351_v58 }
 0x186   :  { %796 = vmatprep.mubr.bf16.mxu0 %v8141_v7 }
 0x18d   :  { %4877 = vmatmul.mubr.msk.bf16.gmra.mrb[40].mxu0 %vm346_vm3, %v6362_v9 }
 0x18e   :  { %806 = vmatprep.mubr.bf16.mxu0 %v8141_v7 }
 0x195   :  { %4878 = vmatmul.mubr.msk.bf16.gmra.mrb[44].mxu0 %vm346_vm3, %v6366_v15 }
 0x196   :  { %816 = vmatprep.mubr.bf16.mxu0 %v8141_v7 }
 0x19d   :  { %4879 = vmatmul.mubr.msk.bf16.gmra.mrb[48].mxu0 %vm346_vm3, %v6376_v32 }
 0x19e   :  { %826 = vmatprep.mubr.bf16.mxu0 %v8141_v7 }
 0x1a5   :  { %4880 = vmatmul.mubr.msk.bf16.gmra.mrb[52].mxu0 %vm346_vm3, %v6382_v37 }
 0x1a6   :  { %836 = vmatprep.mubr.bf16.mxu0 %v8141_v7 }
 0x1ad   :  { %4881 = vmatmul.mubr.msk.bf16.gmra.mrb[56].mxu0 %vm346_vm3, %v6394_v50 }
 0x1ae   :  { %846 = vmatprep.mubr.bf16.mxu0 %v8141_v7 }
 0x1b5   :  { %4882 = vmatmul.mubr.msk.bf16.gmra.mrb[60].mxu0 %vm346_vm3, %v6399_v54 }
 0x1b6   :  { %856 = vmatprep.mubr.bf16.mxu0 %v8141_v7 }
 0x1bd   :  { %857 = vmatmul.mubr.bf16.gmra.mrb[100].mxu0 %v8143_v11 }
 0x1be   :  { %862 = vmatprep.mubr.bf16.mxu0 %v8141_v7 }
 0x1c5   :  { %863 = vmatmul.mubr.bf16.gmra.mrb[104].mxu0 %v8143_v11 }
 0x1c6   :  { %868 = vmatprep.mubr.bf16.mxu0 %v8141_v7 }
 0x1c8   :  { %v611_v19 = vpop.f32.mrb[64].mxu0 }
 0x1c9   :  { %v612_v21 = vpop.f32.mrb[65].mxu0 }
 0x1ca   :  { %v613_v22 = vpop.f32.mrb[66].mxu0 }
 0x1cb   :  { %v614_v25 = vpop.f32.mrb[67].mxu0 }
 0x1cd   :  { %869 = vmatmul.mubr.bf16.gmra.mrb[108].mxu0 %v8143_v11 }
 0x1ce   :  { %874 = vmatprep.mubr.bf16.mxu0 %v8141_v7 }
 0x1d0   :  { %v617_v26 = vpop.f32.mrb[68].mxu0 }
 0x1d1   :  { %v618_v28 = vpop.f32.mrb[69].mxu0  ;;  %v1270_v26 = vlaneseq }
 0x1d2   :  { %v619_v29 = vpop.f32.mrb[70].mxu0 }
 0x1d3   :  { %v620_v30 = vpop.f32.mrb[71].mxu0 }
 0x1d4   :  { %v1271_v30 = vshrl.u32 %v1270_v26, 7 }
 0x1d5   :  { %875 = vmatmul.mubr.bf16.gmra.mrb[112].mxu0 %v8143_v11 }
 0x1d6   :  { %880 = vmatprep.mubr.bf16.mxu0 %v8141_v7 }
 0x1d8   :  { %v623_v31 = vpop.f32.mrb[72].mxu0 }
 0x1d9   :  { %v624_v33 = vpop.f32.mrb[73].mxu0 }
 0x1da   :  { %v625_v34 = vpop.f32.mrb[74].mxu0 }
 0x1db   :  { %v626_v35 = vpop.f32.mrb[75].mxu0  ;;  %v6611_v34 = vsub.s32 0, %v1271_v30 }
 0x1dd   :  { %881 = vmatmul.mubr.bf16.gmra.mrb[116].mxu0 %v8143_v11  ;;  %8147 = vst [vmem:[#allocation5_spill] sm:$0xff] %v6611_v34 }
 0x1de   :  { %886 = vmatprep.mubr.bf16.mxu0 %v8141_v7 }
 0x1e0   :  { %v629_v36 = vpop.f32.mrb[76].mxu0 }
 0x1e1   :  { %v630_v38 = vpop.f32.mrb[77].mxu0  ;;  %v1268_v36 = vld [vmem:[%s8128_s2] sm:$0x3]  ;;  %s6074_s2 = smov 16  }
 0x1e2   :  { %v631_v40 = vpop.f32.mrb[78].mxu0  ;;  %v6616_v38 = vsub.s32 1, %v1271_v30 }
 0x1e3   :  { %v632_v41 = vpop.f32.mrb[79].mxu0 }
 0x1e4   :  { %8148 = vst [vmem:[#allocation6_spill] sm:$0xff] %v6616_v38  ;;  %v6619_v41 = vrot.slane %v1268_v36, %v6611_v34 }
 0x1e5   :  { %887 = vmatmul.mubr.bf16.gmra.mrb[120].mxu0 %v8143_v11 }
 0x1e6   :  { %892 = vmatprep.mubr.bf16.mxu0 %v8141_v7 }
 0x1e8   :  { %v635_v42 = vpop.f32.mrb[80].mxu0 }
 0x1e9   :  { %v636_v44 = vpop.f32.mrb[81].mxu0  ;;  %v6622_v42 = vrot.slane %v1268_v36, %v6616_v38 }
 0x1ea   :  { %v637_v45 = vpop.f32.mrb[82].mxu0 }
 0x1eb   :  { %v638_v46 = vpop.f32.mrb[83].mxu0 }
 0x1ed   :  { %893 = vmatmul.mubr.bf16.gmra.mrb[124].mxu0 %v8143_v11 }
 0x1ee   :  { %931 = vmatprep.mubr.bf16.mxu0 %v8141_v7 }
 0x1f0   :  { %v641_v47 = vpop.f32.mrb[84].mxu0 }
 0x1f1   :  { %v642_v48 = vpop.f32.mrb[85].mxu0 }
 0x1f2   :  { %v643_v49 = vpop.f32.mrb[86].mxu0 }
 0x1f3   :  { %v644_v51 = vpop.f32.mrb[87].mxu0 }
 0x1f5   :  { %932 = vmatmul.mubr.bf16.vlgmr.msra.gmra.mrb[128].mxu0 %v8143_v11 }
 0x1f6   :  { %937 = vmatprep.mubr.bf16.mxu0 %v8141_v7 }
 0x1f8   :  { %v647_v55 = vpop.f32.mrb[88].mxu0 }
 0x1f9   :  { %v648_v56 = vpop.f32.mrb[89].mxu0 }
 0x1fa   :  { %v649_v20 = vpop.f32.mrb[90].mxu0 }
 0x1fb   :  { %v650_v57 = vpop.f32.mrb[91].mxu0 }
 0x1fd   :  { %4884 = vmatmul.mubr.msk.bf16.gmra.mrb[132].mxu0 %vm346_vm3, %v6303_v8 }
 0x1fe   :  { %943 = vmatprep.mubr.bf16.mxu0 %v8141_v7 }
 0x200   :  { %v653_v59 = vpop.f32.mrb[92].mxu0 }
 0x201   :  { %v654_v60 = vpop.f32.mrb[93].mxu0 }
 0x202   :  { %v655_v63 = vpop.f32.mrb[94].mxu0 }
 0x203   :  { %v656_v61 = vpop.f32.mrb[95].mxu0 }
 0x205   :  { %4885 = vmatmul.mubr.msk.bf16.gmra.mrb[0].mxu0 %vm346_vm3, %v6316_v23 }
 0x206   :  { %953 = vmatprep.mubr.bf16.mxu0 %v8141_v7 }
 0x208   :  { %v692_v0 = vpop.f32.mrb[96].mxu0 }
 0x209   :  { %v693_v1 = vpop.f32.mrb[97].mxu0 }
 0x20a   :  { %v694_v2 = vpop.f32.mrb[98].mxu0 }
 0x20b   :  { %v695_v3 = vpop.f32.mrb[99].mxu0 }
 0x20d   :  { %4886 = vmatmul.mubr.msk.bf16.gmra.mrb[4].mxu0 %vm346_vm3, %v6333_v39 }
 0x20e   :  { %963 = vmatprep.mubr.bf16.mxu0 %v8141_v7 }
 0x215   :  { %4887 = vmatmul.mubr.msk.bf16.gmra.mrb[8].mxu0 %vm346_vm3, %v6337_v43 }
 0x216   :  { %973 = vmatprep.mubr.bf16.mxu0 %v8141_v7 }
 0x21d   :  { %4888 = vmatmul.mubr.msk.bf16.gmra.mrb[12].mxu0 %vm346_vm3, %v6397_v52 }
 0x21e   :  { %983 = vmatprep.mubr.bf16.mxu0 %v8141_v7 }
 0x225   :  { %4889 = vmatmul.mubr.msk.bf16.gmra.mrb[16].mxu0 %vm346_vm3, %v6410_v62 }
 0x226   :  { %993 = vmatprep.mubr.bf16.mxu0 %v8141_v7 }
 0x22d   :  { %4890 = vmatmul.mubr.msk.bf16.gmra.mrb[20].mxu0 %vm346_vm3, %v6421_v24 }
 0x22e   :  { %1003 = vmatprep.mubr.bf16.mxu0 %v8141_v7 }
 0x235   :  { %4891 = vmatmul.mubr.msk.bf16.gmra.mrb[24].mxu0 %vm346_vm3, %v6433_v27 }
 0x236   :  { %1013 = vmatprep.mubr.bf16.mxu0 %v8141_v7 }
 0x23d   :  { %4892 = vmatmul.mubr.msk.bf16.gmra.mrb[28].mxu0 %vm346_vm3, %v6345_v53 }
 0x23e   :  { %1023 = vmatprep.mubr.bf16.mxu0 %v8141_v7 }
 0x245   :  { %4893 = vmatmul.mubr.msk.bf16.gmra.mrb[32].mxu0 %vm346_vm3, %v6351_v58 }
 0x246   :  { %1033 = vmatprep.mubr.bf16.mxu0 %v8141_v7 }
 0x24d   :  { %4894 = vmatmul.mubr.msk.bf16.gmra.mrb[36].mxu0 %vm346_vm3, %v6362_v9 }
 0x24e   :  { %1043 = vmatprep.mubr.bf16.mxu0 %v8141_v7 }
 0x255   :  { %4895 = vmatmul.mubr.msk.bf16.gmra.mrb[40].mxu0 %vm346_vm3, %v6366_v15 }
 0x256   :  { %1053 = vmatprep.mubr.bf16.mxu0 %v8141_v7 }
 0x25d   :  { %4896 = vmatmul.mubr.msk.bf16.gmra.mrb[44].mxu0 %vm346_vm3, %v6376_v32 }
 0x25e   :  { %1063 = vmatprep.mubr.bf16.mxu0 %v8141_v7 }
 0x265   :  { %4897 = vmatmul.mubr.msk.bf16.gmra.mrb[48].mxu0 %vm346_vm3, %v6382_v37 }
 0x266   :  { %1073 = vmatprep.mubr.bf16.mxu0 %v8141_v7 }
 0x26d   :  { %4898 = vmatmul.mubr.msk.bf16.gmra.mrb[52].mxu0 %vm346_vm3, %v6394_v50 }
 0x26e   :  { %1083 = vmatprep.mubr.bf16.mxu0 %v8141_v7 }
 0x275   :  { %4899 = vmatmul.mubr.msk.bf16.gmra.mrb[56].mxu0 %vm346_vm3, %v6399_v54 }
 0x276   :  { %1093 = vmatprep.mubr.bf16.mxu0 %v8141_v7 }
 0x27d   :  { %1094 = vmatmul.mubr.bf16.gmra.mrb[60].mxu0 %v8143_v11 }
 0x27e   :  { %1103 = vmatprep.mubr.bf16.mxu0 %v8141_v7 }
 0x285   :  { %1104 = vmatmul.mubr.bf16.gmra.mrb[136].mxu0 %v8143_v11 }
 0x286   :  { %1109 = vmatprep.mubr.bf16.mxu0 %v8141_v7 }
 0x28d   :  { %1110 = vmatmul.mubr.bf16.gmra.mrb[140].mxu0 %v8143_v11 }
 0x28e   :  { %1115 = vmatprep.mubr.bf16.mxu0 %v8141_v7 }
 0x290   :  { %v858_v8 = vpop.f32.mrb[100].mxu0 }
 0x291   :  { %v859_v23 = vpop.f32.mrb[101].mxu0 }
 0x292   :  { %v860_v39 = vpop.f32.mrb[102].mxu0 }
 0x293   :  { %v861_v43 = vpop.f32.mrb[103].mxu0 }
 0x295   :  { %1116 = vmatmul.mubr.bf16.gmra.mrb[144].mxu0 %v8143_v11 }
 0x296   :  { %1121 = vmatprep.mubr.bf16.mxu0 %v8141_v7 }
 0x298   :  { %v864_v53 = vpop.f32.mrb[104].mxu0 }
 0x299   :  { %v865_v58 = vpop.f32.mrb[105].mxu0 }
 0x29a   :  { %v866_v9 = vpop.f32.mrb[106].mxu0 }
 0x29b   :  { %v867_v15 = vpop.f32.mrb[107].mxu0 }
 0x29d   :  { %1122 = vmatmul.mubr.bf16.gmra.mrb[148].mxu0 %v8143_v11 }
 0x29e   :  { %1127 = vmatprep.mubr.bf16.mxu0 %v8141_v7 }
 0x2a0   :  { %v870_v32 = vpop.f32.mrb[108].mxu0 }
 0x2a1   :  { %v871_v37 = vpop.f32.mrb[109].mxu0 }
 0x2a2   :  { %v872_v50 = vpop.f32.mrb[110].mxu0 }
 0x2a3   :  { %v873_v52 = vpop.f32.mrb[111].mxu0 }
 0x2a5   :  { %1128 = vmatmul.mubr.bf16.gmra.mrb[152].mxu0 %v8143_v11 }
 0x2a6   :  { %1133 = vmatprep.mubr.bf16.mxu0 %v8141_v7 }
 0x2a8   :  { %v876_v54 = vpop.f32.mrb[112].mxu0 }
 0x2a9   :  { %v877_v62 = vpop.f32.mrb[113].mxu0 }
 0x2aa   :  { %v878_v24 = vpop.f32.mrb[114].mxu0 }
 0x2ab   :  { %v879_v4 = vpop.f32.mrb[115].mxu0 }
 0x2ad   :  { %1134 = vmatmul.mubr.bf16.gmra.mrb[156].mxu0 %v8143_v11 }
 0x2b0   :  { %v882_v5 = vpop.f32.mrb[116].mxu0 }
 0x2b1   :  { %v883_v6 = vpop.f32.mrb[117].mxu0 }
 0x2b2   :  { %v884_v10 = vpop.f32.mrb[118].mxu0 }
 0x2b3   :  { %v885_v12 = vpop.f32.mrb[119].mxu0 }
 0x2b8   :  { %v888_v27 = vpop.f32.mrb[120].mxu0 }
 0x2b9   :  { %v889_v13 = vpop.f32.mrb[121].mxu0 }
 0x2ba   :  { %v890_v14 = vpop.f32.mrb[122].mxu0 }
 0x2bb   :  { %v891_v16 = vpop.f32.mrb[123].mxu0 }
 0x2c0   :  { %v894_v17 = vpop.f32.mrb[124].mxu0 }
 0x2c1   :  { %v895_v18 = vpop.f32.mrb[125].mxu0 }
 0x2c2   :  { %v896_v19 = vpop.f32.mrb[126].mxu0 }
 0x2c3   :  { %v897_v21 = vpop.f32.mrb[127].mxu0 }
 0x2c8   :  { %v933_v22 = vpop.f32.mrb[128].mxu0 }
 0x2c9   :  { %v934_v25 = vpop.f32.mrb[129].mxu0 }
 0x2ca   :  { %v935_v28 = vpop.f32.mrb[130].mxu0 }
 0x2cb   :  { %v936_v29 = vpop.f32.mrb[131].mxu0 }
 0x2d0   :  { %v939_v31 = vpop.f32.mrb[132].mxu0 }
 0x2d1   :  { %v940_v33 = vpop.f32.mrb[133].mxu0 }
 0x2d2   :  { %v941_v35 = vpop.f32.mrb[134].mxu0 }
 0x2d3   :  { %v942_v40 = vpop.f32.mrb[135].mxu0 }
 0x2d8   :  { %v945_v44 = vpop.f32.mrb[0].mxu0 }
 0x2d9   :  { %v1280_v45 = vadd.f32 %v6619_v41, %v945_v44  ;;  %v947_v46 = vpop.f32.mrb[1].mxu0 }
 0x2da   :  { %v1281_v47 = vadd.f32 %v6622_v42, %v947_v46  ;;  %v949_v48 = vpop.f32.mrb[2].mxu0 }
 0x2db   :  { %v1344_v49 = vmax.f32 %v1280_v45, 0.0  ;;  %v1282_v51 = vadd.f32 %v6619_v41, %v949_v48  ;;  %v951_v55 = vpop.f32.mrb[3].mxu0 }
 0x2dc   :  { %v1345_v56 = vmax.f32 %v1281_v47, 0.0  ;;  %v1283_v20 = vadd.f32 %v6622_v42, %v951_v55 }
 0x2dd   :  { %v1346_v57 = vmax.f32 %v1282_v51, 0.0 }
 0x2de   :  { %v6628_v59 = vmax.f32 %v1344_v49, %v1345_v56  ;;  %v1347_v60 = vmax.f32 %v1283_v20, 0.0 }
 0x2e0   :  { %v5455_v63 = vpack.i.bf16 %v1347_v60, %v1345_v56  ;;  %v6630_v61 = vmax.f32 %v1346_v57, %v1347_v60  ;;  %v955_v0 = vpop.f32.mrb[4].mxu0 }
 0x2e1   :  { %v1284_v1 = vadd.f32 %v6619_v41, %v955_v0  ;;  %v957_v2 = vpop.f32.mrb[5].mxu0 }
 0x2e2   :  { %v1285_v3 = vadd.f32 %v6622_v42, %v957_v2  ;;  %5456 = vrot.lane.b32.xlu0 %v5455_v63, %s6074_s2  ;;  %v959_v8 = vpop.f32.mrb[6].mxu0 }
 0x2e3   :  { %v1348_v23 = vmax.f32 %v1284_v1, 0.0  ;;  %v1286_v39 = vadd.f32 %v6619_v41, %v959_v8  ;;  %v961_v43 = vpop.f32.mrb[7].mxu0 }
 0x2e4   :  { %v1349_v53 = vmax.f32 %v1285_v3, 0.0  ;;  %v1287_v58 = vadd.f32 %v6622_v42, %v961_v43 }
 0x2e5   :  { %v1350_v9 = vmax.f32 %v1286_v39, 0.0 }
 0x2e6   :  { %v6637_v15 = vmax.f32 %v1348_v23, %v1349_v53  ;;  %v1351_v32 = vmax.f32 %v1287_v58, 0.0 }
 0x2e8   :  { %v5460_v37 = vpack.i.bf16 %v1351_v32, %v1349_v53  ;;  %v6639_v50 = vmax.f32 %v1350_v9, %v1351_v32  ;;  %v965_v52 = vpop.f32.mrb[8].mxu0 }
 0x2e9   :  { %v1288_v54 = vadd.f32 %v6619_v41, %v965_v52  ;;  %v967_v62 = vpop.f32.mrb[9].mxu0 }
 0x2ea   :  { %v1289_v24 = vadd.f32 %v6622_v42, %v967_v62  ;;  %5461 = vrot.lane.b32.xlu1 %v5460_v37, %s6074_s2  ;;  %v969_v4 = vpop.f32.mrb[10].mxu0 }
 0x2eb   :  { %v1352_v5 = vmax.f32 %v1288_v54, 0.0  ;;  %v1290_v6 = vadd.f32 %v6619_v41, %v969_v4  ;;  %v971_v10 = vpop.f32.mrb[11].mxu0 }
 0x2ec   :  { %v1353_v12 = vmax.f32 %v1289_v24, 0.0  ;;  %v1291_v27 = vadd.f32 %v6622_v42, %v971_v10 }
 0x2ed   :  { %v1354_v13 = vmax.f32 %v1290_v6, 0.0 }
 0x2ee   :  { %v6646_v14 = vmax.f32 %v1352_v5, %v1353_v12  ;;  %v1355_v16 = vmax.f32 %v1291_v27, 0.0 }
 0x2f0   :  { %v5465_v17 = vpack.i.bf16 %v1355_v16, %v1353_v12  ;;  %v6648_v18 = vmax.f32 %v1354_v13, %v1355_v16  ;;  %v975_v19 = vpop.f32.mrb[12].mxu0 }
 0x2f1   :  { %v1292_v21 = vadd.f32 %v6619_v41, %v975_v19  ;;  %v977_v22 = vpop.f32.mrb[13].mxu0 }
 0x2f2   :  { %v1293_v25 = vadd.f32 %v6622_v42, %v977_v22  ;;  %5466 = vrot.lane.b32.xlu0 %v5465_v17, %s6074_s2  ;;  %v979_v26 = vpop.f32.mrb[14].mxu0 }
 0x2f3   :  { %v1356_v28 = vmax.f32 %v1292_v21, 0.0  ;;  %v1294_v29 = vadd.f32 %v6619_v41, %v979_v26  ;;  %v981_v30 = vpop.f32.mrb[15].mxu0 }
 0x2f4   :  { %v1357_v31 = vmax.f32 %v1293_v25, 0.0  ;;  %v1295_v33 = vadd.f32 %v6622_v42, %v981_v30 }
 0x2f5   :  { %v1358_v35 = vmax.f32 %v1294_v29, 0.0 }
 0x2f6   :  { %v6655_v36 = vmax.f32 %v1356_v28, %v1357_v31  ;;  %v1359_v40 = vmax.f32 %v1295_v33, 0.0 }
 0x2f8   :  { %v5470_v44 = vpack.i.bf16 %v1359_v40, %v1357_v31  ;;  %v6657_v45 = vmax.f32 %v1358_v35, %v1359_v40  ;;  %v985_v46 = vpop.f32.mrb[16].mxu0 }
 0x2f9   :  { %v1296_v47 = vadd.f32 %v6619_v41, %v985_v46  ;;  %v987_v48 = vpop.f32.mrb[17].mxu0 }
 0x2fa   :  { %v1297_v49 = vadd.f32 %v6622_v42, %v987_v48  ;;  %5471 = vrot.lane.b32.xlu1 %v5470_v44, %s6074_s2  ;;  %v989_v51 = vpop.f32.mrb[18].mxu0 }
 0x2fb   :  { %v1360_v55 = vmax.f32 %v1296_v47, 0.0  ;;  %v1298_v56 = vadd.f32 %v6619_v41, %v989_v51  ;;  %v991_v20 = vpop.f32.mrb[19].mxu0 }
 0x2fc   :  { %v1361_v57 = vmax.f32 %v1297_v49, 0.0  ;;  %v1299_v60 = vadd.f32 %v6622_v42, %v991_v20 }
 0x2fd   :  { %v1362_v63 = vmax.f32 %v1298_v56, 0.0 }
 0x2fe   :  { %v6664_v0 = vmax.f32 %v1360_v55, %v1361_v57  ;;  %v1363_v1 = vmax.f32 %v1299_v60, 0.0 }
 0x300   :  { %v5475_v2 = vpack.i.bf16 %v1363_v1, %v1361_v57  ;;  %v6666_v3 = vmax.f32 %v1362_v63, %v1363_v1  ;;  %v995_v8 = vpop.f32.mrb[20].mxu0 }
 0x301   :  { %v1300_v23 = vadd.f32 %v6619_v41, %v995_v8  ;;  %v997_v39 = vpop.f32.mrb[21].mxu0 }
 0x302   :  { %v1301_v43 = vadd.f32 %v6622_v42, %v997_v39  ;;  %5476 = vrot.lane.b32.xlu0 %v5475_v2, %s6074_s2  ;;  %v999_v53 = vpop.f32.mrb[22].mxu0 }
 0x303   :  { %v1364_v58 = vmax.f32 %v1300_v23, 0.0  ;;  %v1302_v9 = vadd.f32 %v6619_v41, %v999_v53  ;;  %v1001_v32 = vpop.f32.mrb[23].mxu0 }
 0x304   :  { %v1365_v37 = vmax.f32 %v1301_v43, 0.0  ;;  %v1303_v52 = vadd.f32 %v6622_v42, %v1001_v32 }
 0x305   :  { %v1366_v54 = vmax.f32 %v1302_v9, 0.0 }
 0x306   :  { %v6673_v62 = vmax.f32 %v1364_v58, %v1365_v37  ;;  %v1367_v24 = vmax.f32 %v1303_v52, 0.0 }
 0x308   :  { %v5480_v4 = vpack.i.bf16 %v1367_v24, %v1365_v37  ;;  %v6675_v5 = vmax.f32 %v1366_v54, %v1367_v24  ;;  %v1005_v6 = vpop.f32.mrb[24].mxu0 }
 0x309   :  { %v1304_v10 = vadd.f32 %v6619_v41, %v1005_v6  ;;  %v1007_v12 = vpop.f32.mrb[25].mxu0 }
 0x30a   :  { %v1305_v27 = vadd.f32 %v6622_v42, %v1007_v12  ;;  %5481 = vrot.lane.b32.xlu1 %v5480_v4, %s6074_s2  ;;  %v1009_v13 = vpop.f32.mrb[26].mxu0 }
 0x30b   :  { %v1368_v16 = vmax.f32 %v1304_v10, 0.0  ;;  %v1306_v17 = vadd.f32 %v6619_v41, %v1009_v13  ;;  %v1011_v19 = vpop.f32.mrb[27].mxu0 }
 0x30c   :  { %v1369_v21 = vmax.f32 %v1305_v27, 0.0  ;;  %v1307_v22 = vadd.f32 %v6622_v42, %v1011_v19 }
 0x30d   :  { %v1370_v25 = vmax.f32 %v1306_v17, 0.0 }
 0x30e   :  { %v6682_v26 = vmax.f32 %v1368_v16, %v1369_v21  ;;  %v1371_v28 = vmax.f32 %v1307_v22, 0.0 }
 0x310   :  { %v5485_v29 = vpack.i.bf16 %v1371_v28, %v1369_v21  ;;  %v6684_v30 = vmax.f32 %v1370_v25, %v1371_v28  ;;  %v1015_v31 = vpop.f32.mrb[28].mxu0 }
 0x311   :  { %v1308_v33 = vadd.f32 %v6619_v41, %v1015_v31  ;;  %v1017_v35 = vpop.f32.mrb[29].mxu0 }
 0x312   :  { %v1309_v40 = vadd.f32 %v6622_v42, %v1017_v35  ;;  %5486 = vrot.lane.b32.xlu0 %v5485_v29, %s6074_s2  ;;  %v1019_v44 = vpop.f32.mrb[30].mxu0 }
 0x313   :  { %v1372_v46 = vmax.f32 %v1308_v33, 0.0  ;;  %v1310_v47 = vadd.f32 %v6619_v41, %v1019_v44  ;;  %v1021_v48 = vpop.f32.mrb[31].mxu0 }
 0x314   :  { %v1373_v49 = vmax.f32 %v1309_v40, 0.0  ;;  %v1311_v51 = vadd.f32 %v6622_v42, %v1021_v48 }
 0x315   :  { %v1374_v55 = vmax.f32 %v1310_v47, 0.0 }
 0x316   :  { %v6691_v56 = vmax.f32 %v1372_v46, %v1373_v49  ;;  %v1375_v20 = vmax.f32 %v1311_v51, 0.0 }
 0x318   :  { %v5490_v57 = vpack.i.bf16 %v1375_v20, %v1373_v49  ;;  %v6693_v60 = vmax.f32 %v1374_v55, %v1375_v20  ;;  %v1025_v63 = vpop.f32.mrb[32].mxu0 }
 0x319   :  { %v1312_v1 = vadd.f32 %v6619_v41, %v1025_v63  ;;  %v1027_v2 = vpop.f32.mrb[33].mxu0 }
 0x31a   :  { %v1313_v8 = vadd.f32 %v6622_v42, %v1027_v2  ;;  %5491 = vrot.lane.b32.xlu1 %v5490_v57, %s6074_s2  ;;  %v1029_v23 = vpop.f32.mrb[34].mxu0  ;;  %v5810_v57 = vld [vmem:[%s8129_s3 + $0x4] ss:$16 sps:$4 sm:$0xff]   ;;  %v5812_v2 = vld [vmem:[%s8129_s3] ss:$16 sps:$4 sm:$0xff]  }
 0x31b   :  { %v1376_v39 = vmax.f32 %v1312_v1, 0.0  ;;  %v1314_v43 = vadd.f32 %v6619_v41, %v1029_v23  ;;  %v1031_v53 = vpop.f32.mrb[35].mxu0  ;;  %2042 = vmatprep.subr.bf16.mxu1 %v5810_v57  ;;  %v5822_v57 = vld [vmem:[%s8129_s3 + $0x84] ss:$16 sps:$4 sm:$0xff]  }
 0x31c   :  { %v1377_v58 = vmax.f32 %v1313_v8, 0.0  ;;  %v1315_v9 = vadd.f32 %v6622_v42, %v1031_v53  ;;  %2043 = vmatpush1.bf16.msra.mxu1 %v5812_v2  ;;  %v5815_v53 = vld [vmem:[%s8129_s3 + $0x20] ss:$16 sps:$4 sm:$0xff]  }
 0x31d   :  { %v1378_v32 = vmax.f32 %v1314_v43, 0.0  ;;  %v5813_v43 = vld [vmem:[%s8129_s3 + $0x24] ss:$16 sps:$4 sm:$0xff]  }
 0x31e   :  { %v6700_v37 = vmax.f32 %v1376_v39, %v1377_v58  ;;  %v1379_v52 = vmax.f32 %v1315_v9, 0.0  ;;  %2044 = vmatprep.subr.bf16.mxu1 %v5813_v43 }
 0x320   :  { %v5495_v54 = vpack.i.bf16 %v1379_v52, %v1377_v58  ;;  %v6702_v24 = vmax.f32 %v1378_v32, %v1379_v52  ;;  %v1035_v4 = vpop.f32.mrb[36].mxu0  ;;  %2045 = vmatpush1.bf16.msra.mxu1 %v5815_v53 }
 0x321   :  { %v1316_v6 = vadd.f32 %v6619_v41, %v1035_v4  ;;  %v1037_v10 = vpop.f32.mrb[37].mxu0 }
 0x322   :  { %v1317_v12 = vadd.f32 %v6622_v42, %v1037_v10  ;;  %5496 = vrot.lane.b32.xlu0 %v5495_v54, %s6074_s2  ;;  %v1039_v27 = vpop.f32.mrb[38].mxu0 }
 0x323   :  { %v1380_v13 = vmax.f32 %v1316_v6, 0.0  ;;  %v1318_v16 = vadd.f32 %v6619_v41, %v1039_v27  ;;  %v1041_v17 = vpop.f32.mrb[39].mxu0 }
 0x324   :  { %v1381_v19 = vmax.f32 %v1317_v12, 0.0  ;;  %v1319_v21 = vadd.f32 %v6622_v42, %v1041_v17 }
 0x325   :  { %v1382_v22 = vmax.f32 %v1318_v16, 0.0 }
 0x326   :  { %v6709_v25 = vmax.f32 %v1380_v13, %v1381_v19  ;;  %v1383_v28 = vmax.f32 %v1319_v21, 0.0  ;;  %v5816_v13 = vld [vmem:[%s8129_s3 + $0x44] ss:$16 sps:$4 sm:$0xff]  }
 0x327   :  { %2046 = vmatprep.subr.bf16.mxu1 %v5816_v13 }
 0x328   :  { %v5500_v29 = vpack.i.bf16 %v1383_v28, %v1381_v19  ;;  %v6711_v31 = vmax.f32 %v1382_v22, %v1383_v28  ;;  %v1045_v33 = vpop.f32.mrb[40].mxu0  ;;  %v5818_v19 = vld [vmem:[%s8129_s3 + $0x40] ss:$16 sps:$4 sm:$0xff]  }
 0x329   :  { %v1320_v35 = vadd.f32 %v6619_v41, %v1045_v33  ;;  %v1047_v40 = vpop.f32.mrb[41].mxu0  ;;  %2047 = vmatpush1.bf16.msra.mxu1 %v5818_v19  ;;  %v5821_v33 = vld [vmem:[%s8129_s3 + $0x60] ss:$16 sps:$4 sm:$0xff]   ;;  %v5828_v19 = vld [vmem:[%s8129_s3 + $0xc4] ss:$16 sps:$4 sm:$0xff]  }
 0x32a   :  { %v1321_v44 = vadd.f32 %v6622_v42, %v1047_v40  ;;  %5501 = vrot.lane.b32.xlu1 %v5500_v29, %s6074_s2  ;;  %v1049_v46 = vpop.f32.mrb[42].mxu0  ;;  %v5819_v29 = vld [vmem:[%s8129_s3 + $0x64] ss:$16 sps:$4 sm:$0xff]  }
 0x32b   :  { %v1384_v47 = vmax.f32 %v1320_v35, 0.0  ;;  %v1322_v48 = vadd.f32 %v6619_v41, %v1049_v46  ;;  %v1051_v49 = vpop.f32.mrb[43].mxu0  ;;  %2048 = vmatprep.subr.bf16.mxu1 %v5819_v29  ;;  %v5830_v29 = vld [vmem:[%s8129_s3 + $0xc0] ss:$16 sps:$4 sm:$0xff]  }
 0x32c   :  { %v1385_v51 = vmax.f32 %v1321_v44, 0.0  ;;  %v1323_v55 = vadd.f32 %v6622_v42, %v1051_v49 }
 0x32d   :  { %v1386_v20 = vmax.f32 %v1322_v48, 0.0  ;;  %2049 = vmatpush1.bf16.msra.mxu1 %v5821_v33 }
 0x32e   :  { %v6721_v63 = vmax.f32 %v1384_v47, %v1385_v51  ;;  %v1387_v1 = vmax.f32 %v1323_v55, 0.0  ;;  %2050 = vmatprep.subr.bf16.mxu1 %v5822_v57 }
 0x330   :  { %v5505_v8 = vpack.i.bf16 %v1387_v1, %v1385_v51  ;;  %v6726_v23 = vmax.f32 %v1386_v20, %v1387_v1  ;;  %v1055_v39 = vpop.f32.mrb[44].mxu0 }
 0x331   :  { %v1324_v58 = vadd.f32 %v6619_v41, %v1055_v39  ;;  %v1057_v9 = vpop.f32.mrb[45].mxu0 }
 0x332   :  { %v1325_v32 = vadd.f32 %v6622_v42, %v1057_v9  ;;  %5506 = vrot.lane.b32.xlu0 %v5505_v8, %s6074_s2  ;;  %v1059_v52 = vpop.f32.mrb[46].mxu0  ;;  %v5824_v8 = vld [vmem:[%s8129_s3 + $0x80] ss:$16 sps:$4 sm:$0xff]  }
 0x333   :  { %v1388_v54 = vmax.f32 %v1324_v58, 0.0  ;;  %v1326_v4 = vadd.f32 %v6619_v41, %v1059_v52  ;;  %v1061_v6 = vpop.f32.mrb[47].mxu0  ;;  %2051 = vmatpush1.bf16.msra.mxu1 %v5824_v8  ;;  %v5825_v58 = vld [vmem:[%s8129_s3 + $0xa4] ss:$16 sps:$4 sm:$0xff]   ;;  %v5827_v9 = vld [vmem:[%s8129_s3 + $0xa0] ss:$16 sps:$4 sm:$0xff]  }
 0x334   :  { %v1389_v10 = vmax.f32 %v1325_v32, 0.0  ;;  %v1327_v12 = vadd.f32 %v6622_v42, %v1061_v6  ;;  %2052 = vmatprep.subr.bf16.mxu1 %v5825_v58 }
 0x335   :  { %v1390_v27 = vmax.f32 %v1326_v4, 0.0 }
 0x336   :  { %v6742_v16 = vmax.f32 %v1388_v54, %v1389_v10  ;;  %v1391_v17 = vmax.f32 %v1327_v12, 0.0 }
 0x337   :  { %2053 = vmatpush1.bf16.msra.mxu1 %v5827_v9 }
 0x338   :  { %v5510_v21 = vpack.i.bf16 %v1391_v17, %v1389_v10  ;;  %v6747_v22 = vmax.f32 %v1390_v27, %v1391_v17  ;;  %v1065_v28 = vpop.f32.mrb[48].mxu0  ;;  %2054 = vmatprep.subr.bf16.mxu1 %v5828_v19 }
 0x339   :  { %v1328_v35 = vadd.f32 %v6619_v41, %v1065_v28  ;;  %v1067_v40 = vpop.f32.mrb[49].mxu0 }
 0x33a   :  { %v1329_v44 = vadd.f32 %v6622_v42, %v1067_v40  ;;  %5511 = vrot.lane.b32.xlu1 %v5510_v21, %s6074_s2  ;;  %v1069_v46 = vpop.f32.mrb[50].mxu0 }
 0x33b   :  { %v1392_v47 = vmax.f32 %v1328_v35, 0.0  ;;  %v1330_v48 = vadd.f32 %v6619_v41, %v1069_v46  ;;  %v1071_v49 = vpop.f32.mrb[51].mxu0  ;;  %2055 = vmatpush1.bf16.msra.mxu1 %v5830_v29  ;;  %v5833_v46 = vld [vmem:[%s8129_s3 + $0xe0] ss:$16 sps:$4 sm:$0xff]  }
 0x33c   :  { %v1393_v51 = vmax.f32 %v1329_v44, 0.0  ;;  %v1331_v55 = vadd.f32 %v6622_v42, %v1071_v49  ;;  %v5831_v44 = vld [vmem:[%s8129_s3 + $0xe4] ss:$16 sps:$4 sm:$0xff]  }
 0x33d   :  { %v1394_v20 = vmax.f32 %v1330_v48, 0.0  ;;  %2056 = vmatprep.subr.bf16.mxu1 %v5831_v44 }
 0x33e   :  { %v6763_v1 = vmax.f32 %v1392_v47, %v1393_v51  ;;  %v1395_v2 = vmax.f32 %v1331_v55, 0.0 }
 0x33f   :  { %2057 = vmatpush1.bf16.msra.mxu1 %v5833_v46 }
 0x340   :  { %v5515_v39 = vpack.i.bf16 %v1395_v2, %v1393_v51  ;;  %v6768_v43 = vmax.f32 %v1394_v20, %v1395_v2  ;;  %v1075_v53 = vpop.f32.mrb[52].mxu0 }
 0x341   :  { %v1332_v32 = vadd.f32 %v6619_v41, %v1075_v53  ;;  %v1077_v52 = vpop.f32.mrb[53].mxu0  ;;  %v5834_v53 = vld [vmem:[%s8129_s3 + $0x104] ss:$16 sps:$4 sm:$0xff]  }
 0x342   :  { %v1333_v54 = vadd.f32 %v6622_v42, %v1077_v52  ;;  %5516 = vrot.lane.b32.xlu0 %v5515_v39, %s6074_s2  ;;  %v1079_v4 = vpop.f32.mrb[54].mxu0  ;;  %2058 = vmatprep.subr.bf16.mxu1 %v5834_v53 }
 0x343   :  { %v1396_v6 = vmax.f32 %v1332_v32, 0.0  ;;  %v1334_v10 = vadd.f32 %v6619_v41, %v1079_v4  ;;  %v1081_v12 = vpop.f32.mrb[55].mxu0  ;;  %v5836_v32 = vld [vmem:[%s8129_s3 + $0x100] ss:$16 sps:$4 sm:$0xff]  }
 0x344   :  { %v1397_v27 = vmax.f32 %v1333_v54, 0.0  ;;  %v1335_v13 = vadd.f32 %v6622_v42, %v1081_v12  ;;  %2059 = vmatpush1.bf16.msra.mxu1 %v5836_v32 }
 0x345   :  { %v1398_v17 = vmax.f32 %v1334_v10, 0.0  ;;  %v5839_v10 = vld [vmem:[%s8129_s3 + $0x120] ss:$16 sps:$4 sm:$0xff]  }
 0x346   :  { %v6784_v21 = vmax.f32 %v1396_v6, %v1397_v27  ;;  %v1399_v28 = vmax.f32 %v1335_v13, 0.0  ;;  %v5837_v6 = vld [vmem:[%s8129_s3 + $0x124] ss:$16 sps:$4 sm:$0xff]  }
 0x347   :  { %2060 = vmatprep.subr.bf16.mxu1 %v5837_v6 }
 0x348   :  { %v5520_v33 = vpack.i.bf16 %v1399_v28, %v1397_v27  ;;  %v6789_v35 = vmax.f32 %v1398_v17, %v1399_v28  ;;  %v1085_v40 = vpop.f32.mrb[56].mxu0  ;;  %2061 = vmatpush1.bf16.msra.mxu1 %v5839_v10 }
 0x349   :  { %v1336_v47 = vadd.f32 %v6619_v41, %v1085_v40  ;;  %v1087_v48 = vpop.f32.mrb[57].mxu0 }
 0x34a   :  { %v1337_v49 = vadd.f32 %v6622_v42, %v1087_v48  ;;  %5521 = vrot.lane.b32.xlu1 %v5520_v33, %s6074_s2  ;;  %v1089_v51 = vpop.f32.mrb[58].mxu0 }
 0x34b   :  { %v1400_v55 = vmax.f32 %v1336_v47, 0.0  ;;  %v1338_v20 = vadd.f32 %v6619_v41, %v1089_v51  ;;  %v1091_v57 = vpop.f32.mrb[59].mxu0  ;;  %2075 = vmatmul.mubr.bf16.vlgmr.msra.gmra.mrb[0].mxu1 %v8143_v11 }
 0x34c   :  { %v1401_v2 = vmax.f32 %v1337_v49, 0.0  ;;  %v1339_v8 = vadd.f32 %v6622_v42, %v1091_v57 }
 0x34d   :  { %v1402_v39 = vmax.f32 %v1338_v20, 0.0 }
 0x34e   :  { %v6805_v58 = vmax.f32 %v1400_v55, %v1401_v2  ;;  %v1403_v9 = vmax.f32 %v1339_v8, 0.0 }
 0x350   :  { %v5525_v52 = vpack.i.bf16 %v1403_v9, %v1401_v2  ;;  %v6810_v54 = vmax.f32 %v1402_v39, %v1403_v9  ;;  %v1095_v4 = vpop.f32.mrb[60].mxu0 }
 0x351   :  { %v1340_v12 = vadd.f32 %v6619_v41, %v1095_v4  ;;  %v1097_v27 = vpop.f32.mrb[61].mxu0 }
 0x352   :  { %v1341_v13 = vadd.f32 %v6622_v42, %v1097_v27  ;;  %5526 = vrot.lane.b32.xlu0 %v5525_v52, %s6074_s2  ;;  %v1099_v17 = vpop.f32.mrb[62].mxu0 }
 0x353   :  { %v1404_v19 = vmax.f32 %v1340_v12, 0.0  ;;  %v1342_v28 = vadd.f32 %v6619_v41, %v1099_v17  ;;  %v1101_v29 = vpop.f32.mrb[63].mxu0 }
 0x354   :  { %v1405_v33 = vmax.f32 %v1341_v13, 0.0  ;;  %v1343_v40 = vadd.f32 %v6622_v42, %v1101_v29  ;;  %v5457_v48 = vpop.permute.xlu0 %5456 }
 0x355   :  { %v1406_v44 = vmax.f32 %v1342_v28, 0.0  ;;  %v5459_v20 = vunpack.i.h.bf16 %v5457_v48  ;;  %v5458_v57 = vunpack.i.l.bf16 %v5457_v48 }
 0x356   :  { %v6823_v46 = vmax.f32 %v1404_v19, %v1405_v33  ;;  %v1407_v47 = vmax.f32 %v1343_v40, 0.0 }
 0x357   :  { %v1538_v39 = vsel %vm1536_vm4, 0.0, %v5459_v20  ;;  %v1537_v53 = vsel %vm1536_vm4, 0.0, %v5458_v57 }
 0x358   :  { %v5530_v49 = vpack.i.bf16 %v1407_v47, %v1405_v33  ;;  %v6826_v51 = vmax.f32 %v1406_v44, %v1407_v47  ;;  %v1105_v55 = vpop.f32.mrb[136].mxu0  ;;  %v1601_v6 = vmax.f32 %v6628_v59, %v1537_v53  ;;  %v1602_v10 = vmax.f32 %v6630_v61, %v1538_v39 }
 0x359   :  { %v1106_v2 = vpop.f32.mrb[137].mxu0 }
 0x35a   :  { %5531 = vrot.lane.b32.xlu1 %v5530_v49, %s6074_s2  ;;  %v1107_v41 = vpop.f32.mrb[138].mxu0 }
 0x35b   :  { %v1108_v42 = vpop.f32.mrb[139].mxu0 }
 0x35c   :  { %v5462_v8 = vpop.permute.xlu1 %5461 }
 0x35d   :  { %v5464_v9 = vunpack.i.h.bf16 %v5462_v8  ;;  %v5463_v32 = vunpack.i.l.bf16 %v5462_v8 }
 0x35f   :  { %v1540_v52 = vsel %vm1536_vm4, 0.0, %v5464_v9  ;;  %v1539_v4 = vsel %vm1536_vm4, 0.0, %v5463_v32 }
 0x360   :  { %v1603_v12 = vmax.f32 %v6637_v15, %v1539_v4  ;;  %v1604_v27 = vmax.f32 %v6639_v50, %v1540_v52  ;;  %v1111_v13 = vpop.f32.mrb[140].mxu0 }
 0x361   :  { %v1112_v17 = vpop.f32.mrb[141].mxu0 }
 0x362   :  { %v1633_v19 = vmax.f32 %v1601_v6, %v1603_v12  ;;  %v1634_v28 = vmax.f32 %v1602_v10, %v1604_v27  ;;  %v1113_v29 = vpop.f32.mrb[142].mxu0 }
 0x363   :  { %v1114_v33 = vpop.f32.mrb[143].mxu0 }
 0x364   :  { %v5535_v40 = vpack.i.bf16 %v1634_v28, %v1633_v19  ;;  %v5467_v44 = vpop.permute.xlu0 %5466 }
 0x365   :  { %v5469_v48 = vunpack.i.h.bf16 %v5467_v44  ;;  %v5468_v49 = vunpack.i.l.bf16 %v5467_v44 }
 0x366   :  { %5536 = vrot.lane.b32.xlu0 %v5535_v40, %s6074_s2 }
 0x367   :  { %v1542_v15 = vsel %vm1536_vm4, 0.0, %v5469_v48  ;;  %v1541_v50 = vsel %vm1536_vm4, 0.0, %v5468_v49 }
 0x368   :  { %v1117_v47 = vpop.f32.mrb[144].mxu0  ;;  %v1605_v8 = vmax.f32 %v6646_v14, %v1541_v50  ;;  %v1606_v39 = vmax.f32 %v6648_v18, %v1542_v15 }
 0x369   :  { %v1118_v59 = vpop.f32.mrb[145].mxu0 }
 0x36a   :  { %v1119_v55 = vpop.f32.mrb[146].mxu0 }
 0x36b   :  { %v1120_v61 = vpop.f32.mrb[147].mxu0 }
 0x36c   :  { %v5472_v20 = vpop.permute.xlu1 %5471 }
 0x36d   :  { %v5474_v57 = vunpack.i.h.bf16 %v5472_v20  ;;  %v5473_v2 = vunpack.i.l.bf16 %v5472_v20 }
 0x36f   :  { %v1544_v41 = vsel %vm1536_vm4, 0.0, %v5474_v57  ;;  %v1543_v42 = vsel %vm1536_vm4, 0.0, %v5473_v2 }
 0x370   :  { %v1607_v53 = vmax.f32 %v6655_v36, %v1543_v42  ;;  %v1608_v9 = vmax.f32 %v6657_v45, %v1544_v41  ;;  %v1123_v32 = vpop.f32.mrb[148].mxu0 }
 0x371   :  { %v1124_v52 = vpop.f32.mrb[149].mxu0 }
 0x372   :  { %v1635_v4 = vmax.f32 %v1605_v8, %v1607_v53  ;;  %v1636_v6 = vmax.f32 %v1606_v39, %v1608_v9  ;;  %v1125_v10 = vpop.f32.mrb[150].mxu0 }
 0x373   :  { %v1126_v13 = vpop.f32.mrb[151].mxu0 }
 0x374   :  { %v1637_v17 = vmax.f32 %v1635_v4, %v1603_v12  ;;  %v1638_v19 = vmax.f32 %v1636_v6, %v1604_v27  ;;  %v5477_v28 = vpop.permute.xlu0 %5476 }
 0x375   :  { %v5479_v14 = vunpack.i.h.bf16 %v5477_v28  ;;  %v5478_v40 = vunpack.i.l.bf16 %v5477_v28 }
 0x376   :  { %v5540_v29 = vpack.i.bf16 %v1638_v19, %v1637_v17 }
 0x377   :  { %v1546_v45 = vsel %vm1536_vm4, 0.0, %v5479_v14  ;;  %v1545_v48 = vsel %vm1536_vm4, 0.0, %v5478_v40  ;;  %v5842_v14 = vld [vmem:[%s8129_s3 + $0xc] ss:$16 sps:$4 sm:$0xff]  }
 0x378   :  { %5541 = vrot.lane.b32.xlu1 %v5540_v29, %s6074_s2  ;;  %v1129_v33 = vpop.f32.mrb[152].mxu0  ;;  %v1609_v55 = vmax.f32 %v6664_v0, %v1545_v48  ;;  %v1610_v61 = vmax.f32 %v6666_v3, %v1546_v45  ;;  %2205 = vmatprep.subr.bf16.mxu1 %v5842_v14 }
 0x379   :  { %v1130_v18 = vpop.f32.mrb[153].mxu0  ;;  %v5840_v33 = vld [vmem:[%s8129_s3 + $0x8] ss:$16 sps:$4 sm:$0xff]  }
 0x37a   :  { %v1131_v44 = vpop.f32.mrb[154].mxu0  ;;  %2206 = vmatpush1.bf16.msra.mxu1 %v5840_v33 }
 0x37b   :  { %v1132_v36 = vpop.f32.mrb[155].mxu0 }
 0x37c   :  { %v5482_v47 = vpop.permute.xlu1 %5481 }
 0x37d   :  { %v5484_v49 = vunpack.i.h.bf16 %v5482_v47  ;;  %v5483_v59 = vunpack.i.l.bf16 %v5482_v47 }
 0x37f   :  { %v1548_v12 = vsel %vm1536_vm4, 0.0, %v5484_v49  ;;  %v1547_v27 = vsel %vm1536_vm4, 0.0, %v5483_v59 }
 0x380   :  { %v1611_v20 = vmax.f32 %v6673_v62, %v1547_v27  ;;  %v1612_v15 = vmax.f32 %v6675_v5, %v1548_v12  ;;  %v1135_v50 = vpop.f32.mrb[156].mxu0  ;;  %v5843_v12 = vld [vmem:[%s8129_s3 + $0x28] ss:$16 sps:$4 sm:$0xff]   ;;  %v5845_v27 = vld [vmem:[%s8129_s3 + $0x2c] ss:$16 sps:$4 sm:$0xff]  }
 0x381   :  { %v1136_v57 = vpop.f32.mrb[157].mxu0  ;;  %2207 = vmatprep.subr.bf16.mxu1 %v5845_v27 }
 0x382   :  { %v1639_v2 = vmax.f32 %v1609_v55, %v1611_v20  ;;  %v1640_v41 = vmax.f32 %v1610_v61, %v1612_v15  ;;  %v1137_v42 = vpop.f32.mrb[158].mxu0  ;;  %2208 = vmatpush1.bf16.msra.mxu1 %v5843_v12 }
 0x383   :  { %v1138_v8 = vpop.f32.mrb[159].mxu0 }
 0x384   :  { %v1641_v39 = vmax.f32 %v1639_v2, %v1607_v53  ;;  %v1642_v32 = vmax.f32 %v1640_v41, %v1608_v9  ;;  %v5487_v52 = vpop.permute.xlu0 %5486  ;;  %v5846_v2 = vld [vmem:[%s8129_s3 + $0x48] ss:$16 sps:$4 sm:$0xff]   ;;  %v5848_v41 = vld [vmem:[%s8129_s3 + $0x4c] ss:$16 sps:$4 sm:$0xff]  }
 0x385   :  { %v5489_v6 = vunpack.i.h.bf16 %v5487_v52  ;;  %v5488_v0 = vunpack.i.l.bf16 %v5487_v52  ;;  %2209 = vmatprep.subr.bf16.mxu1 %v5848_v41 }
 0x386   :  { %v5545_v4 = vpack.i.bf16 %v1642_v32, %v1641_v39  ;;  %2210 = vmatpush1.bf16.msra.mxu1 %v5846_v2 }
 0x387   :  { %v1550_v3 = vsel %vm1536_vm4, 0.0, %v5489_v6  ;;  %v1549_v62 = vsel %vm1536_vm4, 0.0, %v5488_v0 }
 0x388   :  { %5546 = vrot.lane.b32.xlu0 %v5545_v4, %s6074_s2  ;;  %v1613_v53 = vmax.f32 %v6682_v26, %v1549_v62  ;;  %v1614_v9 = vmax.f32 %v6684_v30, %v1550_v3 }
 0x38c   :  { %v5492_v10 = vpop.permute.xlu1 %5491 }
 0x38d   :  { %v5494_v5 = vunpack.i.h.bf16 %v5492_v10  ;;  %v5493_v13 = vunpack.i.l.bf16 %v5492_v10 }
 0x38f   :  { %v1552_v17 = vsel %vm1536_vm4, 0.0, %v5494_v5  ;;  %v1551_v19 = vsel %vm1536_vm4, 0.0, %v5493_v13 }
 0x390   :  { %v1615_v28 = vmax.f32 %v6691_v56, %v1551_v19  ;;  %v1616_v29 = vmax.f32 %v6693_v60, %v1552_v17 }
 0x392   :  { %v1643_v40 = vmax.f32 %v1613_v53, %v1615_v28  ;;  %v1644_v18 = vmax.f32 %v1614_v9, %v1616_v29  ;;  %v5849_v53 = vld [vmem:[%s8129_s3 + $0x68] ss:$16 sps:$4 sm:$0xff]   ;;  %v5851_v9 = vld [vmem:[%s8129_s3 + $0x6c] ss:$16 sps:$4 sm:$0xff]  }
 0x393   :  { %2211 = vmatprep.subr.bf16.mxu1 %v5851_v9 }
 0x394   :  { %v1645_v44 = vmax.f32 %v1643_v40, %v1611_v20  ;;  %v1646_v26 = vmax.f32 %v1644_v18, %v1612_v15  ;;  %v5497_v36 = vpop.permute.xlu0 %5496  ;;  %2212 = vmatpush1.bf16.msra.mxu1 %v5849_v53  ;;  %v5863_v53 = vld [vmem:[%s8129_s3 + $0xec] ss:$16 sps:$4 sm:$0xff]  }
 0x395   :  { %v5499_v56 = vunpack.i.h.bf16 %v5497_v36  ;;  %v5498_v60 = vunpack.i.l.bf16 %v5497_v36 }
 0x396   :  { %v5550_v30 = vpack.i.bf16 %v1646_v26, %v1645_v44 }
 0x397   :  { %v1554_v45 = vsel %vm1536_vm4, 0.0, %v5499_v56  ;;  %v1553_v48 = vsel %vm1536_vm4, 0.0, %v5498_v60 }
 0x398   :  { %5551 = vrot.lane.b32.xlu1 %v5550_v30, %s6074_s2  ;;  %v1617_v20 = vmax.f32 %v6700_v37, %v1553_v48  ;;  %v1618_v15 = vmax.f32 %v6702_v24, %v1554_v45 }
 0x39c   :  { %v5502_v47 = vpop.permute.xlu1 %5501 }
 0x39d   :  { %v5504_v49 = vunpack.i.h.bf16 %v5502_v47  ;;  %v5503_v59 = vunpack.i.l.bf16 %v5502_v47 }
 0x39f   :  { %v1556_v55 = vsel %vm1536_vm4, 0.0, %v5504_v49  ;;  %v1555_v61 = vsel %vm1536_vm4, 0.0, %v5503_v59  ;;  %v5852_v49 = vld [vmem:[%s8129_s3 + $0x88] ss:$16 sps:$4 sm:$0xff]   ;;  %v5854_v59 = vld [vmem:[%s8129_s3 + $0x8c] ss:$16 sps:$4 sm:$0xff]  }
 0x3a0   :  { %v1619_v50 = vmax.f32 %v6709_v25, %v1555_v61  ;;  %v1620_v57 = vmax.f32 %v6711_v31, %v1556_v55  ;;  %2213 = vmatprep.subr.bf16.mxu1 %v5854_v59 }
 0x3a1   :  { %2214 = vmatpush1.bf16.msra.mxu1 %v5852_v49 }
 0x3a2   :  { %v1647_v42 = vmax.f32 %v1617_v20, %v1619_v50  ;;  %v1648_v8 = vmax.f32 %v1618_v15, %v1620_v57 }
 0x3a4   :  { %v1649_v37 = vmax.f32 %v1647_v42, %v1615_v28  ;;  %v1650_v39 = vmax.f32 %v1648_v8, %v1616_v29  ;;  %v5507_v24 = vpop.permute.xlu0 %5506 }
 0x3a5   :  { %v5509_v31 = vunpack.i.h.bf16 %v5507_v24  ;;  %v5508_v32 = vunpack.i.l.bf16 %v5507_v24 }
 0x3a6   :  { %v5555_v25 = vpack.i.bf16 %v1650_v39, %v1649_v37 }
 0x3a7   :  { %v1558_v4 = vsel %vm1536_vm4, 0.0, %v5509_v31  ;;  %v1557_v6 = vsel %vm1536_vm4, 0.0, %v5508_v32  ;;  %v5857_v31 = vld [vmem:[%s8129_s3 + $0xac] ss:$16 sps:$4 sm:$0xff]  }
 0x3a8   :  { %5556 = vrot.lane.b32.xlu0 %v5555_v25, %s6074_s2  ;;  %v1621_v5 = vmax.f32 %v6721_v63, %v1557_v6  ;;  %v1622_v13 = vmax.f32 %v6726_v23, %v1558_v4  ;;  %v5855_v25 = vld [vmem:[%s8129_s3 + $0xa8] ss:$16 sps:$4 sm:$0xff]   ;;  %2215 = vmatprep.subr.bf16.mxu1 %v5857_v31 }
 0x3a9   :  { %2216 = vmatpush1.bf16.msra.mxu1 %v5855_v25 }
 0x3ac   :  { %v5512_v52 = vpop.permute.xlu1 %5511 }
 0x3ad   :  { %v5514_v0 = vunpack.i.h.bf16 %v5512_v52  ;;  %v5513_v10 = vunpack.i.l.bf16 %v5512_v52 }
 0x3af   :  { %v1560_v3 = vsel %vm1536_vm4, 0.0, %v5514_v0  ;;  %v1559_v62 = vsel %vm1536_vm4, 0.0, %v5513_v10  ;;  %v5858_v0 = vld [vmem:[%s8129_s3 + $0xc8] ss:$16 sps:$4 sm:$0xff]   ;;  %v5860_v10 = vld [vmem:[%s8129_s3 + $0xcc] ss:$16 sps:$4 sm:$0xff]  }
 0x3b0   :  { %v1623_v17 = vmax.f32 %v6742_v16, %v1559_v62  ;;  %v1624_v19 = vmax.f32 %v6747_v22, %v1560_v3  ;;  %2217 = vmatprep.subr.bf16.mxu1 %v5860_v10 }
 0x3b1   :  { %2218 = vmatpush1.bf16.msra.mxu1 %v5858_v0 }
 0x3b2   :  { %v1651_v28 = vmax.f32 %v1621_v5, %v1623_v17  ;;  %v1652_v29 = vmax.f32 %v1622_v13, %v1624_v19  ;;  %2219 = vmatprep.subr.bf16.mxu1 %v5863_v53 }
 0x3b4   :  { %v1653_v33 = vmax.f32 %v1651_v28, %v1619_v50  ;;  %v1654_v14 = vmax.f32 %v1652_v29, %v1620_v57  ;;  %v5517_v63 = vpop.permute.xlu0 %5516 }
 0x3b5   :  { %v5519_v16 = vunpack.i.h.bf16 %v5517_v63  ;;  %v5518_v22 = vunpack.i.l.bf16 %v5517_v63 }
 0x3b6   :  { %v5560_v23 = vpack.i.bf16 %v1654_v14, %v1653_v33 }
 0x3b7   :  { %v1562_v18 = vsel %vm1536_vm4, 0.0, %v5519_v16  ;;  %v1561_v44 = vsel %vm1536_vm4, 0.0, %v5518_v22  ;;  %v5864_v16 = vld [vmem:[%s8129_s3 + $0x108] ss:$16 sps:$4 sm:$0xff]   ;;  %v5866_v22 = vld [vmem:[%s8129_s3 + $0x10c] ss:$16 sps:$4 sm:$0xff]  }
 0x3b8   :  { %5561 = vrot.lane.b32.xlu1 %v5560_v23, %s6074_s2  ;;  %v1625_v60 = vmax.f32 %v6763_v1, %v1561_v44  ;;  %v1626_v47 = vmax.f32 %v6768_v43, %v1562_v18 }
 0x3bc   :  { %v5522_v40 = vpop.permute.xlu1 %5521 }
 0x3bd   :  { %v5524_v26 = vunpack.i.h.bf16 %v5522_v40  ;;  %v5523_v36 = vunpack.i.l.bf16 %v5522_v40 }
 0x3bf   :  { %v1564_v30 = vsel %vm1536_vm4, 0.0, %v5524_v26  ;;  %v1563_v56 = vsel %vm1536_vm4, 0.0, %v5523_v36 }
 0x3c0   :  { %v1627_v45 = vmax.f32 %v6784_v21, %v1563_v56  ;;  %v1628_v48 = vmax.f32 %v6789_v35, %v1564_v30 }
 0x3c2   :  { %v1655_v12 = vmax.f32 %v1625_v60, %v1627_v45  ;;  %v1656_v27 = vmax.f32 %v1626_v47, %v1628_v48  ;;  %v5867_v60 = vld [vmem:[%s8129_s3 + $0x128] ss:$16 sps:$4 sm:$0xff]   ;;  %v5869_v47 = vld [vmem:[%s8129_s3 + $0x12c] ss:$16 sps:$4 sm:$0xff]  }
 0x3c4   :  { %v1657_v55 = vmax.f32 %v1655_v12, %v1623_v17  ;;  %v1658_v61 = vmax.f32 %v1656_v27, %v1624_v19  ;;  %v5527_v1 = vpop.permute.xlu0 %5526  ;;  %v5861_v19 = vld [vmem:[%s8129_s3 + $0xe8] ss:$16 sps:$4 sm:$0xff]   ;;  %s6075_s3 = smov 96  }
 0x3c5   :  { %v5529_v21 = vunpack.i.h.bf16 %v5527_v1  ;;  %v5528_v35 = vunpack.i.l.bf16 %v5527_v1  ;;  %2220 = vmatpush1.bf16.msra.mxu1 %v5861_v19 }
 0x3c6   :  { %v5565_v43 = vpack.i.bf16 %v1658_v61, %v1657_v55  ;;  %2221 = vmatprep.subr.bf16.mxu1 %v5866_v22 }
 0x3c7   :  { %v1566_v15 = vsel %vm1536_vm4, 0.0, %v5529_v21  ;;  %v1565_v50 = vsel %vm1536_vm4, 0.0, %v5528_v35 }
 0x3c8   :  { %5566 = vrot.lane.b32.xlu0 %v5565_v43, %s6074_s2  ;;  %v1629_v8 = vmax.f32 %v6805_v58, %v1565_v50  ;;  %v1630_v37 = vmax.f32 %v6810_v54, %v1566_v15 }
 0x3c9   :  { %2222 = vmatpush1.bf16.msra.mxu1 %v5864_v16 }
 0x3ca   :  { %2223 = vmatprep.subr.bf16.mxu1 %v5869_v47 }
 0x3cc   :  { %v5532_v20 = vpop.permute.xlu1 %5531 }
 0x3cd   :  { %v5534_v57 = vunpack.i.h.bf16 %v5532_v20  ;;  %v5533_v2 = vunpack.i.l.bf16 %v5532_v20  ;;  %2224 = vmatpush1.bf16.msra.mxu1 %v5867_v60 }
 0x3cf   :  { %v1568_v41 = vsel %vm1536_vm4, 0.0, %v5534_v57  ;;  %v1567_v42 = vsel %vm1536_vm4, 0.0, %v5533_v2 }
 0x3d0   :  { %v1631_v39 = vmax.f32 %v6823_v46, %v1567_v42  ;;  %v1632_v24 = vmax.f32 %v6826_v51, %v1568_v41 }
 0x3d2   :  { %v1659_v32 = vmax.f32 %v1629_v8, %v1631_v39  ;;  %v1660_v52 = vmax.f32 %v1630_v37, %v1632_v24 }
 0x3d4   :  { %v1661_v4 = vmax.f32 %v1659_v32, %v1627_v45  ;;  %v1662_v58 = vmax.f32 %v1660_v52, %v1628_v48 }
 0x3d6   :  { %v5570_v6 = vpack.i.bf16 %v1662_v58, %v1661_v4 }
 0x3d8   :  { %v5537_v54 = vpop.permute.xlu0 %5536  ;;  %5571 = vrot.lane.b32.xlu1 %v5570_v6, %s6074_s2 }
 0x3d9   :  { %v5539_v46 = vunpack.i.h.bf16 %v5537_v54  ;;  %v5538_v51 = vunpack.i.l.bf16 %v5537_v54 }
 0x3db   :  { %v1744_v3 = vsel %vm1536_vm4, %v5539_v46, 0.0  ;;  %v1743_v62 = vsel %vm1536_vm4, %v5538_v51, 0.0  ;;  %v6952_v17 = vpack.c.bf16 %v5539_v46, %v5538_v51 }
 0x3dc   :  { %v6946_v5 = vpack.c.bf16 %v1744_v3, %v1743_v62 }
 0x3de   :  { %4940 = vmatprep.mubr.msk.bf16.mxu1 %vm2015_vm6, %v6946_v5 }
 0x3df   :  { %4945 = vmatmul.mubr.msk.bf16.gmra.mrb[4].mxu1 %vm6948_vm7, %v6952_v17 }
 0x3ea   :  { %v5542_v9 = vpop.permute.xlu1 %5541 }
 0x3eb   :  { %v5544_v28 = vunpack.i.h.bf16 %v5542_v9  ;;  %v5543_v29 = vunpack.i.l.bf16 %v5542_v9 }
 0x3ed   :  { %v1746_v33 = vsel %vm1536_vm4, %v5544_v28, 0.0  ;;  %v1745_v14 = vsel %vm1536_vm4, %v5543_v29, 0.0  ;;  %v6969_v23 = vpack.c.bf16 %v5544_v28, %v5543_v29 }
 0x3ee   :  { %v6967_v63 = vpack.c.bf16 %v1746_v33, %v1745_v14 }
 0x3f0   :  { %4946 = vmatprep.mubr.msk.bf16.mxu1 %vm2015_vm6, %v6967_v63 }
 0x3f1   :  { %4951 = vmatmul.mubr.msk.bf16.gmra.mrb[8].mxu1 %vm6948_vm7, %v6969_v23 }
 0x3fa   :  { %v5547_v40 = vpop.permute.xlu0 %5546 }
 0x3fb   :  { %v5549_v18 = vunpack.i.h.bf16 %v5547_v40  ;;  %v5548_v44 = vunpack.i.l.bf16 %v5547_v40 }
 0x3fd   :  { %v1748_v26 = vsel %vm1536_vm4, %v5549_v18, 0.0  ;;  %v1747_v36 = vsel %vm1536_vm4, %v5548_v44, 0.0  ;;  %v6986_v56 = vpack.c.bf16 %v5549_v18, %v5548_v44 }
 0x3fe   :  { %v6984_v30 = vpack.c.bf16 %v1748_v26, %v1747_v36 }
 0x400   :  { %4952 = vmatprep.mubr.msk.bf16.mxu1 %vm2015_vm6, %v6984_v30 }
 0x401   :  { %4957 = vmatmul.mubr.msk.bf16.gmra.mrb[12].mxu1 %vm6948_vm7, %v6986_v56 }
 0x40a   :  { %v5552_v45 = vpop.permute.xlu1 %5551 }
 0x40b   :  { %v5554_v48 = vunpack.i.h.bf16 %v5552_v45  ;;  %v5553_v49 = vunpack.i.l.bf16 %v5552_v45 }
 0x40d   :  { %v1750_v59 = vsel %vm1536_vm4, %v5554_v48, 0.0  ;;  %v1749_v12 = vsel %vm1536_vm4, %v5553_v49, 0.0  ;;  %v7003_v55 = vpack.c.bf16 %v5554_v48, %v5553_v49 }
 0x40e   :  { %v7001_v27 = vpack.c.bf16 %v1750_v59, %v1749_v12 }
 0x410   :  { %4958 = vmatprep.mubr.msk.bf16.mxu1 %vm2015_vm6, %v7001_v27 }
 0x411   :  { %4963 = vmatmul.mubr.msk.bf16.gmra.mrb[16].mxu1 %vm6948_vm7, %v7003_v55 }
 0x41a   :  { %v5557_v61 = vpop.permute.xlu0 %5556 }
 0x41b   :  { %v5559_v1 = vunpack.i.h.bf16 %v5557_v61  ;;  %v5558_v43 = vunpack.i.l.bf16 %v5557_v61 }
 0x41d   :  { %v1752_v21 = vsel %vm1536_vm4, %v5559_v1, 0.0  ;;  %v1751_v35 = vsel %vm1536_vm4, %v5558_v43, 0.0  ;;  %v7012_v15 = vpack.c.bf16 %v5559_v1, %v5558_v43 }
 0x41e   :  { %v1768_v20 = vpack.c.bf16 %v1752_v21, %v1751_v35  ;;  %v7018_v57 = vpop.f32.mrb[0].mxu1 }
 0x41f   :  { %v7020_v42 = vpop.f32.mrb[1].mxu1 }
 0x420   :  { %4964 = vmatprep.mubr.msk.bf16.mxu1 %vm2015_vm6, %v1768_v20  ;;  %v7022_v8 = vpop.f32.mrb[2].mxu1 }
 0x421   :  { %4969 = vmatmul.mubr.msk.bf16.gmra.mrb[20].mxu1 %vm6948_vm7, %v7012_v15  ;;  %v7026_v24 = vpop.f32.mrb[3].mxu1 }
 0x42a   :  { %v5562_v50 = vpop.permute.xlu1 %5561 }
 0x42b   :  { %v5564_v2 = vunpack.i.h.bf16 %v5562_v50  ;;  %v5563_v41 = vunpack.i.l.bf16 %v5562_v50 }
 0x42d   :  { %v1754_v37 = vsel %vm1536_vm4, %v5564_v2, 0.0  ;;  %v1753_v39 = vsel %vm1536_vm4, %v5563_v41, 0.0  ;;  %v4974_v31 = vpack.c.bf16 %v5564_v2, %v5563_v41 }
 0x42e   :  { %v1770_v25 = vpack.c.bf16 %v1754_v37, %v1753_v39 }
 0x430   :  { %4970 = vmatprep.mubr.msk.bf16.mxu1 %vm2015_vm6, %v1770_v25 }
 0x431   :  { %4975 = vmatmul.mubr.msk.bf16.gmra.mrb[24].mxu1 %vm6948_vm7, %v4974_v31 }
 0x43a   :  { %v5567_v32 = vpop.permute.xlu0 %5566 }
 0x43b   :  { %v5569_v52 = vunpack.i.h.bf16 %v5567_v32  ;;  %v5568_v4 = vunpack.i.l.bf16 %v5567_v32 }
 0x43d   :  { %v1756_v58 = vsel %vm1536_vm4, %v5569_v52, 0.0  ;;  %v1755_v6 = vsel %vm1536_vm4, %v5568_v4, 0.0  ;;  %v4980_v46 = vpack.c.bf16 %v5569_v52, %v5568_v4 }
 0x43e   :  { %v1772_v54 = vpack.c.bf16 %v1756_v58, %v1755_v6 }
 0x440   :  { %4976 = vmatprep.mubr.msk.bf16.mxu1 %vm2015_vm6, %v1772_v54 }
 0x441   :  { %4981 = vmatmul.mubr.msk.bf16.gmra.mrb[28].mxu1 %vm6948_vm7, %v4980_v46 }
 0x44a   :  { %v5572_v51 = vpop.permute.xlu1 %5571 }
 0x44b   :  { %v5574_v0 = vunpack.i.h.bf16 %v5572_v51  ;;  %v5573_v10 = vunpack.i.l.bf16 %v5572_v51 }
 0x44d   :  { %v1758_v3 = vsel %vm1536_vm4, %v5574_v0, 0.0  ;;  %v1757_v62 = vsel %vm1536_vm4, %v5573_v10, 0.0  ;;  %v4986_v53 = vpack.c.bf16 %v5574_v0, %v5573_v10 }
 0x44e   :  { %v1774_v19 = vpack.c.bf16 %v1758_v3, %v1757_v62 }
 0x450   :  { %4982 = vmatprep.mubr.msk.bf16.mxu1 %vm2015_vm6, %v1774_v19 }
 0x451   :  { %4987 = vmatmul.mubr.msk.bf16.gmra.mrb[32].mxu1 %vm6948_vm7, %v4986_v53 }
 0x452   :  { %2162 = vmatprep.mubr.bf16.mxu1 %v8143_v11 }
 0x459   :  { %2163 = vmatmul.mubr.bf16.gmra.mrb[36].mxu1 %v8143_v11 }
 0x45a   :  { %2168 = vmatprep.mubr.bf16.mxu1 %v8143_v11 }
 0x461   :  { %2169 = vmatmul.mubr.bf16.gmra.mrb[40].mxu1 %v8143_v11 }
 0x462   :  { %2174 = vmatprep.mubr.bf16.mxu1 %v8143_v11 }
 0x469   :  { %2175 = vmatmul.mubr.bf16.gmra.mrb[44].mxu1 %v8143_v11 }
 0x46a   :  { %2180 = vmatprep.mubr.bf16.mxu1 %v8143_v11 }
 0x471   :  { %2181 = vmatmul.mubr.bf16.gmra.mrb[48].mxu1 %v8143_v11 }
 0x472   :  { %2186 = vmatprep.mubr.bf16.mxu1 %v8143_v11 }
 0x479   :  { %2187 = vmatmul.mubr.bf16.gmra.mrb[52].mxu1 %v8143_v11 }
 0x47a   :  { %2192 = vmatprep.mubr.bf16.mxu1 %v8143_v11 }
 0x481   :  { %2193 = vmatmul.mubr.bf16.gmra.mrb[56].mxu1 %v8143_v11 }
 0x482   :  { %2198 = vmatprep.mubr.bf16.mxu1 %v8143_v11 }
 0x489   :  { %2199 = vmatmul.mubr.bf16.gmra.mrb[60].mxu1 %v8143_v11 }
 0x48a   :  { %2237 = vmatprep.mubr.bf16.mxu1 %v8143_v11 }
 0x491   :  { %2238 = vmatmul.mubr.bf16.vlgmr.msra.gmra.mrb[64].mxu1 %v8143_v11 }
 0x492   :  { %4988 = vmatprep.mubr.msk.bf16.mxu1 %vm2015_vm6, %v6946_v5 }
 0x499   :  { %4993 = vmatmul.mubr.msk.bf16.gmra.mrb[68].mxu1 %vm6948_vm7, %v6952_v17 }
 0x49a   :  { %4994 = vmatprep.mubr.msk.bf16.mxu1 %vm2015_vm6, %v6967_v63 }
 0x4a1   :  { %4999 = vmatmul.mubr.msk.bf16.gmra.mrb[72].mxu1 %vm6948_vm7, %v6969_v23 }
 0x4a2   :  { %5000 = vmatprep.mubr.msk.bf16.mxu1 %vm2015_vm6, %v6984_v30 }
 0x4a9   :  { %5005 = vmatmul.mubr.msk.bf16.gmra.mrb[76].mxu1 %vm6948_vm7, %v6986_v56 }
 0x4aa   :  { %5006 = vmatprep.mubr.msk.bf16.mxu1 %vm2015_vm6, %v7001_v27 }
 0x4b1   :  { %5011 = vmatmul.mubr.msk.bf16.gmra.mrb[80].mxu1 %vm6948_vm7, %v7003_v55 }
 0x4b2   :  { %v7077_v5 = vpop.f32.mrb[4].mxu1  ;;  %5012 = vmatprep.mubr.msk.bf16.mxu1 %vm2015_vm6, %v1768_v20 }
 0x4b3   :  { %v7080_v17 = vpop.f32.mrb[5].mxu1 }
 0x4b4   :  { %2400 = vrot.lane.b32.xlu0 %v7080_v17, %s6075_s3  ;;  %v7084_v9 = vpop.f32.mrb[6].mxu1 }
 0x4b5   :  { %v7086_v28 = vpop.f32.mrb[7].mxu1 }
 0x4b8   :  { %2404 = vrot.lane.b32.xlu0 %v7086_v28, %s6075_s3 }
 0x4b9   :  { %5017 = vmatmul.mubr.msk.bf16.gmra.mrb[84].mxu1 %vm6948_vm7, %v7012_v15 }
 0x4ba   :  { %5018 = vmatprep.mubr.msk.bf16.mxu1 %vm2015_vm6, %v1770_v25 }
 0x4c1   :  { %5023 = vmatmul.mubr.msk.bf16.gmra.mrb[88].mxu1 %vm6948_vm7, %v4974_v31 }
 0x4c2   :  { %5024 = vmatprep.mubr.msk.bf16.mxu1 %vm2015_vm6, %v1772_v54 }
 0x4c4   :  { %v7097_v29 = vpop.f32.mrb[8].mxu1 }
 0x4c5   :  { %v7099_v33 = vpop.f32.mrb[9].mxu1 }
 0x4c6   :  { %2408 = vrot.lane.b32.xlu0 %v7099_v33, %s6075_s3  ;;  %v7103_v14 = vpop.f32.mrb[10].mxu1 }
 0x4c7   :  { %v7105_v63 = vpop.f32.mrb[11].mxu1 }
 0x4c9   :  { %5029 = vmatmul.mubr.msk.bf16.gmra.mrb[92].mxu1 %vm6948_vm7, %v4980_v46 }
 0x4ca   :  { %2412 = vrot.lane.b32.xlu0 %v7105_v63, %s6075_s3  ;;  %5030 = vmatprep.mubr.msk.bf16.mxu1 %vm2015_vm6, %v1774_v19 }
 0x4d1   :  { %5035 = vmatmul.mubr.msk.bf16.gmra.mrb[96].mxu1 %vm6948_vm7, %v4986_v53 }
 0x4d2   :  { %2321 = vmatprep.mubr.bf16.mxu1 %v8143_v11 }
 0x4d4   :  { %v7115_v23 = vpop.f32.mrb[12].mxu1 }
 0x4d5   :  { %v7117_v16 = vpop.f32.mrb[13].mxu1 }
 0x4d6   :  { %2416 = vrot.lane.b32.xlu0 %v7117_v16, %s6075_s3  ;;  %v7121_v22 = vpop.f32.mrb[14].mxu1 }
 0x4d7   :  { %v7123_v40 = vpop.f32.mrb[15].mxu1 }
 0x4d9   :  { %2322 = vmatmul.mubr.bf16.gmra.mrb[100].mxu1 %v8143_v11 }
 0x4da   :  { %2420 = vrot.lane.b32.xlu0 %v7123_v40, %s6075_s3  ;;  %2331 = vmatprep.mubr.bf16.mxu1 %v8143_v11 }
 0x4e1   :  { %2332 = vmatmul.mubr.bf16.gmra.mrb[104].mxu1 %v8143_v11 }
 0x4e2   :  { %2337 = vmatprep.mubr.bf16.mxu1 %v8143_v11 }
 0x4e4   :  { %v7131_v13 = vpop.f32.mrb[16].mxu1 }
 0x4e5   :  { %v7133_v18 = vpop.f32.mrb[17].mxu1 }
 0x4e6   :  { %2424 = vrot.lane.b32.xlu0 %v7133_v18, %s6075_s3  ;;  %v7137_v44 = vpop.f32.mrb[18].mxu1 }
 0x4e7   :  { %v7139_v26 = vpop.f32.mrb[19].mxu1 }
 0x4e9   :  { %2338 = vmatmul.mubr.bf16.gmra.mrb[108].mxu1 %v8143_v11 }
 0x4ea   :  { %2428 = vrot.lane.b32.xlu0 %v7139_v26, %s6075_s3  ;;  %2343 = vmatprep.mubr.bf16.mxu1 %v8143_v11 }
 0x4f1   :  { %2344 = vmatmul.mubr.bf16.gmra.mrb[112].mxu1 %v8143_v11 }
 0x4f2   :  { %2349 = vmatprep.mubr.bf16.mxu1 %v8143_v11 }
 0x4f4   :  { %v7147_v36 = vpop.f32.mrb[20].mxu1 }
 0x4f5   :  { %v7149_v30 = vpop.f32.mrb[21].mxu1 }
 0x4f6   :  { %2432 = vrot.lane.b32.xlu0 %v7149_v30, %s6075_s3  ;;  %v7153_v56 = vpop.f32.mrb[22].mxu1 }
 0x4f7   :  { %v7155_v60 = vpop.f32.mrb[23].mxu1 }
 0x4f9   :  { %2350 = vmatmul.mubr.bf16.gmra.mrb[116].mxu1 %v8143_v11 }
 0x4fa   :  { %2436 = vrot.lane.b32.xlu0 %v7155_v60, %s6075_s3  ;;  %2355 = vmatprep.mubr.bf16.mxu1 %v8143_v11 }
 0x501   :  { %2356 = vmatmul.mubr.bf16.gmra.mrb[120].mxu1 %v8143_v11 }
 0x502   :  { %2361 = vmatprep.mubr.bf16.mxu1 %v8143_v11 }
 0x504   :  { %v7163_v47 = vpop.f32.mrb[24].mxu1 }
 0x505   :  { %v7165_v45 = vpop.f32.mrb[25].mxu1 }
 0x506   :  { %2440 = vrot.lane.b32.xlu0 %v7165_v45, %s6075_s3  ;;  %v7169_v48 = vpop.f32.mrb[26].mxu1 }
 0x507   :  { %v7171_v49 = vpop.f32.mrb[27].mxu1 }
 0x509   :  { %2362 = vmatmul.mubr.bf16.gmra.mrb[124].mxu1 %v8143_v11 }
 0x50a   :  { %2444 = vrot.lane.b32.xlu0 %v7171_v49, %s6075_s3  ;;  %3333 = vmatprep.mubr.bf16.mxu1 %v8141_v7 }
 0x514   :  { %v7177_v59 = vpop.f32.mrb[28].mxu1 }
 0x515   :  { %v7179_v12 = vpop.f32.mrb[29].mxu1 }
 0x516   :  { %2448 = vrot.lane.b32.xlu0 %v7179_v12, %s6075_s3  ;;  %v7183_v27 = vpop.f32.mrb[30].mxu1 }
 0x517   :  { %8151 = vst [vmem:[#allocation7_spill] sm:$0xff] %v7183_v27  ;;  %v7185_v55 = vpop.f32.mrb[31].mxu1 }
 0x51a   :  { %2452 = vrot.lane.b32.xlu0 %v7185_v55, %s6075_s3 }
 0x524   :  { %v2156_v61 = vpop.f32.mrb[32].mxu1 }
 0x525   :  { %v2157_v1 = vpop.f32.mrb[33].mxu1 }
 0x526   :  { %2456 = vrot.lane.b32.xlu0 %v2157_v1, %s6075_s3  ;;  %v2159_v43 = vpop.f32.mrb[34].mxu1 }
 0x527   :  { %v2160_v21 = vpop.f32.mrb[35].mxu1 }
 0x52a   :  { %2460 = vrot.lane.b32.xlu0 %v2160_v21, %s6075_s3 }
 0x52c   :  { %v2164_v35 = vpop.f32.mrb[36].mxu1 }
 0x52d   :  { %v2165_v20 = vpop.f32.mrb[37].mxu1 }
 0x52e   :  { %v2166_v15 = vpop.f32.mrb[38].mxu1 }
 0x52f   :  { %v2167_v50 = vpop.f32.mrb[39].mxu1 }
 0x534   :  { %v2170_v2 = vpop.f32.mrb[40].mxu1 }
 0x535   :  { %v2171_v41 = vpop.f32.mrb[41].mxu1 }
 0x536   :  { %v2172_v37 = vpop.f32.mrb[42].mxu1 }
 0x537   :  { %v2173_v39 = vpop.f32.mrb[43].mxu1 }
 0x53c   :  { %v2176_v25 = vpop.f32.mrb[44].mxu1 }
 0x53d   :  { %v2177_v31 = vpop.f32.mrb[45].mxu1 }
 0x53e   :  { %v2178_v32 = vpop.f32.mrb[46].mxu1 }
 0x53f   :  { %v2179_v52 = vpop.f32.mrb[47].mxu1 }
 0x544   :  { %v2182_v4 = vpop.f32.mrb[48].mxu1 }
 0x545   :  { %v2183_v58 = vpop.f32.mrb[49].mxu1 }
 0x546   :  { %v2184_v6 = vpop.f32.mrb[50].mxu1 }
 0x547   :  { %v2185_v54 = vpop.f32.mrb[51].mxu1 }
 0x54c   :  { %v2188_v46 = vpop.f32.mrb[52].mxu1 }
 0x54d   :  { %v2189_v51 = vpop.f32.mrb[53].mxu1 }
 0x54e   :  { %v2190_v0 = vpop.f32.mrb[54].mxu1 }
 0x54f   :  { %v2191_v10 = vpop.f32.mrb[55].mxu1 }
 0x554   :  { %v2194_v3 = vpop.f32.mrb[56].mxu1 }
 0x555   :  { %v2195_v62 = vpop.f32.mrb[57].mxu1 }
 0x556   :  { %v2196_v19 = vpop.f32.mrb[58].mxu1 }
 0x557   :  { %v2197_v53 = vpop.f32.mrb[59].mxu1 }
 0x55c   :  { %v2200_v61 = vpop.f32.mrb[60].mxu1 }
 0x55d   :  { %v2201_v1 = vpop.f32.mrb[61].mxu1 }
 0x55e   :  { %v2202_v43 = vpop.f32.mrb[62].mxu1 }
 0x55f   :  { %v2203_v21 = vpop.f32.mrb[63].mxu1 }
 0x564   :  { %v2239_v35 = vpop.f32.mrb[64].mxu1 }
 0x565   :  { %v2240_v20 = vpop.f32.mrb[65].mxu1  ;;  %v7213_v35 = vpop.permute.xlu0 %2400 }
 0x566   :  { %v2241_v15 = vpop.f32.mrb[66].mxu1 }
 0x567   :  { %v2242_v50 = vpop.f32.mrb[67].mxu1 }
 0x56c   :  { %v2245_v2 = vpop.f32.mrb[68].mxu1 }
 0x56d   :  { %2402 = vrot.lane.b32.xlu1 %v2245_v2, %s6075_s3  ;;  %v2247_v41 = vpop.f32.mrb[69].mxu1 }
 0x56e   :  { %v2248_v37 = vpop.f32.mrb[70].mxu1  ;;  %v7217_v41 = vpop.permute.xlu0 %2404 }
 0x56f   :  { %v2250_v39 = vpop.f32.mrb[71].mxu1 }
 0x571   :  { %2406 = vrot.lane.b32.xlu1 %v2248_v37, %s6075_s3 }
 0x572   :  { %v7221_v39 = vpop.permute.xlu0 %2408 }
 0x574   :  { %v2253_v25 = vpop.f32.mrb[72].mxu1 }
 0x575   :  { %2563 = vrot.lane.b32.xlu0 %v2253_v25, %s6076_s26  ;;  %2410 = vrot.lane.b32.xlu1 %v2253_v25, %s6075_s3  ;;  %v2255_v31 = vpop.f32.mrb[73].mxu1 }
 0x576   :  { %v2257_v32 = vpop.f32.mrb[74].mxu1 }
 0x577   :  { %v2259_v52 = vpop.f32.mrb[75].mxu1 }
 0x579   :  { %2565 = vrot.lane.b32.xlu1 %v2255_v31, %s6076_s26  ;;  %2567 = vrot.lane.b32.xlu0 %v2257_v32, %s6076_s26 }
 0x57c   :  { %v2263_v4 = vpop.f32.mrb[76].mxu1 }
 0x57d   :  { %2414 = vrot.lane.b32.xlu1 %v2257_v32, %s6075_s3  ;;  %2571 = vrot.lane.b32.xlu0 %v2263_v4, %s6076_s26  ;;  %v2265_v58 = vpop.f32.mrb[77].mxu1 }
 0x57e   :  { %v2267_v6 = vpop.f32.mrb[78].mxu1 }
 0x57f   :  { %v2269_v54 = vpop.f32.mrb[79].mxu1 }
 0x581   :  { %2569 = vrot.lane.b32.xlu1 %v2259_v52, %s6076_s26  ;;  %2575 = vrot.lane.b32.xlu0 %v2267_v6, %s6076_s26  ;;  %v7227_v52 = vpop.permute.xlu0 %2412 }
 0x584   :  { %v2273_v46 = vpop.f32.mrb[80].mxu1 }
 0x585   :  { %2418 = vrot.lane.b32.xlu1 %v2263_v4, %s6075_s3  ;;  %2579 = vrot.lane.b32.xlu0 %v2273_v46, %s6076_s26  ;;  %v2275_v51 = vpop.f32.mrb[81].mxu1 }
 0x586   :  { %v2277_v0 = vpop.f32.mrb[82].mxu1 }
 0x587   :  { %v2279_v10 = vpop.f32.mrb[83].mxu1 }
 0x589   :  { %2573 = vrot.lane.b32.xlu1 %v2265_v58, %s6076_s26  ;;  %2583 = vrot.lane.b32.xlu0 %v2277_v0, %s6076_s26 }
 0x58c   :  { %v2283_v3 = vpop.f32.mrb[84].mxu1 }
 0x58d   :  { %2422 = vrot.lane.b32.xlu1 %v2267_v6, %s6075_s3  ;;  %2587 = vrot.lane.b32.xlu0 %v2283_v3, %s6076_s26  ;;  %v2285_v62 = vpop.f32.mrb[85].mxu1 }
 0x58e   :  { %v2287_v19 = vpop.f32.mrb[86].mxu1 }
 0x58f   :  { %v2289_v53 = vpop.f32.mrb[87].mxu1 }
 0x591   :  { %2577 = vrot.lane.b32.xlu1 %v2269_v54, %s6076_s26  ;;  %2591 = vrot.lane.b32.xlu0 %v2287_v19, %s6076_s26  ;;  %v7231_v54 = vpop.permute.xlu0 %2416 }
 0x594   :  { %v2293_v61 = vpop.f32.mrb[88].mxu1 }
 0x595   :  { %2426 = vrot.lane.b32.xlu1 %v2273_v46, %s6075_s3  ;;  %2595 = vrot.lane.b32.xlu0 %v2293_v61, %s6076_s26  ;;  %v2295_v1 = vpop.f32.mrb[89].mxu1 }
 0x596   :  { %v2297_v43 = vpop.f32.mrb[90].mxu1 }
 0x597   :  { %v2299_v21 = vpop.f32.mrb[91].mxu1 }
 0x599   :  { %2581 = vrot.lane.b32.xlu1 %v2275_v51, %s6076_s26  ;;  %2599 = vrot.lane.b32.xlu0 %v2297_v43, %s6076_s26 }
 0x59c   :  { %v2303_v20 = vpop.f32.mrb[92].mxu1 }
 0x59d   :  { %2430 = vrot.lane.b32.xlu1 %v2277_v0, %s6075_s3  ;;  %2603 = vrot.lane.b32.xlu0 %v2303_v20, %s6076_s26  ;;  %v2305_v15 = vpop.f32.mrb[93].mxu1  ;;  %v7235_v0 = vpop.permute.xlu0 %2420 }
 0x59e   :  { %v2307_v50 = vpop.f32.mrb[94].mxu1 }
 0x59f   :  { %v2309_v2 = vpop.f32.mrb[95].mxu1 }
 0x5a1   :  { %2585 = vrot.lane.b32.xlu1 %v2279_v10, %s6076_s26  ;;  %2607 = vrot.lane.b32.xlu0 %v2307_v50, %s6076_s26 }
 0x5a4   :  { %v2313_v37 = vpop.f32.mrb[96].mxu1 }
 0x5a5   :  { %2434 = vrot.lane.b32.xlu1 %v2283_v3, %s6075_s3  ;;  %2611 = vrot.lane.b32.xlu0 %v2313_v37, %s6076_s26  ;;  %v2315_v25 = vpop.f32.mrb[97].mxu1 }
 0x5a6   :  { %v2317_v31 = vpop.f32.mrb[98].mxu1 }
 0x5a7   :  { %v2319_v32 = vpop.f32.mrb[99].mxu1 }
 0x5a9   :  { %2589 = vrot.lane.b32.xlu1 %v2285_v62, %s6076_s26  ;;  %2615 = vrot.lane.b32.xlu0 %v2317_v31, %s6076_s26 }
 0x5ac   :  { %v2323_v4 = vpop.f32.mrb[100].mxu1 }
 0x5ad   :  { %2438 = vrot.lane.b32.xlu1 %v2287_v19, %s6075_s3  ;;  %2619 = vrot.lane.b32.xlu0 %v2323_v4, %s6076_s26  ;;  %v2325_v58 = vpop.f32.mrb[101].mxu1  ;;  %v7238_v19 = vpop.permute.xlu0 %2424 }
 0x5ae   :  { %v2327_v6 = vpop.f32.mrb[102].mxu1 }
 0x5af   :  { %v2329_v46 = vpop.f32.mrb[103].mxu1 }
 0x5b1   :  { %2593 = vrot.lane.b32.xlu1 %v2289_v53, %s6076_s26  ;;  %2623 = vrot.lane.b32.xlu0 %v2327_v6, %s6076_s26  ;;  %v7242_v53 = vpop.permute.xlu0 %2428 }
 0x5b4   :  { %v2333_v51 = vpop.f32.mrb[104].mxu1 }
 0x5b5   :  { %2442 = vrot.lane.b32.xlu1 %v2293_v61, %s6075_s3  ;;  %v2334_v10 = vpop.f32.mrb[105].mxu1  ;;  %v7245_v51 = vpop.permute.xlu0 %2432 }
 0x5b6   :  { %v2335_v3 = vpop.f32.mrb[106].mxu1 }
 0x5b7   :  { %v2336_v62 = vpop.f32.mrb[107].mxu1 }
 0x5b9   :  { %2597 = vrot.lane.b32.xlu1 %v2295_v1, %s6076_s26  ;;  %v7248_v27 = vpop.permute.xlu0 %2436 }
 0x5bc   :  { %v2339_v4 = vpop.f32.mrb[108].mxu1 }
 0x5bd   :  { %2446 = vrot.lane.b32.xlu1 %v2297_v43, %s6075_s3  ;;  %v2340_v7 = vpop.f32.mrb[109].mxu1 }
 0x5be   :  { %v2341_v11 = vpop.f32.mrb[110].mxu1  ;;  %v7251_v7 = vpop.permute.xlu0 %2440 }
 0x5bf   :  { %v2342_v6 = vpop.f32.mrb[111].mxu1 }
 0x5c1   :  { %2601 = vrot.lane.b32.xlu1 %v2299_v21, %s6076_s26 }
 0x5c2   :  { %v7255_v4 = vpop.permute.xlu0 %2444 }
 0x5c4   :  { %v2345_v61 = vpop.f32.mrb[112].mxu1 }
 0x5c5   :  { %2450 = vrot.lane.b32.xlu1 %v2303_v20, %s6075_s3  ;;  %v2346_v10 = vpop.f32.mrb[113].mxu1 }
 0x5c6   :  { %v2347_v3 = vpop.f32.mrb[114].mxu1  ;;  %v7258_v10 = vpop.permute.xlu0 %2448 }
 0x5c7   :  { %v2348_v62 = vpop.f32.mrb[115].mxu1 }
 0x5c9   :  { %2605 = vrot.lane.b32.xlu1 %v2305_v15, %s6076_s26 }
 0x5ca   :  { %v7261_v62 = vpop.permute.xlu0 %2452 }
 0x5cc   :  { %v2351_v1 = vpop.f32.mrb[116].mxu1 }
 0x5cd   :  { %2454 = vrot.lane.b32.xlu1 %v2307_v50, %s6075_s3  ;;  %v2352_v11 = vpop.f32.mrb[117].mxu1 }
 0x5ce   :  { %v2353_v43 = vpop.f32.mrb[118].mxu1 }
 0x5cf   :  { %v2354_v21 = vpop.f32.mrb[119].mxu1  ;;  %v7264_v43 = vpop.permute.xlu0 %2456 }
 0x5d1   :  { %2609 = vrot.lane.b32.xlu1 %v2309_v2, %s6076_s26 }
 0x5d3   :  { %v7268_v21 = vpop.permute.xlu0 %2460 }
 0x5d4   :  { %v2357_v20 = vpop.f32.mrb[120].mxu1 }
 0x5d5   :  { %2458 = vrot.lane.b32.xlu1 %v2313_v37, %s6075_s3  ;;  %v2358_v6 = vpop.f32.mrb[121].mxu1  ;;  %v2708_v20 = vld [vmem:[%s8130_s4] sm:$0x3]  ;;  %s6077_s4 = smov 48  }
 0x5d6   :  { %v2359_v61 = vpop.f32.mrb[122].mxu1 }
 0x5d7   :  { %v2360_v15 = vpop.f32.mrb[123].mxu1 }
 0x5d8   :  { %v7282_v15 = vrot.slane %v2708_v20, %v6611_v34 }
 0x5d9   :  { %2613 = vrot.lane.b32.xlu1 %v2315_v25, %s6076_s26 }
 0x5dc   :  { %v2363_v3 = vpop.f32.mrb[124].mxu1 }
 0x5dd   :  { %2462 = vrot.lane.b32.xlu1 %v2317_v31, %s6075_s3  ;;  %v2364_v50 = vpop.f32.mrb[125].mxu1 }
 0x5de   :  { %v2365_v1 = vpop.f32.mrb[126].mxu1 }
 0x5df   :  { %v2403_v2 = vpop.permute.xlu1 %2402  ;;  %v2366_v11 = vpop.f32.mrb[127].mxu1 }
 0x5e0   :  { %v2465_v31 = vsel %vm2464_vm8, %v7213_v35, %v2403_v2  ;;  %v2514_v6 = vadd.f32 %v2403_v2, %v7020_v42 }
 0x5e1   :  { %2617 = vrot.lane.b32.xlu1 %v2319_v32, %s6076_s26  ;;  %v7278_v32 = vrot.slane %v2708_v20, %v6616_v38 }
 0x5e3   :  { %v2407_v37 = vpop.permute.xlu1 %2406 }
 0x5e4   :  { %v2466_v2 = vsel %vm2464_vm8, %v7217_v41, %v2407_v37  ;;  %v2516_v20 = vadd.f32 %v2407_v37, %v7026_v24 }
 0x5e5   :  { %2621 = vrot.lane.b32.xlu1 %v2325_v58, %s6076_s26  ;;  %v2513_v58 = vadd.f32 %v2465_v31, %v7018_v57  ;;  %v2515_v31 = vadd.f32 %v2466_v2, %v7022_v8 }
 0x5e7   :  { %v2411_v25 = vpop.permute.xlu1 %2410  ;;  %v2564_v61 = vpop.permute.xlu0 %2563 }
 0x5e8   :  { %v2467_v8 = vsel %vm2464_vm8, %v7221_v39, %v2411_v25 }
 0x5e9   :  { %2625 = vrot.lane.b32.xlu1 %v2329_v46, %s6076_s26 }
 0x5eb   :  { %v2566_v3 = vpop.permute.xlu1 %2565  ;;  %v2568_v34 = vpop.permute.xlu0 %2567 }
 0x5ec   :  { %v2628_v50 = vsel %vm2627_vm9, %v2564_v61, %v2566_v3  ;;  %v2677_v1 = vadd.f32 %v2566_v3, %v2514_v6 }
 0x5ed   :  { %v2676_v11 = vadd.f32 %v2628_v50, %v2513_v58 }
 0x5ee   :  { %v2721_v35 = vadd.f32 %v7278_v32, %v2677_v1 }
 0x5ef   :  { %v7287_v46 = vadd.f32 %v7282_v15, %v2676_v11  ;;  %v2415_v42 = vpop.permute.xlu1 %2414 }
 0x5f0   :  { %v2753_v38 = vmax.f32 %v2721_v35, 0.0  ;;  %v2572_v35 = vpop.permute.xlu0 %2571 }
 0x5f1   :  { %v2752_v57 = vmax.f32 %v7287_v46, 0.0 }
 0x5f3   :  { %v2570_v61 = vpop.permute.xlu1 %2569  ;;  %v5575_v6 = vpack.i.bf16 %v2753_v38, %v2752_v57  ;;  %v2517_v38 = vadd.f32 %v2467_v8, %v7077_v5  ;;  %v2468_v5 = vsel %vm2464_vm8, %v7227_v52, %v2415_v42 }
 0x5f4   :  { %v2629_v58 = vsel %vm2627_vm9, %v2568_v34, %v2570_v61  ;;  %v2679_v3 = vadd.f32 %v2570_v61, %v2516_v20  ;;  %v2518_v34 = vadd.f32 %v2411_v25, %v7080_v17  ;;  %v2576_v8 = vpop.permute.xlu0 %2575 }
 0x5f5   :  { %v2678_v50 = vadd.f32 %v2629_v58, %v2515_v31  ;;  %5576 = vrot.lane.b32.xlu0 %v5575_v6, %s6077_s4 }
 0x5f6   :  { %v2723_v41 = vadd.f32 %v7278_v32, %v2679_v3 }
 0x5f7   :  { %v7300_v1 = vadd.f32 %v7282_v15, %v2678_v50  ;;  %v2419_v24 = vpop.permute.xlu1 %2418  ;;  %v2520_v50 = vadd.f32 %v2415_v42, %v7086_v28 }
 0x5f8   :  { %v2755_v37 = vmax.f32 %v2723_v41, 0.0  ;;  %v2519_v41 = vadd.f32 %v2468_v5, %v7084_v9  ;;  %v2469_v9 = vsel %vm2464_vm8, %v7231_v54, %v2419_v24 }
 0x5f9   :  { %v2754_v11 = vmax.f32 %v7300_v1, 0.0  ;;  %5581 = vrot.lane.b32.xlu0 %v5575_v6, %s6078_s0 }
 0x5fb   :  { %v2574_v2 = vpop.permute.xlu1 %2573  ;;  %v5585_v20 = vpack.i.bf16 %v2755_v37, %v2754_v11 }
 0x5fc   :  { %v2630_v31 = vsel %vm2627_vm9, %v2572_v35, %v2574_v2  ;;  %v2681_v61 = vadd.f32 %v2574_v2, %v2518_v34 }
 0x5fd   :  { %v2680_v58 = vadd.f32 %v2630_v31, %v2517_v38  ;;  %5586 = vrot.lane.b32.xlu1 %v5585_v20, %s6077_s4 }
 0x5fe   :  { %v2725_v39 = vadd.f32 %v7278_v32, %v2681_v61  ;;  %v2522_v61 = vadd.f32 %v2419_v24, %v7099_v33 }
 0x5ff   :  { %v7314_v3 = vadd.f32 %v7282_v15, %v2680_v58  ;;  %v2423_v6 = vpop.permute.xlu1 %2422  ;;  %v2521_v58 = vadd.f32 %v2469_v9, %v7097_v29 }
 0x600   :  { %v2757_v17 = vmax.f32 %v2725_v39, 0.0  ;;  %v2580_v39 = vpop.permute.xlu0 %2579  ;;  %v2470_v29 = vsel %vm2464_vm8, %v7235_v0, %v2423_v6 }
 0x601   :  { %v2756_v25 = vmax.f32 %v7314_v3, 0.0  ;;  %5591 = vrot.lane.b32.xlu1 %v5585_v20, %s6078_s0 }
 0x603   :  { %v2578_v37 = vpop.permute.xlu1 %2577  ;;  %v5595_v34 = vpack.i.bf16 %v2757_v17, %v2756_v25 }
 0x604   :  { %v2631_v38 = vsel %vm2627_vm9, %v2576_v8, %v2578_v37  ;;  %v2683_v35 = vadd.f32 %v2578_v37, %v2520_v50 }
 0x605   :  { %v2682_v2 = vadd.f32 %v2631_v38, %v2519_v41  ;;  %5596 = vrot.lane.b32.xlu0 %v5595_v34, %s6077_s4  ;;  %v2524_v38 = vadd.f32 %v2423_v6, %v7105_v63 }
 0x606   :  { %v2727_v52 = vadd.f32 %v7278_v32, %v2683_v35  ;;  %v2584_v35 = vpop.permute.xlu0 %2583 }
 0x607   :  { %v7328_v31 = vadd.f32 %v7282_v15, %v2682_v2  ;;  %v2427_v20 = vpop.permute.xlu1 %2426  ;;  %v2523_v2 = vadd.f32 %v2470_v29, %v7103_v14 }
 0x608   :  { %v2759_v28 = vmax.f32 %v2727_v52, 0.0  ;;  %v2471_v63 = vsel %vm2464_vm8, %v7238_v19, %v2427_v20 }
 0x609   :  { %v2758_v42 = vmax.f32 %v7328_v31, 0.0  ;;  %5601 = vrot.lane.b32.xlu0 %v5595_v34, %s6078_s0 }
 0x60b   :  { %v2582_v5 = vpop.permute.xlu1 %2581  ;;  %v5605_v17 = vpack.i.bf16 %v2759_v28, %v2758_v42 }
 0x60c   :  { %v2632_v50 = vsel %vm2627_vm9, %v2580_v39, %v2582_v5  ;;  %v2685_v41 = vadd.f32 %v2582_v5, %v2522_v61 }
 0x60d   :  { %v2684_v8 = vadd.f32 %v2632_v50, %v2521_v58  ;;  %5606 = vrot.lane.b32.xlu1 %v5605_v17, %s6077_s4  ;;  %v2588_v50 = vpop.permute.xlu0 %2587 }
 0x60e   :  { %v2729_v54 = vadd.f32 %v7278_v32, %v2685_v41  ;;  %v2525_v41 = vadd.f32 %v2471_v63, %v7115_v23 }
 0x60f   :  { %v7342_v37 = vadd.f32 %v7282_v15, %v2684_v8  ;;  %v2431_v34 = vpop.permute.xlu1 %2430 }
 0x610   :  { %v2761_v33 = vmax.f32 %v2729_v54, 0.0 }
 0x611   :  { %v2760_v24 = vmax.f32 %v7342_v37, 0.0  ;;  %5611 = vrot.lane.b32.xlu1 %v5605_v17, %s6078_s0  ;;  %v2526_v17 = vadd.f32 %v2427_v20, %v7117_v16  ;;  %v2472_v16 = vsel %vm2464_vm8, %v7242_v53, %v2431_v34 }
 0x613   :  { %v2586_v52 = vpop.permute.xlu1 %2585  ;;  %v5615_v9 = vpack.i.bf16 %v2761_v33, %v2760_v24 }
 0x614   :  { %v2633_v28 = vsel %vm2627_vm9, %v2584_v35, %v2586_v52  ;;  %v2687_v61 = vadd.f32 %v2586_v52, %v2524_v38  ;;  %v2528_v52 = vadd.f32 %v2431_v34, %v7123_v40 }
 0x615   :  { %v2686_v58 = vadd.f32 %v2633_v28, %v2523_v2  ;;  %5616 = vrot.lane.b32.xlu0 %v5615_v9, %s6077_s4  ;;  %v2527_v28 = vadd.f32 %v2472_v16, %v7121_v22 }
 0x616   :  { %v2731_v0 = vadd.f32 %v7278_v32, %v2687_v61 }
 0x617   :  { %v7356_v39 = vadd.f32 %v7282_v15, %v2686_v58  ;;  %v2435_v5 = vpop.permute.xlu1 %2434 }
 0x618   :  { %v2763_v14 = vmax.f32 %v2731_v0, 0.0  ;;  %v2473_v40 = vsel %vm2464_vm8, %v7245_v51, %v2435_v5 }
 0x619   :  { %v2762_v6 = vmax.f32 %v7356_v39, 0.0  ;;  %5621 = vrot.lane.b32.xlu0 %v5615_v9, %s6078_s0  ;;  %v2592_v9 = vpop.permute.xlu0 %2591 }
 0x61b   :  { %v2590_v8 = vpop.permute.xlu1 %2589  ;;  %v5625_v54 = vpack.i.bf16 %v2763_v14, %v2762_v6 }
 0x61c   :  { %v2634_v29 = vsel %vm2627_vm9, %v2588_v50, %v2590_v8  ;;  %v2689_v33 = vadd.f32 %v2590_v8, %v2526_v17 }
 0x61d   :  { %v2688_v38 = vadd.f32 %v2634_v29, %v2525_v41  ;;  %5626 = vrot.lane.b32.xlu1 %v5625_v54, %s6077_s4  ;;  %v2530_v41 = vadd.f32 %v2435_v5, %v7133_v18  ;;  %v2596_v8 = vpop.permute.xlu0 %2595 }
 0x61e   :  { %v2733_v19 = vadd.f32 %v7278_v32, %v2689_v33 }
 0x61f   :  { %v7370_v35 = vadd.f32 %v7282_v15, %v2688_v38  ;;  %v2439_v2 = vpop.permute.xlu1 %2438 }
 0x620   :  { %v2765_v23 = vmax.f32 %v2733_v19, 0.0  ;;  %v2474_v18 = vsel %vm2464_vm8, %v7248_v27, %v2439_v2 }
 0x621   :  { %v2764_v20 = vmax.f32 %v7370_v35, 0.0  ;;  %5631 = vrot.lane.b32.xlu1 %v5625_v54, %s6078_s0  ;;  %v2529_v54 = vadd.f32 %v2473_v40, %v7131_v13 }
 0x623   :  { %v2594_v61 = vpop.permute.xlu1 %2593  ;;  %v5635_v58 = vpack.i.bf16 %v2765_v23, %v2764_v20 }
 0x624   :  { %v2635_v0 = vsel %vm2627_vm9, %v2592_v9, %v2594_v61  ;;  %v2691_v63 = vadd.f32 %v2594_v61, %v2528_v52  ;;  %v2532_v9 = vadd.f32 %v2439_v2, %v7139_v26  ;;  %v2531_v61 = vadd.f32 %v2474_v18, %v7137_v44 }
 0x625   :  { %v2690_v14 = vadd.f32 %v2635_v0, %v2527_v28  ;;  %5636 = vrot.lane.b32.xlu0 %v5635_v58, %s6077_s4  ;;  %v2600_v28 = vpop.permute.xlu0 %2599 }
 0x626   :  { %v2735_v53 = vadd.f32 %v7278_v32, %v2691_v63 }
 0x627   :  { %v7384_v17 = vadd.f32 %v7282_v15, %v2690_v14  ;;  %v2443_v50 = vpop.permute.xlu1 %2442 }
 0x628   :  { %v2767_v22 = vmax.f32 %v2735_v53, 0.0  ;;  %v2475_v26 = vsel %vm2464_vm8, %v7251_v7, %v2443_v50 }
 0x629   :  { %v2766_v34 = vmax.f32 %v7384_v17, 0.0  ;;  %5641 = vrot.lane.b32.xlu0 %v5635_v58, %s6078_s0 }
 0x62b   :  { %v2598_v29 = vpop.permute.xlu1 %2597  ;;  %v5645_v33 = vpack.i.bf16 %v2767_v22, %v2766_v34 }
 0x62c   :  { %v2636_v38 = vsel %vm2627_vm9, %v2596_v8, %v2598_v29  ;;  %v2693_v19 = vadd.f32 %v2598_v29, %v2530_v41  ;;  %v2534_v41 = vadd.f32 %v2443_v50, %v7149_v30  ;;  %v2604_v8 = vpop.permute.xlu0 %2603 }
 0x62d   :  { %v2692_v16 = vadd.f32 %v2636_v38, %v2529_v54  ;;  %5646 = vrot.lane.b32.xlu1 %v5645_v33, %s6077_s4  ;;  %v2533_v54 = vadd.f32 %v2475_v26, %v7147_v36 }
 0x62e   :  { %v2737_v51 = vadd.f32 %v7278_v32, %v2693_v19 }
 0x62f   :  { %v7398_v23 = vadd.f32 %v7282_v15, %v2692_v16  ;;  %v2447_v52 = vpop.permute.xlu1 %2446 }
 0x630   :  { %v2769_v13 = vmax.f32 %v2737_v51, 0.0  ;;  %v2476_v30 = vsel %vm2464_vm8, %v7255_v4, %v2447_v52  ;;  %v5872_v4 = vld [vmem:[%s8131_s5 + $0x4] ss:$12 sps:$4 sm:$0xff]  }
 0x631   :  { %v2768_v5 = vmax.f32 %v7398_v23, 0.0  ;;  %5651 = vrot.lane.b32.xlu1 %v5645_v33, %s6078_s0  ;;  %3301 = vmatprep.subr.bf16.mxu1 %v5872_v4  ;;  %v5894_v23 = vld [vmem:[%s8131_s5 + $0x20] ss:$12 sps:$4 sm:$0xff]  }
 0x633   :  { %v2602_v58 = vpop.permute.xlu1 %2601  ;;  %v5655_v0 = vpack.i.bf16 %v2769_v13, %v2768_v5  ;;  %v2536_v13 = vadd.f32 %v2447_v52, %v7155_v60 }
 0x634   :  { %v2637_v63 = vsel %vm2627_vm9, %v2600_v28, %v2602_v58  ;;  %v2695_v14 = vadd.f32 %v2602_v58, %v2532_v9  ;;  %v2608_v9 = vpop.permute.xlu0 %2607  ;;  %v2535_v28 = vadd.f32 %v2476_v30, %v7153_v56 }
 0x635   :  { %v2694_v53 = vadd.f32 %v2637_v63, %v2531_v61  ;;  %5656 = vrot.lane.b32.xlu0 %v5655_v0, %s6077_s4 }
 0x636   :  { %v2739_v27 = vadd.f32 %v7278_v32, %v2695_v14 }
 0x637   :  { %v7412_v40 = vadd.f32 %v7282_v15, %v2694_v53  ;;  %v2451_v22 = vpop.permute.xlu1 %2450 }
 0x638   :  { %v2771_v44 = vmax.f32 %v2739_v27, 0.0  ;;  %v2477_v27 = vsel %vm2464_vm8, %v7258_v10, %v2451_v22 }
 0x639   :  { %v2770_v2 = vmax.f32 %v7412_v40, 0.0  ;;  %5661 = vrot.lane.b32.xlu0 %v5655_v0, %s6078_s0  ;;  %v5870_v0 = vld [vmem:[%s8131_s5] ss:$12 sps:$4 sm:$0xff]   ;;  %v5895_v40 = vld [vmem:[%s8131_s5 + $0x38] ss:$12 sps:$4 sm:$0xff]  }
 0x63a   :  { %3302 = vmatpush1.bf16.msra.mxu1 %v5870_v0 }
 0x63b   :  { %v2606_v29 = vpop.permute.xlu1 %2605  ;;  %v5665_v33 = vpack.i.bf16 %v2771_v44, %v2770_v2 }
 0x63c   :  { %v2638_v38 = vsel %vm2627_vm9, %v2604_v8, %v2606_v29  ;;  %v2697_v19 = vadd.f32 %v2606_v29, %v2534_v41  ;;  %v2538_v41 = vadd.f32 %v2451_v22, %v7165_v45  ;;  %v2612_v8 = vpop.permute.xlu0 %2611 }
 0x63d   :  { %v2696_v16 = vadd.f32 %v2638_v38, %v2533_v54  ;;  %5666 = vrot.lane.b32.xlu1 %v5665_v33, %s6077_s4  ;;  %v2537_v54 = vadd.f32 %v2477_v27, %v7163_v47 }
 0x63e   :  { %v2741_v7 = vadd.f32 %v7278_v32, %v2697_v19 }
 0x63f   :  { %v7426_v51 = vadd.f32 %v7282_v15, %v2696_v16  ;;  %v2455_v18 = vpop.permute.xlu1 %2454 }
 0x640   :  { %v2773_v36 = vmax.f32 %v2741_v7, 0.0  ;;  %v2478_v45 = vsel %vm2464_vm8, %v7261_v62, %v2455_v18  ;;  %v2616_v22 = vpop.permute.xlu0 %2615  ;;  %v5875_v62 = vld [vmem:[%s8131_s5 + $0x1c] ss:$12 sps:$4 sm:$0xff]  }
 0x641   :  { %v2772_v50 = vmax.f32 %v7426_v51, 0.0  ;;  %5671 = vrot.lane.b32.xlu1 %v5665_v33, %s6078_s0  ;;  %3303 = vmatprep.subr.bf16.mxu1 %v5875_v62 }
 0x643   :  { %v2610_v61 = vpop.permute.xlu1 %2609  ;;  %v5675_v58 = vpack.i.bf16 %v2773_v36, %v2772_v50 }
 0x644   :  { %v2639_v63 = vsel %vm2627_vm9, %v2608_v9, %v2610_v61  ;;  %v2699_v14 = vadd.f32 %v2610_v61, %v2536_v13  ;;  %v2540_v13 = vadd.f32 %v2455_v18, %v7171_v49  ;;  %v2539_v9 = vadd.f32 %v2478_v45, %v7169_v48  ;;  %v2620_v18 = vpop.permute.xlu0 %2619 }
 0x645   :  { %v2698_v53 = vadd.f32 %v2639_v63, %v2535_v28  ;;  %5676 = vrot.lane.b32.xlu0 %v5675_v58, %s6077_s4 }
 0x646   :  { %v2743_v56 = vadd.f32 %v7278_v32, %v2699_v14 }
 0x647   :  { %v7446_v60 = vadd.f32 %v7282_v15, %v2698_v53  ;;  %v2459_v52 = vpop.permute.xlu1 %2458 }
 0x648   :  { %v2775_v26 = vmax.f32 %v2743_v56, 0.0  ;;  %v2479_v0 = vsel %vm2464_vm8, %v7264_v43, %v2459_v52  ;;  %v2542_v63 = vadd.f32 %v2459_v52, %v7179_v12  ;;  %v8152_v52 = vld [vmem:[#allocation7_spill] sm:$0xff] }
 0x649   :  { %v2774_v44 = vmax.f32 %v7446_v60, 0.0  ;;  %5681 = vrot.lane.b32.xlu0 %v5675_v58, %s6078_s0  ;;  %v5873_v58 = vld [vmem:[%s8131_s5 + $0x18] ss:$12 sps:$4 sm:$0xff]   ;;  %v2541_v53 = vadd.f32 %v2479_v0, %v7177_v59  ;;  %v5896_v60 = vld [vmem:[%s8131_s5 + $0x50] ss:$12 sps:$4 sm:$0xff]  }
 0x64a   :  { %3304 = vmatpush1.bf16.msra.mxu1 %v5873_v58  ;;  %v5876_v58 = vld [vmem:[%s8131_s5 + $0x30] ss:$12 sps:$4 sm:$0xff]   ;;  %v5881_v0 = vld [vmem:[%s8131_s5 + $0x4c] ss:$12 sps:$4 sm:$0xff]  }
 0x64b   :  { %v2614_v29 = vpop.permute.xlu1 %2613  ;;  %v5685_v33 = vpack.i.bf16 %v2775_v26, %v2774_v44 }
 0x64c   :  { %v2640_v38 = vsel %vm2627_vm9, %v2612_v8, %v2614_v29  ;;  %v2701_v19 = vadd.f32 %v2614_v29, %v2538_v41 }
 0x64d   :  { %v2700_v16 = vadd.f32 %v2640_v38, %v2537_v54  ;;  %5686 = vrot.lane.b32.xlu1 %v5685_v33, %s6077_s4  ;;  %v2624_v38 = vpop.permute.xlu0 %2623 }
 0x64e   :  { %v2745_v10 = vadd.f32 %v7278_v32, %v2701_v19 }
 0x64f   :  { %v7460_v7 = vadd.f32 %v7282_v15, %v2700_v16  ;;  %v2463_v30 = vpop.permute.xlu1 %2462 }
 0x650   :  { %v2777_v47 = vmax.f32 %v2745_v10, 0.0  ;;  %v2480_v43 = vsel %vm2464_vm8, %v7268_v21, %v2463_v30  ;;  %v2544_v12 = vadd.f32 %v2463_v30, %v7185_v55 }
 0x651   :  { %v2776_v36 = vmax.f32 %v7460_v7, 0.0  ;;  %5691 = vrot.lane.b32.xlu1 %v5685_v33, %s6078_s0  ;;  %v2543_v33 = vadd.f32 %v2480_v43, %v8152_v52  ;;  %v5888_v43 = vld [vmem:[%s8131_s5 + $0x90] ss:$12 sps:$4 sm:$0xff]   ;;  %v5897_v7 = vld [vmem:[%s8131_s5 + $0x68] ss:$12 sps:$4 sm:$0xff]  }
 0x653   :  { %v2618_v28 = vpop.permute.xlu1 %2617  ;;  %v5695_v61 = vpack.i.bf16 %v2777_v47, %v2776_v36 }
 0x654   :  { %v2641_v4 = vsel %vm2627_vm9, %v2616_v22, %v2618_v28  ;;  %v2703_v49 = vadd.f32 %v2618_v28, %v2540_v13 }
 0x655   :  { %v2702_v48 = vadd.f32 %v2641_v4, %v2539_v9  ;;  %5696 = vrot.lane.b32.xlu0 %v5695_v61, %s6077_s4  ;;  %v5884_v4 = vld [vmem:[%s8131_s5 + $0x64] ss:$12 sps:$4 sm:$0xff]  }
 0x656   :  { %v2747_v14 = vadd.f32 %v7278_v32, %v2703_v49  ;;  %v5882_v49 = vld [vmem:[%s8131_s5 + $0x60] ss:$12 sps:$4 sm:$0xff]  }
 0x657   :  { %v7484_v56 = vadd.f32 %v7282_v15, %v2702_v48  ;;  %v2622_v27 = vpop.permute.xlu1 %2621 }
 0x658   :  { %v2779_v26 = vmax.f32 %v2747_v14, 0.0  ;;  %v2642_v41 = vsel %vm2627_vm9, %v2620_v18, %v2622_v27  ;;  %v2705_v8 = vadd.f32 %v2622_v27, %v2542_v63  ;;  %v5887_v18 = vld [vmem:[%s8131_s5 + $0x7c] ss:$12 sps:$4 sm:$0xff]   ;;  %v5885_v63 = vld [vmem:[%s8131_s5 + $0x78] ss:$12 sps:$4 sm:$0xff]  }
 0x659   :  { %v2778_v54 = vmax.f32 %v7484_v56, 0.0  ;;  %v2704_v29 = vadd.f32 %v2642_v41, %v2541_v53  ;;  %5701 = vrot.lane.b32.xlu0 %v5695_v61, %s6078_s0  ;;  %v5890_v14 = vld [vmem:[%s8131_s5 + $0x94] ss:$12 sps:$4 sm:$0xff]   ;;  %v3154_v53 = vld [vmem:[%s8131_s5 + $0xa8] sm:$0xff] }
 0x65a   :  { %v2749_v59 = vadd.f32 %v7278_v32, %v2705_v8  ;;  %v5057_v41 = vcombine.low %v3154_v53, %v3154_v53  ;;  %v5898_v56 = vld [vmem:[%s8131_s5 + $0x80] ss:$12 sps:$4 sm:$0xff]  }
 0x65b   :  { %v7495_v19 = vadd.f32 %v7282_v15, %v2704_v29  ;;  %v2626_v21 = vpop.permute.xlu1 %2625  ;;  %v5705_v16 = vpack.i.bf16 %v2779_v26, %v2778_v54  ;;  %v5058_v26 = vcombine.high %v3154_v53, %v3154_v53 }
 0x65c   :  { %v2781_v10 = vmax.f32 %v2749_v59, 0.0  ;;  %v2643_v45 = vsel %vm2627_vm9, %v2624_v38, %v2626_v21  ;;  %v2707_v47 = vadd.f32 %v2626_v21, %v2544_v12  ;;  %v3293_v12 = vsel %vm3291_vm10, %v5057_v41, 0 }
 0x65d   :  { %v2780_v22 = vmax.f32 %v7495_v19, 0.0  ;;  %v2706_v13 = vadd.f32 %v2643_v45, %v2543_v33  ;;  %5706 = vrot.lane.b32.xlu1 %v5705_v16, %s6077_s4 }
 0x65e   :  { %v2751_v55 = vadd.f32 %v7278_v32, %v2707_v47  ;;  %v5878_v32 = vld [vmem:[%s8131_s5 + $0x34] ss:$12 sps:$4 sm:$0xff]  }
 0x65f   :  { %v5715_v30 = vpack.i.bf16 %v2781_v10, %v2780_v22  ;;  %v7506_v9 = vadd.f32 %v7282_v15, %v2706_v13  ;;  %3305 = vmatprep.subr.bf16.mxu1 %v5878_v32  ;;  %v5879_v15 = vld [vmem:[%s8131_s5 + $0x48] ss:$12 sps:$4 sm:$0xff]  }
 0x660   :  { %v2783_v28 = vmax.f32 %v2751_v55, 0.0  ;;  %3306 = vmatpush1.bf16.msra.mxu1 %v5876_v58 }
 0x661   :  { %v2782_v61 = vmax.f32 %v7506_v9, 0.0  ;;  %5716 = vrot.lane.b32.xlu0 %v5715_v30, %s6077_s4  ;;  %5711 = vrot.lane.b32.xlu1 %v5705_v16, %s6078_s0 }
 0x662   :  { %3307 = vmatprep.subr.bf16.mxu1 %v5881_v0 }
 0x663   :  { %v5725_v62 = vpack.i.bf16 %v2783_v28, %v2782_v61  ;;  %v8153_v28 = vmov 0.0|0.0  }
 0x664   :  { %3308 = vmatpush1.bf16.msra.mxu1 %v5879_v15  ;;  %v8154_v15 = vmov 0  }
 0x665   :  { %5721 = vrot.lane.b32.xlu0 %v5715_v30, %s6078_s0  ;;  %5726 = vrot.lane.b32.xlu1 %v5725_v62, %s6077_s4 }
 0x666   :  { %3309 = vmatprep.subr.bf16.mxu1 %v5884_v4 }
 0x667   :  { %v5577_v48 = vpop.permute.xlu0 %5576 }
 0x668   :  { %3310 = vmatpush1.bf16.msra.mxu1 %v5882_v49  ;;  %v5579_v21 = vunpack.i.h.bf16 %v5577_v48  ;;  %v5578_v16 = vunpack.i.l.bf16 %v5577_v48 }
 0x669   :  { %5731 = vrot.lane.b32.xlu1 %v5725_v62, %s6078_s0  ;;  %3311 = vmatprep.subr.bf16.mxu1 %v5887_v18 }
 0x66a   :  { %v2995_v48 = vsel %vm2994_vm11, %v5578_v16, %v5579_v21 }
 0x66b   :  { %v5582_v27 = vpop.permute.xlu0 %5581 }
 0x66c   :  { %3312 = vmatpush1.bf16.msra.mxu1 %v5885_v63  ;;  %v5584_v47 = vunpack.i.h.bf16 %v5582_v27  ;;  %v5583_v13 = vunpack.i.l.bf16 %v5582_v27 }
 0x66d   :  { %3313 = vmatprep.subr.bf16.mxu1 %v5890_v14 }
 0x66e   :  { %v2881_v63 = vsel %vm2880_vm12, %v5583_v13, %v5584_v47 }
 0x66f   :  { %v5587_v8 = vpop.permute.xlu1 %5586 }
 0x670   :  { %3314 = vmatpush1.bf16.msra.mxu1 %v5888_v43  ;;  %v5589_v58 = vunpack.i.h.bf16 %v5587_v8  ;;  %v5588_v32 = vunpack.i.l.bf16 %v5587_v8 }
 0x671   :  { %5060 = vmatprep.subr.msk.bf16.mxu1 %vm3291_vm10, %v5058_v26 }
 0x672   :  { %v2996_v53 = vsel %vm2994_vm11, %v5588_v32, %v5589_v58 }
 0x673   :  { %v5592_v59 = vpop.permute.xlu1 %5591 }
 0x674   :  { %3316 = vmatpush1.bf16.msra.mxu1 %v3293_v12  ;;  %v5594_v55 = vunpack.i.h.bf16 %v5592_v59  ;;  %v5593_v30 = vunpack.i.l.bf16 %v5592_v59  ;;  %v3027_v12 = vmax.f32 %v2752_v57, %v2995_v48  ;;  %v2914_v59 = vsel %vm2913_vm13, 0.0, %v2881_v63 }
 0x676   :  { %v2882_v14 = vsel %vm2880_vm12, %v5593_v30, %v5594_v55  ;;  %v3043_v16 = vmax.f32 %v3027_v12, %v2914_v59 }
 0x677   :  { %v5597_v29 = vpop.permute.xlu0 %5596  ;;  %3334 = vmatmul.mubr.bf16.vlgmr.msra.gmra.mrb[128].mxu1 %v8153_v28 }
 0x678   :  { %v5599_v10 = vunpack.i.h.bf16 %v5597_v29  ;;  %v5598_v45 = vunpack.i.l.bf16 %v5597_v29  ;;  %3341 = vmatprep.mubr.bf16.mxu1 %v8154_v15 }
 0x67a   :  { %v2997_v18 = vsel %vm2994_vm11, %v5598_v45, %v5599_v10 }
 0x67b   :  { %v5602_v52 = vpop.permute.xlu0 %5601  ;;  %v3029_v41 = vmax.f32 %v2756_v25, %v2997_v18 }
 0x67c   :  { %v5604_v33 = vunpack.i.h.bf16 %v5602_v52  ;;  %v5603_v38 = vunpack.i.l.bf16 %v5602_v52  ;;  %v2915_v52 = vsel %vm2913_vm13, 0.0, %v2882_v14 }
 0x67e   :  { %v2883_v0 = vsel %vm2880_vm12, %v5603_v38, %v5604_v33  ;;  %v3028_v33 = vmax.f32 %v2754_v11, %v2996_v53 }
 0x67f   :  { %v5607_v62 = vpop.permute.xlu1 %5606  ;;  %v2916_v27 = vsel %vm2913_vm13, 0.0, %v2883_v0 }
 0x680   :  { %v5609_v4 = vunpack.i.h.bf16 %v5607_v62  ;;  %v5608_v49 = vunpack.i.l.bf16 %v5607_v62  ;;  %v7569_v38 = vmax.f32 %v3029_v41, %v2916_v27  ;;  %v3044_v10 = vmax.f32 %v3028_v33, %v2915_v52 }
 0x682   :  { %v2998_v43 = vsel %vm2994_vm11, %v5608_v49, %v5609_v4  ;;  %v3059_v57 = vmax.f32 %v3043_v16, %v7569_v38 }
 0x683   :  { %v5612_v26 = vpop.permute.xlu1 %5611  ;;  %v3030_v21 = vmax.f32 %v2758_v42, %v2998_v43 }
 0x684   :  { %v5614_v8 = vunpack.i.h.bf16 %v5612_v26  ;;  %v5613_v29 = vunpack.i.l.bf16 %v5612_v26 }
 0x686   :  { %v2884_v3 = vsel %vm2880_vm12, %v5613_v29, %v5614_v8 }
 0x687   :  { %v2917_v25 = vsel %vm2913_vm13, 0.0, %v2884_v3  ;;  %v5617_v13 = vpop.permute.xlu0 %5616 }
 0x688   :  { %v3046_v46 = vmax.f32 %v3030_v21, %v2917_v25  ;;  %v5619_v49 = vunpack.i.h.bf16 %v5617_v13  ;;  %v5618_v18 = vunpack.i.l.bf16 %v5617_v13 }
 0x68a   :  { %v3060_v45 = vmax.f32 %v3044_v10, %v3046_v46  ;;  %v2999_v12 = vsel %vm2994_vm11, %v5618_v18, %v5619_v49 }
 0x68b   :  { %v5622_v1 = vpop.permute.xlu0 %5621  ;;  %v3031_v10 = vmax.f32 %v2760_v24, %v2999_v12 }
 0x68c   :  { %v5735_v47 = vpack.i.bf16 %v3060_v45, %v3059_v57  ;;  %v5624_v32 = vunpack.i.h.bf16 %v5622_v1  ;;  %v5623_v62 = vunpack.i.l.bf16 %v5622_v1 }
 0x68e   :  { %5736 = vrot.lane.b32.xlu0 %v5735_v47, %s6079_s21  ;;  %v2885_v41 = vsel %vm2880_vm12, %v5623_v62, %v5624_v32 }
 0x68f   :  { %v5627_v11 = vpop.permute.xlu1 %5626  ;;  %v2918_v21 = vsel %vm2913_vm13, 0.0, %v2885_v41 }
 0x690   :  { %v5629_v53 = vunpack.i.h.bf16 %v5627_v11  ;;  %v5628_v27 = vunpack.i.l.bf16 %v5627_v11  ;;  %v3047_v1 = vmax.f32 %v3031_v10, %v2918_v21 }
 0x692   :  { %v3000_v3 = vsel %vm2994_vm11, %v5628_v27, %v5629_v53 }
 0x693   :  { %v5632_v31 = vpop.permute.xlu1 %5631  ;;  %v3032_v35 = vmax.f32 %v2762_v6, %v3000_v3 }
 0x694   :  { %v5634_v48 = vunpack.i.h.bf16 %v5632_v31  ;;  %v5633_v63 = vunpack.i.l.bf16 %v5632_v31 }
 0x696   :  { %v2886_v52 = vsel %vm2880_vm12, %v5633_v63, %v5634_v48 }
 0x697   :  { %v5637_v55 = vpop.permute.xlu0 %5636  ;;  %v2919_v13 = vsel %vm2913_vm13, 0.0, %v2886_v52 }
 0x698   :  { %v5639_v42 = vunpack.i.h.bf16 %v5637_v55  ;;  %v5638_v30 = vunpack.i.l.bf16 %v5637_v55  ;;  %v3048_v31 = vmax.f32 %v3032_v35, %v2919_v13 }
 0x69a   :  { %v3001_v43 = vsel %vm2994_vm11, %v5638_v30, %v5639_v42  ;;  %v5893_v42 = vld [vmem:[%s8131_s5 + $0x8] ss:$12 sps:$4 sm:$0xff]  }
 0x69b   :  { %v5642_v58 = vpop.permute.xlu0 %5641  ;;  %v3033_v33 = vmax.f32 %v2764_v20, %v3001_v43  ;;  %5167 = vmatprep.subr.bf16.mxu1 %v5893_v42 }
 0x69c   :  { %v5644_v0 = vunpack.i.h.bf16 %v5642_v58  ;;  %v5643_v4 = vunpack.i.l.bf16 %v5642_v58  ;;  %5168 = vmatpush3.bf16.msra.mxu1 %v5893_v42 }
 0x69d   :  { %5169 = vmatprep.subr.bf16.mxu1 %v5894_v23 }
 0x69e   :  { %v2887_v14 = vsel %vm2880_vm12, %v5643_v4, %v5644_v0 }
 0x69f   :  { %v5647_v26 = vpop.permute.xlu1 %5646  ;;  %v2920_v59 = vsel %vm2913_vm13, 0.0, %v2887_v14 }
 0x6a0   :  { %v5649_v8 = vunpack.i.h.bf16 %v5647_v26  ;;  %v5648_v29 = vunpack.i.l.bf16 %v5647_v26  ;;  %v7590_v57 = vmax.f32 %v3033_v33, %v2920_v59  ;;  %5170 = vmatpush3.bf16.msra.mxu1 %v5894_v23  ;;  %v5899_v23 = vld [vmem:[%s8131_s5 + $0x98] ss:$12 sps:$4 sm:$0xff]  }
 0x6a1   :  { %5171 = vmatprep.subr.bf16.mxu1 %v5895_v40 }
 0x6a2   :  { %v3002_v25 = vsel %vm2994_vm11, %v5648_v29, %v5649_v8  ;;  %v3061_v37 = vmax.f32 %v3047_v1, %v7590_v57 }
 0x6a3   :  { %v5652_v16 = vpop.permute.xlu1 %5651  ;;  %v3034_v20 = vmax.f32 %v2766_v34, %v3002_v25 }
 0x6a4   :  { %v5654_v45 = vunpack.i.h.bf16 %v5652_v16  ;;  %v5653_v47 = vunpack.i.l.bf16 %v5652_v16  ;;  %v3063_v39 = vmax.f32 %v3061_v37, %v7569_v38  ;;  %5172 = vmatpush3.bf16.msra.mxu1 %v5895_v40 }
 0x6a5   :  { %5173 = vmatprep.subr.bf16.mxu1 %v5896_v60 }
 0x6a6   :  { %v2888_v11 = vsel %vm2880_vm12, %v5653_v47, %v5654_v45 }
 0x6a7   :  { %v2921_v55 = vsel %vm2913_vm13, 0.0, %v2888_v11  ;;  %v5657_v17 = vpop.permute.xlu0 %5656 }
 0x6a8   :  { %v7600_v24 = vmax.f32 %v3034_v20, %v2921_v55  ;;  %v5659_v27 = vunpack.i.h.bf16 %v5657_v17  ;;  %v5658_v43 = vunpack.i.l.bf16 %v5657_v17  ;;  %5174 = vmatpush3.bf16.msra.mxu1 %v5896_v60 }
 0x6a9   :  { %5175 = vmatprep.subr.bf16.mxu1 %v5897_v7 }
 0x6aa   :  { %v3062_v30 = vmax.f32 %v3048_v31, %v7600_v24  ;;  %v3003_v21 = vsel %vm2994_vm11, %v5658_v43, %v5659_v27 }
 0x6ab   :  { %v5662_v58 = vpop.permute.xlu0 %5661  ;;  %v3035_v1 = vmax.f32 %v2768_v5, %v3003_v21 }
 0x6ac   :  { %v3064_v6 = vmax.f32 %v3062_v30, %v3046_v46  ;;  %v5664_v48 = vunpack.i.h.bf16 %v5662_v58  ;;  %v5663_v63 = vunpack.i.l.bf16 %v5662_v58  ;;  %5176 = vmatpush3.bf16.msra.mxu1 %v5897_v7 }
 0x6ad   :  { %5177 = vmatprep.subr.bf16.mxu1 %v5898_v56 }
 0x6ae   :  { %v5740_v34 = vpack.i.bf16 %v3064_v6, %v3063_v39  ;;  %v2889_v59 = vsel %vm2880_vm12, %v5663_v63, %v5664_v48 }
 0x6af   :  { %v5667_v32 = vpop.permute.xlu1 %5666  ;;  %v2922_v10 = vsel %vm2913_vm13, 0.0, %v2889_v59 }
 0x6b0   :  { %5741 = vrot.lane.b32.xlu1 %v5740_v34, %s6079_s21  ;;  %v5669_v41 = vunpack.i.h.bf16 %v5667_v32  ;;  %v5668_v8 = vunpack.i.l.bf16 %v5667_v32  ;;  %v3051_v31 = vmax.f32 %v3035_v1, %v2922_v10  ;;  %5178 = vmatpush3.bf16.msra.mxu1 %v5898_v56 }
 0x6b1   :  { %5179 = vmatprep.subr.bf16.mxu1 %v5899_v23 }
 0x6b2   :  { %v3004_v45 = vsel %vm2994_vm11, %v5668_v8, %v5669_v41 }
 0x6b3   :  { %v5672_v0 = vpop.permute.xlu1 %5671  ;;  %v3036_v51 = vmax.f32 %v2770_v2, %v3004_v45 }
 0x6b4   :  { %v5674_v38 = vunpack.i.h.bf16 %v5672_v0  ;;  %v5673_v46 = vunpack.i.l.bf16 %v5672_v0  ;;  %5180 = vmatpush3.bf16.msra.mxu1 %v5899_v23 }
 0x6b6   :  { %v2890_v25 = vsel %vm2880_vm12, %v5673_v46, %v5674_v38 }
 0x6b7   :  { %v5677_v62 = vpop.permute.xlu0 %5676  ;;  %v2923_v55 = vsel %vm2913_vm13, 0.0, %v2890_v25 }
 0x6b8   :  { %v5679_v4 = vunpack.i.h.bf16 %v5677_v62  ;;  %v5678_v49 = vunpack.i.l.bf16 %v5677_v62  ;;  %v3052_v5 = vmax.f32 %v3036_v51, %v2923_v55 }
 0x6ba   :  { %v3005_v29 = vsel %vm2994_vm11, %v5678_v49, %v5679_v4 }
 0x6bb   :  { %v5682_v18 = vpop.permute.xlu0 %5681  ;;  %v3037_v16 = vmax.f32 %v2772_v50, %v3005_v29 }
 0x6bc   :  { %v5684_v14 = vunpack.i.h.bf16 %v5682_v18  ;;  %v5683_v53 = vunpack.i.l.bf16 %v5682_v18 }
 0x6be   :  { %v2891_v26 = vsel %vm2880_vm12, %v5683_v53, %v5684_v14 }
 0x6bf   :  { %v5687_v12 = vpop.permute.xlu1 %5686  ;;  %v2924_v3 = vsel %vm2913_vm13, 0.0, %v2891_v26 }
 0x6c0   :  { %v5689_v52 = vunpack.i.h.bf16 %v5687_v12  ;;  %v5688_v33 = vunpack.i.l.bf16 %v5687_v12  ;;  %v7621_v35 = vmax.f32 %v3037_v16, %v2924_v3 }
 0x6c2   :  { %v3006_v47 = vsel %vm2994_vm11, %v5688_v33, %v5689_v52  ;;  %v3065_v30 = vmax.f32 %v3051_v31, %v7621_v35 }
 0x6c3   :  { %v5692_v13 = vpop.permute.xlu1 %5691  ;;  %v3038_v50 = vmax.f32 %v2774_v44, %v3006_v47 }
 0x6c4   :  { %v5694_v20 = vunpack.i.h.bf16 %v5692_v13  ;;  %v5693_v11 = vunpack.i.l.bf16 %v5692_v13  ;;  %v3067_v44 = vmax.f32 %v3065_v30, %v7590_v57 }
 0x6c6   :  { %v2892_v37 = vsel %vm2880_vm12, %v5693_v11, %v5694_v20 }
 0x6c7   :  { %v2925_v42 = vsel %vm2913_vm13, 0.0, %v2892_v37  ;;  %v5697_v6 = vpop.permute.xlu0 %5696 }
 0x6c8   :  { %v7634_v39 = vmax.f32 %v3038_v50, %v2925_v42  ;;  %v5699_v63 = vunpack.i.h.bf16 %v5697_v6  ;;  %v5698_v14 = vunpack.i.l.bf16 %v5697_v6 }
 0x6ca   :  { %v3066_v2 = vmax.f32 %v3052_v5, %v7634_v39  ;;  %v3007_v12 = vsel %vm2994_vm11, %v5698_v14, %v5699_v63  ;;  %v5900_v5 = vld [vmem:[%s8131_s5 + $0xb0] ss:$0 sps:$4 sm:$0xff]   ;;  %s6080_s5 = smov 32  }
 0x6cb   :  { %v5702_v58 = vpop.permute.xlu0 %5701  ;;  %v3039_v47 = vmax.f32 %v2776_v36, %v3007_v12  ;;  %5359 = vmatprep.subr.msk.bf16.mxu1 %vm3291_vm10, %v5900_v5 }
 0x6cc   :  { %v3068_v17 = vmax.f32 %v3066_v2, %v7600_v24  ;;  %v5704_v4 = vunpack.i.h.bf16 %v5702_v58  ;;  %v5703_v49 = vunpack.i.l.bf16 %v5702_v58 }
 0x6ce   :  { %v5745_v34 = vpack.i.bf16 %v3068_v17, %v3067_v44  ;;  %v2893_v26 = vsel %vm2880_vm12, %v5703_v49, %v5704_v4 }
 0x6cf   :  { %v5707_v32 = vpop.permute.xlu1 %5706  ;;  %v2926_v3 = vsel %vm2913_vm13, 0.0, %v2893_v26 }
 0x6d0   :  { %5746 = vrot.lane.b32.xlu0 %v5745_v34, %s6079_s21  ;;  %v5709_v27 = vunpack.i.h.bf16 %v5707_v32  ;;  %v5708_v24 = vunpack.i.l.bf16 %v5707_v32  ;;  %v3055_v20 = vmax.f32 %v3039_v47, %v2926_v3 }
 0x6d2   :  { %v3008_v25 = vsel %vm2994_vm11, %v5708_v24, %v5709_v27 }
 0x6d3   :  { %v5717_v62 = vpop.permute.xlu0 %5716  ;;  %v5712_v0 = vpop.permute.xlu1 %5711  ;;  %v3040_v11 = vmax.f32 %v2778_v54, %v3008_v25 }
 0x6d4   :  { %v5719_v18 = vunpack.i.h.bf16 %v5717_v62  ;;  %v5718_v48 = vunpack.i.l.bf16 %v5717_v62  ;;  %v5714_v53 = vunpack.i.h.bf16 %v5712_v0  ;;  %v5713_v57 = vunpack.i.l.bf16 %v5712_v0 }
 0x6d6   :  { %v3009_v43 = vsel %vm2994_vm11, %v5718_v48, %v5719_v18  ;;  %v2894_v33 = vsel %vm2880_vm12, %v5713_v57, %v5714_v53 }
 0x6d7   :  { %v5722_v38 = vpop.permute.xlu0 %5721  ;;  %v5727_v46 = vpop.permute.xlu1 %5726  ;;  %v3041_v52 = vmax.f32 %v2780_v22, %v3009_v43  ;;  %v2927_v22 = vsel %vm2913_vm13, 0.0, %v2894_v33 }
 0x6d8   :  { %v5724_v41 = vunpack.i.h.bf16 %v5722_v38  ;;  %v5723_v8 = vunpack.i.l.bf16 %v5722_v38  ;;  %v5729_v29 = vunpack.i.h.bf16 %v5727_v46  ;;  %v5728_v59 = vunpack.i.l.bf16 %v5727_v46 }
 0x6d9   :  { %v3056_v36 = vmax.f32 %v3040_v11, %v2927_v22 }
 0x6da   :  { %v2895_v21 = vsel %vm2880_vm12, %v5723_v8, %v5724_v41  ;;  %v3010_v10 = vsel %vm2994_vm11, %v5728_v59, %v5729_v29 }
 0x6db   :  { %v2928_v16 = vsel %vm2913_vm13, 0.0, %v2895_v21  ;;  %v5732_v45 = vpop.permute.xlu1 %5731  ;;  %v3042_v55 = vmax.f32 %v2782_v61, %v3010_v10 }
 0x6dc   :  { %v3057_v13 = vmax.f32 %v3041_v52, %v2928_v16  ;;  %v5734_v1 = vunpack.i.h.bf16 %v5732_v45  ;;  %v5733_v19 = vunpack.i.l.bf16 %v5732_v45 }
 0x6de   :  { %v2896_v31 = vsel %vm2880_vm12, %v5733_v19, %v5734_v1  ;;  %v3069_v50 = vmax.f32 %v3055_v20, %v3057_v13 }
 0x6df   :  { %v2929_v51 = vsel %vm2913_vm13, 0.0, %v2896_v31 }
 0x6e0   :  { %v3058_v37 = vmax.f32 %v3042_v55, %v2929_v51  ;;  %v3071_v54 = vmax.f32 %v3069_v50, %v7621_v35  ;;  %v3299_v35 = vsel %vm3291_vm10, %v5900_v5, 0 }
 0x6e1   :  { %5182 = vmatpush3.bf16.msra.mxu1 %v3299_v35 }
 0x6e2   :  { %v3070_v42 = vmax.f32 %v3056_v36, %v3058_v37 }
 0x6e4   :  { %v3072_v9 = vmax.f32 %v3070_v42, %v7634_v39 }
 0x6e6   :  { %v5750_v61 = vpack.i.bf16 %v3072_v9, %v3071_v54 }
 0x6e8   :  { %5751 = vrot.lane.b32.xlu1 %v5750_v61, %s6079_s21 }
 0x700   :  { %v5737_v30 = vpop.permute.xlu0 %5736 }
 0x701   :  { %v5739_v39 = vunpack.i.h.bf16 %v5737_v30  ;;  %v5738_v6 = vunpack.i.l.bf16 %v5737_v30 }
 0x703   :  { %v3106_v40 = vsel %vm2913_vm13, 0.0, %v5739_v39  ;;  %v3105_v2 = vsel %vm2913_vm13, 0.0, %v5738_v6 }
 0x704   :  { %v3115_v60 = vsel %vm3113_vm14, %v3106_v40, 0.0  ;;  %v3114_v44 = vsel %vm3113_vm14, %v3105_v2, 0.0 }
 0x705   :  { %v3122_v17 = vpack.c.bf16 %v3115_v60, %v3114_v44 }
 0x707   :  { %5061 = vmatmul.mubr.msk.bf16.gmra.mrb[132].mxu1 %vm3276_vm15, %v3122_v17 }
 0x708   :  { %3351 = vmatprep.mubr.bf16.mxu1 %v8154_v15 }
 0x722   :  { %v5742_v34 = vpop.permute.xlu1 %5741 }
 0x723   :  { %v5744_v58 = vunpack.i.h.bf16 %v5742_v34  ;;  %v5743_v32 = vunpack.i.l.bf16 %v5742_v34 }
 0x725   :  { %v3108_v62 = vsel %vm2913_vm13, 0.0, %v5744_v58  ;;  %v3107_v0 = vsel %vm2913_vm13, 0.0, %v5743_v32 }
 0x726   :  { %v3117_v4 = vsel %vm3113_vm14, %v3108_v62, 0.0  ;;  %v3116_v49 = vsel %vm3113_vm14, %v3107_v0, 0.0 }
 0x727   :  { %v3123_v18 = vpack.c.bf16 %v3117_v4, %v3116_v49 }
 0x729   :  { %5062 = vmatmul.mubr.msk.bf16.gmra.mrb[136].mxu1 %vm3276_vm15, %v3123_v18 }
 0x72a   :  { %3361 = vmatprep.mubr.bf16.mxu1 %v8154_v15 }
 0x742   :  { %v5747_v48 = vpop.permute.xlu0 %5746 }
 0x743   :  { %v5749_v63 = vunpack.i.h.bf16 %v5747_v48  ;;  %v5748_v14 = vunpack.i.l.bf16 %v5747_v48 }
 0x745   :  { %v3110_v53 = vsel %vm2913_vm13, 0.0, %v5749_v63  ;;  %v3109_v57 = vsel %vm2913_vm13, 0.0, %v5748_v14  ;;  %v5901_v63 = vld [vmem:[%s8133_s7 + $0x18] sm:$0xff]   ;;  %v6081_v14 = vmov 0.0  }
 0x746   :  { %v3119_v27 = vsel %vm3113_vm14, %v3110_v53, 0.0  ;;  %v3118_v24 = vsel %vm3113_vm14, %v3109_v57, 0.0  ;;  %5199 = vmatprep.subr.bf16.mxu1 %v6081_v14 }
 0x747   :  { %v3124_v43 = vpack.c.bf16 %v3119_v27, %v3118_v24 }
 0x749   :  { %5063 = vmatmul.mubr.msk.bf16.gmra.mrb[140].mxu1 %vm3276_vm15, %v3124_v43 }
 0x74a   :  { %3371 = vmatprep.mubr.bf16.mxu1 %v8154_v15  ;;  %v7701_v38 = vpop.f32.mrb[128].mxu1 }
 0x74b   :  { %v3337_v46 = vpop.f32.mrb[129].mxu1 }
 0x74c   :  { %v7703_v26 = vpop.f32.mrb[130].mxu1 }
 0x74d   :  { %v3340_v41 = vpop.f32.mrb[131].mxu1 }
 0x75a   :  { %v5752_v8 = vpop.permute.xlu1 %5751 }
 0x75b   :  { %v5754_v29 = vunpack.i.h.bf16 %v5752_v8  ;;  %v5753_v12 = vunpack.i.l.bf16 %v5752_v8 }
 0x75d   :  { %v3112_v59 = vsel %vm2913_vm13, 0.0, %v5754_v29  ;;  %v3111_v52 = vsel %vm2913_vm13, 0.0, %v5753_v12 }
 0x75e   :  { %v3121_v33 = vsel %vm3113_vm14, %v3112_v59, 0.0  ;;  %v3120_v21 = vsel %vm3113_vm14, %v3111_v52, 0.0 }
 0x75f   :  { %v3125_v3 = vpack.c.bf16 %v3121_v33, %v3120_v21 }
 0x761   :  { %5064 = vmatmul.mubr.msk.bf16.gmra.mrb[144].mxu1 %vm3276_vm15, %v3125_v3 }
 0x762   :  { %3381 = vmatprep.mubr.bf16.mxu1 %v8154_v15 }
 0x769   :  { %3382 = vmatmul.mubr.bf16.gmra.mrb[148].mxu1 %v8153_v28 }
 0x76a   :  { %3389 = vmatprep.mubr.bf16.mxu1 %v8154_v15 }
 0x771   :  { %3390 = vmatmul.mubr.bf16.gmra.mrb[152].mxu1 %v8153_v28 }
 0x772   :  { %3395 = vmatprep.mubr.bf16.mxu1 %v8154_v15 }
 0x779   :  { %3396 = vmatmul.mubr.bf16.gmra.mrb[156].mxu1 %v8153_v28 }
 0x77a   :  { %5183 = vmatprep.mubr.bf16.mxu1 %v8153_v28 }
 0x781   :  { %5184 = vmatmul.mubr.msk.bf16.vlgmr.msra.gmra.mrb[160].mxu1 %vm3276_vm15, %v3122_v17 }
 0x782   :  { %5187 = vmatprep.mubr.msk.bf16.mxu1 %vm3276_vm15, %v3123_v18  ;;  %5200 = vmatpush3.bf16.msra.mxu1 %v5901_v63 }
 0x783   :  { %5201 = vmatprep.subr.bf16.mxu1 %v6081_v14 }
 0x789   :  { %5188 = vmatmul.mubr.msk.bf16.gmra.mrb[164].mxu1 %vm3276_vm15, %v3124_v43 }
 0x78a   :  { %5191 = vmatprep.mubr.msk.bf16.mxu1 %vm3276_vm15, %v3125_v3 }
 0x791   :  { %5192 = vmatmul.mubr.bf16.gmra.mrb[168].mxu1 %v8153_v28 }
 0x792   :  { %5195 = vmatprep.mubr.bf16.mxu1 %v8153_v28 }
 0x799   :  { %5196 = vmatmul.mubr.bf16.gmra.mrb[172].mxu1 %v8153_v28 }
 0x79a   :  { %5205 = vmatprep.mubr.msk.bf16.mxu1 %vm6084_vm0, %v6081_v14 }
 0x7da   :  { %v7724_v25 = vpop.f32.mrb[132].mxu1 }
 0x7db   :  { %v7726_v16 = vpop.f32.mrb[133].mxu1 }
 0x7dc   :  { %v7728_v10 = vpop.f32.mrb[134].mxu1 }
 0x7dd   :  { %v7730_v45 = vpop.f32.mrb[135].mxu1 }
 0x7fc   :  { %v7732_v47 = vpop.f32.mrb[136].mxu1 }
 0x7fd   :  { %3515 = vrot.lane.b32.xlu0 %v7732_v47, %s6080_s5  ;;  %v3355_v13 = vpop.f32.mrb[137].mxu1 }
 0x7fe   :  { %3517 = vrot.lane.b32.xlu1 %v3355_v13, %s6080_s5  ;;  %v7737_v1 = vpop.f32.mrb[138].mxu1 }
 0x7ff   :  { %v3359_v28 = vpop.f32.mrb[139].mxu1 }
 0x801   :  { %3519 = vrot.lane.b32.xlu0 %v7737_v1, %s6080_s5 }
 0x802   :  { %3521 = vrot.lane.b32.xlu1 %v3359_v28, %s6080_s5 }
 0x81c   :  { %v7742_v19 = vpop.f32.mrb[140].mxu1 }
 0x81d   :  { %3523 = vrot.lane.b32.xlu0 %v7742_v19, %s6080_s5  ;;  %v3365_v22 = vpop.f32.mrb[141].mxu1 }
 0x81e   :  { %3525 = vrot.lane.b32.xlu1 %v3365_v22, %s6080_s5  ;;  %v7747_v20 = vpop.f32.mrb[142].mxu1 }
 0x81f   :  { %v3369_v11 = vpop.f32.mrb[143].mxu1 }
 0x821   :  { %3581 = vrot.lane.b32.xlu0 %v3365_v22, %s6076_s26 }
 0x822   :  { %3529 = vrot.lane.b32.xlu1 %v3369_v11, %s6080_s5 }
 0x825   :  { %3527 = vrot.lane.b32.xlu0 %v7747_v20, %s6080_s5 }
 0x829   :  { %3585 = vrot.lane.b32.xlu0 %v3369_v11, %s6076_s26 }
 0x834   :  { %v3373_v55 = vpop.f32.mrb[144].mxu1 }
 0x835   :  { %3531 = vrot.lane.b32.xlu0 %v3373_v55, %s6080_s5  ;;  %v3375_v31 = vpop.f32.mrb[145].mxu1 }
 0x836   :  { %3533 = vrot.lane.b32.xlu1 %v3375_v31, %s6080_s5  ;;  %v3377_v51 = vpop.f32.mrb[146].mxu1 }
 0x837   :  { %v3379_v7 = vpop.f32.mrb[147].mxu1 }
 0x839   :  { %3589 = vrot.lane.b32.xlu0 %v3375_v31, %s6076_s26 }
 0x83a   :  { %3537 = vrot.lane.b32.xlu1 %v3379_v7, %s6080_s5 }
 0x83c   :  { %v3383_v36 = vpop.f32.mrb[148].mxu1 }
 0x83d   :  { %3535 = vrot.lane.b32.xlu0 %v3377_v51, %s6080_s5  ;;  %v3384_v50 = vpop.f32.mrb[149].mxu1 }
 0x83e   :  { %v3386_v37 = vpop.f32.mrb[150].mxu1 }
 0x83f   :  { %v3387_v42 = vpop.f32.mrb[151].mxu1 }
 0x841   :  { %3593 = vrot.lane.b32.xlu0 %v3379_v7, %s6076_s26 }
 0x844   :  { %v3391_v56 = vpop.f32.mrb[152].mxu1 }
 0x845   :  { %3597 = vrot.lane.b32.xlu0 %v3384_v50, %s6076_s26  ;;  %v3392_v54 = vpop.f32.mrb[153].mxu1 }
 0x846   :  { %v3393_v9 = vpop.f32.mrb[154].mxu1  ;;  %v5902_v54 = vld [vmem:[%s8133_s7 + $0x20] sm:$0xff]  }
 0x847   :  { %v3394_v61 = vpop.f32.mrb[155].mxu1  ;;  %5202 = vmatpush3.bf16.msra.mxu1 %v5902_v54 }
 0x848   :  { %5203 = vmatprep.subr.bf16.mxu1 %v6081_v14 }
 0x849   :  { %3601 = vrot.lane.b32.xlu0 %v3387_v42, %s6076_s26 }
 0x84c   :  { %v3397_v23 = vpop.f32.mrb[156].mxu1 }
 0x84d   :  { %3507 = vrot.lane.b32.xlu0 %v7724_v25, %s6080_s5  ;;  %v3398_v5 = vpop.f32.mrb[157].mxu1 }
 0x84e   :  { %v3399_v35 = vpop.f32.mrb[158].mxu1 }
 0x84f   :  { %v3400_v30 = vpop.f32.mrb[159].mxu1 }
 0x850   :  { %v5069_v30 = vld [vmem:[%s8132_s6] ss:$0 sm:$0xff]  ;;  %s6082_s6 = smov 80  }
 0x851   :  { %3511 = vrot.lane.b32.xlu0 %v7728_v10, %s6080_s5 }
 0x854   :  { %v5185_v39 = vpop.f32.mrb[160].mxu1 }
 0x855   :  { %3573 = vrot.lane.b32.xlu0 %v3355_v13, %s6076_s26  ;;  %v3436_v6 = vpop.f32.mrb[161].mxu1 }
 0x856   :  { %v5186_v40 = vpop.f32.mrb[162].mxu1 }
 0x857   :  { %v3438_v2 = vpop.f32.mrb[163].mxu1 }
 0x859   :  { %3577 = vrot.lane.b32.xlu0 %v3359_v28, %s6076_s26 }
 0x85c   :  { %v5189_v60 = vpop.f32.mrb[164].mxu1 }
 0x85d   :  { %3583 = vrot.lane.b32.xlu1 %v5189_v60, %s6076_s26  ;;  %v3448_v44 = vpop.f32.mrb[165].mxu1 }
 0x85e   :  { %v5190_v17 = vpop.f32.mrb[166].mxu1 }
 0x85f   :  { %v3451_v34 = vpop.f32.mrb[167].mxu1 }
 0x861   :  { %3587 = vrot.lane.b32.xlu1 %v5190_v17, %s6076_s26 }
 0x864   :  { %v5193_v58 = vpop.f32.mrb[168].mxu1 }
 0x865   :  { %3599 = vrot.lane.b32.xlu1 %v5193_v58, %s6076_s26  ;;  %v3464_v32 = vpop.f32.mrb[169].mxu1 }
 0x866   :  { %v5194_v62 = vpop.f32.mrb[170].mxu1 }
 0x867   :  { %v3467_v0 = vpop.f32.mrb[171].mxu1 }
 0x869   :  { %3591 = vrot.lane.b32.xlu1 %v3464_v32, %s6076_s26 }
 0x86c   :  { %v5197_v4 = vpop.f32.mrb[172].mxu1 }
 0x86d   :  { %3603 = vrot.lane.b32.xlu1 %v5194_v62, %s6076_s26  ;;  %v3480_v49 = vpop.f32.mrb[173].mxu1 }
 0x86e   :  { %v5198_v18 = vpop.f32.mrb[174].mxu1 }
 0x86f   :  { %v3482_v48 = vpop.f32.mrb[175].mxu1  ;;  %v3516_v53 = vpop.permute.xlu0 %3515 }
 0x870   :  { %v3518_v43 = vpop.permute.xlu1 %3517 }
 0x871   :  { %3595 = vrot.lane.b32.xlu1 %v3467_v0, %s6076_s26  ;;  %v3541_v9 = vsel %vm2015_vm6, %v3516_v53, %v3518_v43 }
 0x873   :  { %v3520_v57 = vpop.permute.xlu0 %3519 }
 0x874   :  { %v3522_v41 = vpop.permute.xlu1 %3521 }
 0x875   :  { %3509 = vrot.lane.b32.xlu1 %v7726_v16, %s6080_s5  ;;  %v3542_v37 = vsel %vm2015_vm6, %v3520_v57, %v3522_v41 }
 0x876   :  { %v3558_v5 = vadd.f32 %v3542_v37, %v7728_v10  ;;  %v3557_v10 = vadd.f32 %v3541_v9, %v7724_v25 }
 0x879   :  { %3513 = vrot.lane.b32.xlu1 %v7730_v45, %s6080_s5 }
 0x87d   :  { %3575 = vrot.lane.b32.xlu1 %v3448_v44, %s6076_s26 }
 0x881   :  { %3579 = vrot.lane.b32.xlu1 %v3451_v34, %s6076_s26 }
 0x88f   :  { %v3524_v27 = vpop.permute.xlu0 %3523 }
 0x890   :  { %v3526_v29 = vpop.permute.xlu1 %3525 }
 0x891   :  { %v3543_v36 = vsel %vm2015_vm6, %v3524_v27, %v3526_v29 }
 0x892   :  { %v3559_v61 = vadd.f32 %v3543_v36, %v7732_v47 }
 0x893   :  { %v3582_v24 = vpop.permute.xlu0 %3581 }
 0x894   :  { %v3530_v59 = vpop.permute.xlu1 %3529 }
 0x897   :  { %v3528_v46 = vpop.permute.xlu0 %3527 }
 0x898   :  { %v3544_v35 = vsel %vm2015_vm6, %v3528_v46, %v3530_v59  ;;  %v5903_v59 = vld [vmem:[%s8133_s7 + $0x28] sm:$0xff]  }
 0x899   :  { %v3560_v44 = vadd.f32 %v3544_v35, %v7737_v1  ;;  %5204 = vmatpush3.bf16.msra.mxu1 %v5903_v59  ;;  %v5904_v59 = vld [vmem:[%s8133_s7] sm:$0xff]  }
 0x89a   :  { %5209 = vmatprep.subr.bf16.mxu1 %v6081_v14 }
 0x89b   :  { %v3586_v8 = vpop.permute.xlu0 %3585 }
 0x8a7   :  { %v3532_v12 = vpop.permute.xlu0 %3531 }
 0x8a8   :  { %v3534_v33 = vpop.permute.xlu1 %3533 }
 0x8a9   :  { %v3545_v11 = vsel %vm2015_vm6, %v3532_v12, %v3534_v33 }
 0x8aa   :  { %v3561_v31 = vadd.f32 %v3545_v11, %v7742_v19 }
 0x8ab   :  { %v3590_v52 = vpop.permute.xlu0 %3589 }
 0x8ac   :  { %v3538_v3 = vpop.permute.xlu1 %3537 }
 0x8af   :  { %v3536_v21 = vpop.permute.xlu0 %3535 }
 0x8b0   :  { %v3546_v50 = vsel %vm2015_vm6, %v3536_v21, %v3538_v3 }
 0x8b1   :  { %v3562_v19 = vadd.f32 %v3546_v50, %v7747_v20 }
 0x8b3   :  { %v3594_v16 = vpop.permute.xlu0 %3593 }
 0x8b7   :  { %v3598_v28 = vpop.permute.xlu0 %3597 }
 0x8bb   :  { %v3602_v51 = vpop.permute.xlu0 %3601 }
 0x8bf   :  { %v3508_v40 = vpop.permute.xlu0 %3507 }
 0x8c3   :  { %v3512_v48 = vpop.permute.xlu0 %3511 }
 0x8c7   :  { %v3574_v29 = vpop.permute.xlu0 %3573 }
 0x8cf   :  { %v3584_v45 = vpop.permute.xlu1 %3583 }
 0x8d0   :  { %v3607_v2 = vsel %vm2627_vm9, %v3582_v24, %v3584_v45 }
 0x8d1   :  { %v3623_v32 = vadd.f32 %v3607_v2, %v3557_v10 }
 0x8d3   :  { %v3588_v13 = vpop.permute.xlu1 %3587  ;;  %v7822_v57 = vadd.f32 %v5069_v30, %v3623_v32 }
 0x8d4   :  { %v3608_v39 = vsel %vm2627_vm9, %v3586_v8, %v3588_v13  ;;  %v3578_v13 = vpop.permute.xlu0 %3577 }
 0x8d5   :  { %v3624_v17 = vadd.f32 %v3608_v39, %v3558_v5  ;;  %v3646_v12 = vmax.f32 %v7822_v57, 0.0 }
 0x8d7   :  { %v3600_v22 = vpop.permute.xlu1 %3599  ;;  %v7818_v63 = vadd.f32 %v5069_v30, %v3624_v17 }
 0x8d8   :  { %v3611_v55 = vsel %vm2627_vm9, %v3598_v28, %v3600_v22 }
 0x8d9   :  { %v3627_v42 = vadd.f32 %v3611_v55, %v3561_v31  ;;  %v3647_v43 = vmax.f32 %v7818_v63, 0.0 }
 0x8db   :  { %v3592_v7 = vpop.permute.xlu1 %3591  ;;  %v7806_v47 = vadd.f32 %v5069_v30, %v3627_v42  ;;  %v5780_v21 = vpack.i.bf16 %v3647_v43, %v3646_v12 }
 0x8dc   :  { %v3609_v56 = vsel %vm2627_vm9, %v3590_v52, %v3592_v7 }
 0x8dd   :  { %v3625_v20 = vadd.f32 %v3609_v56, %v3559_v61  ;;  %v3650_v0 = vmax.f32 %v7806_v47, 0.0 }
 0x8df   :  { %v3604_v23 = vpop.permute.xlu1 %3603  ;;  %v7815_v4 = vadd.f32 %v5069_v30, %v3625_v20 }
 0x8e0   :  { %v3612_v6 = vsel %vm2627_vm9, %v3602_v51, %v3604_v23 }
 0x8e1   :  { %v3628_v60 = vadd.f32 %v3612_v6, %v3562_v19  ;;  %v3648_v27 = vmax.f32 %v7815_v4, 0.0 }
 0x8e3   :  { %v7811_v34 = vadd.f32 %v5069_v30, %v3628_v60  ;;  %v3596_v58 = vpop.permute.xlu1 %3595 }
 0x8e4   :  { %v3610_v62 = vsel %vm2627_vm9, %v3594_v16, %v3596_v58 }
 0x8e5   :  { %v3651_v49 = vmax.f32 %v7811_v34, 0.0  ;;  %v3626_v18 = vadd.f32 %v3610_v62, %v3560_v44 }
 0x8e7   :  { %v3641_v25 = vadd.f32 %v5069_v30, %v3626_v18  ;;  %v3510_v53 = vpop.permute.xlu1 %3509  ;;  %v5755_v1 = vpack.i.bf16 %v3651_v49, %v3650_v0 }
 0x8e8   :  { %v3539_v8 = vsel %vm2015_vm6, %v3508_v40, %v3510_v53 }
 0x8e9   :  { %v3649_v24 = vmax.f32 %v3641_v25, 0.0  ;;  %5756 = vrot.lane.b32.xlu1 %v5755_v1, %s6082_s6  ;;  %v3555_v52 = vadd.f32 %v3539_v8, %v7701_v38 }
 0x8eb   :  { %v3514_v46 = vpop.permute.xlu1 %3513  ;;  %v5765_v41 = vpack.i.bf16 %v3649_v24, %v3648_v27 }
 0x8ec   :  { %v3540_v3 = vsel %vm2015_vm6, %v3512_v48, %v3514_v46 }
 0x8ed   :  { %5761 = vrot.lane.b32.xlu1 %v5755_v1, %s6083_s24  ;;  %5766 = vrot.lane.b32.xlu0 %v5765_v41, %s6082_s6  ;;  %v3556_v38 = vadd.f32 %v3540_v3, %v7703_v26 }
 0x8ef   :  { %v3576_v33 = vpop.permute.xlu1 %3575 }
 0x8f0   :  { %v3605_v16 = vsel %vm2627_vm9, %v3574_v29, %v3576_v33 }
 0x8f1   :  { %v3621_v45 = vadd.f32 %v3605_v16, %v3555_v52  ;;  %5781 = vrot.lane.b32.xlu1 %v5780_v21, %s6083_s24  ;;  %5771 = vrot.lane.b32.xlu0 %v5765_v41, %s6083_s24 }
 0x8f3   :  { %v3580_v28 = vpop.permute.xlu1 %3579  ;;  %v3636_v11 = vadd.f32 %v5069_v30, %v3621_v45 }
 0x8f4   :  { %v3606_v22 = vsel %vm2627_vm9, %v3578_v13, %v3580_v28  ;;  %v5905_v13 = vld [vmem:[%s8133_s7 + $0x8] sm:$0xff]  }
 0x8f5   :  { %v3622_v55 = vadd.f32 %v3606_v22, %v3556_v38  ;;  %5776 = vrot.lane.b32.xlu0 %v5780_v21, %s6082_s6  ;;  %v3644_v51 = vmax.f32 %v3636_v11, 0.0  ;;  %v5906_v22 = vld [vmem:[%s8133_s7 + $0x10] sm:$0xff]  }
 0x8f7   :  { %v3637_v31 = vadd.f32 %v5069_v30, %v3622_v55 }
 0x8f9   :  { %v3645_v7 = vmax.f32 %v3637_v31, 0.0  ;;  %v5909_v31 = vld [vmem:[%s8135_s9 + $0x4] ss:$8 sps:$4 sm:$0xff]  }
 0x8fb   :  { %v5790_v36 = vpack.i.bf16 %v3645_v7, %v3644_v51 }
 0x8fd   :  { %5791 = vrot.lane.b32.xlu1 %v5790_v36, %s6083_s24  ;;  %5786 = vrot.lane.b32.xlu0 %v5790_v36, %s6082_s6  ;;  %v5912_v36 = vld [vmem:[%s8135_s9 + $0x14] ss:$8 sps:$4 sm:$0xff]  }
 0x95b   :  { %v5757_v50 = vpop.permute.xlu1 %5756 }
 0x95c   :  { %v5759_v56 = vunpack.i.h.bf16 %v5757_v50  ;;  %v5758_v54 = vunpack.i.l.bf16 %v5757_v50  ;;  %v5910_v50 = vld [vmem:[%s8135_s9 + $0x10] ss:$8 sps:$4 sm:$0xff]  }
 0x95e   :  { %v3724_v39 = vmax.f32 %v3651_v49, %v5759_v56  ;;  %v3723_v6 = vmax.f32 %v3650_v0, %v5758_v54  ;;  %v5918_v56 = vld [vmem:[%s8135_s9 + $0x34] ss:$8 sps:$4 sm:$0xff]   ;;  %v5916_v54 = vld [vmem:[%s8135_s9 + $0x30] ss:$8 sps:$4 sm:$0xff]  }
 0x95f   :  { %v5767_v37 = vpop.permute.xlu0 %5766  ;;  %v5762_v42 = vpop.permute.xlu1 %5761 }
 0x960   :  { %v5769_v26 = vunpack.i.h.bf16 %v5767_v37  ;;  %v5768_v9 = vunpack.i.l.bf16 %v5767_v37  ;;  %v5764_v61 = vunpack.i.h.bf16 %v5762_v42  ;;  %v5763_v19 = vunpack.i.l.bf16 %v5762_v42  ;;  %v5915_v37 = vld [vmem:[%s8135_s9 + $0x24] ss:$8 sps:$4 sm:$0xff]   ;;  %v5913_v42 = vld [vmem:[%s8135_s9 + $0x20] ss:$8 sps:$4 sm:$0xff]  }
 0x962   :  { %v3722_v40 = vmax.f32 %v3649_v24, %v5769_v26  ;;  %v3721_v2 = vmax.f32 %v3648_v27, %v5768_v9  ;;  %v3692_v10 = vsel %vm3684_vm1, 0.0, %v5764_v61  ;;  %v3691_v44 = vsel %vm3684_vm1, 0.0, %v5763_v19  ;;  %v5919_v26 = vld [vmem:[%s8135_s9 + $0x40] ss:$8 sps:$4 sm:$0xff]   ;;  %v5921_v9 = vld [vmem:[%s8135_s9 + $0x44] ss:$8 sps:$4 sm:$0xff]  }
 0x963   :  { %v5772_v23 = vpop.permute.xlu0 %5771  ;;  %v5782_v30 = vpop.permute.xlu1 %5781  ;;  %v3731_v18 = vmax.f32 %v3723_v6, %v3691_v44  ;;  %v3732_v47 = vmax.f32 %v3724_v39, %v3692_v10  ;;  %v5924_v61 = vld [vmem:[%s8135_s9 + $0x54] ss:$8 sps:$4 sm:$0xff]   ;;  %v5922_v19 = vld [vmem:[%s8135_s9 + $0x50] ss:$8 sps:$4 sm:$0xff]   ;;  %v7924_v39 = vld [vmem:[%s8136_s10 + $0x4] ss:$8 sps:$4 sm:$0xff]  }
 0x964   :  { %v5774_v5 = vunpack.i.h.bf16 %v5772_v23  ;;  %v5773_v35 = vunpack.i.l.bf16 %v5772_v23  ;;  %v5784_v17 = vunpack.i.h.bf16 %v5782_v30  ;;  %v5783_v34 = vunpack.i.l.bf16 %v5782_v30  ;;  %v5927_v23 = vld [vmem:[%s8135_s9 + $0x64] ss:$8 sps:$4 sm:$0xff]   ;;  %v5928_v30 = vld [vmem:[%s8135_s9 + $0x70] ss:$8 sps:$4 sm:$0xff]   ;;  %v5084_v10 = vld [vmem:[%s8134_s8] ss:$0 sm:$0xff] }
 0x966   :  { %v3690_v20 = vsel %vm3684_vm1, 0.0, %v5774_v5  ;;  %v3689_v60 = vsel %vm3684_vm1, 0.0, %v5773_v35  ;;  %v3688_v25 = vsel %vm3684_vm1, 0.0, %v5784_v17  ;;  %v3687_v53 = vsel %vm3684_vm1, 0.0, %v5783_v34  ;;  %v5925_v5 = vld [vmem:[%s8135_s9 + $0x60] ss:$8 sps:$4 sm:$0xff]  }
 0x967   :  { %v5777_v58 = vpop.permute.xlu0 %5776  ;;  %v3729_v32 = vmax.f32 %v3721_v2, %v3689_v60  ;;  %v3730_v62 = vmax.f32 %v3722_v40, %v3690_v20  ;;  %v5930_v35 = vld [vmem:[%s8135_s9 + $0x74] ss:$8 sps:$4 sm:$0xff]  }
 0x968   :  { %v5779_v4 = vunpack.i.h.bf16 %v5777_v58  ;;  %v5778_v49 = vunpack.i.l.bf16 %v5777_v58 }
 0x969   :  { %v3735_v1 = vmax.f32 %v3729_v32, %v3731_v18  ;;  %v3736_v57 = vmax.f32 %v3730_v62, %v3732_v47  ;;  %v7933_v47 = vld [vmem:[%s8136_s10] ss:$8 sps:$4 sm:$0xff]  }
 0x96a   :  { %v3720_v0 = vmax.f32 %v3647_v43, %v5779_v4  ;;  %v3719_v48 = vmax.f32 %v3646_v12, %v5778_v49 }
 0x96c   :  { %v3727_v27 = vmax.f32 %v3719_v48, %v3687_v53  ;;  %v3728_v24 = vmax.f32 %v3720_v0, %v3688_v25  ;;  %v7938_v48 = vld [vmem:[%s8136_s10 + $0x14] ss:$8 sps:$4 sm:$0xff]   ;;  %v7944_v25 = vld [vmem:[%s8136_s10 + $0x10] ss:$8 sps:$4 sm:$0xff]   ;;  %v7951_v53 = vld [vmem:[%s8136_s10 + $0x24] ss:$8 sps:$4 sm:$0xff]  }
 0x96e   :  { %v3737_v46 = vmax.f32 %v3735_v1, %v3727_v27  ;;  %v3738_v41 = vmax.f32 %v3736_v57, %v3728_v24  ;;  %v7957_v1 = vld [vmem:[%s8136_s10 + $0x20] ss:$8 sps:$4 sm:$0xff]   ;;  %v7963_v57 = vld [vmem:[%s8136_s10 + $0x34] ss:$8 sps:$4 sm:$0xff]  }
 0x96f   :  { %v5787_v8 = vpop.permute.xlu0 %5786  ;;  %v5792_v29 = vpop.permute.xlu1 %5791 }
 0x970   :  { %v3746_v52 = vpack.c.bf16 %v3738_v41, %v3737_v46  ;;  %v5789_v63 = vunpack.i.h.bf16 %v5787_v8  ;;  %v5788_v43 = vunpack.i.l.bf16 %v5787_v8  ;;  %v5794_v12 = vunpack.i.h.bf16 %v5792_v29  ;;  %v8155_v41 = vld [vmem:[#allocation5_spill] sm:$0xff] }
 0x971   :  { %v5793_v33 = vunpack.i.l.bf16 %v5792_v29 }
 0x972   :  { %v3718_v21 = vmax.f32 %v3645_v7, %v5789_v63  ;;  %v3717_v3 = vmax.f32 %v3644_v51, %v5788_v43  ;;  %v3686_v16 = vsel %vm3684_vm1, 0.0, %v5794_v12  ;;  %5206 = vmatmul.mubr.msk.bf16.vlgmr.msra.gmra.mrb[176].mxu1 %vm2994_vm11, %v3746_v52  ;;  %v5907_v51 = vld [vmem:[%s8135_s9] ss:$8 sps:$4 sm:$0xff]  }
 0x973   :  { %v3685_v45 = vsel %vm3684_vm1, 0.0, %v5793_v33  ;;  %5210 = vmatpush3.bf16.msra.mxu1 %v5904_v59  ;;  %5215 = vmatprep.mubr.msk.bf16.mxu1 %vm6084_vm0, %v6081_v14  ;;  %v8156_v59 = vld [vmem:[#allocation6_spill] sm:$0xff] }
 0x974   :  { %v3726_v38 = vmax.f32 %v3718_v21, %v3686_v16  ;;  %v3725_v28 = vmax.f32 %v3717_v3, %v3685_v45  ;;  %5211 = vmatprep.subr.bf16.mxu1 %v6081_v14 }
 0x976   :  { %v3733_v11 = vmax.f32 %v3725_v28, %v3727_v27  ;;  %v3734_v55 = vmax.f32 %v3726_v38, %v3728_v24  ;;  %v7969_v27 = vld [vmem:[%s8136_s10 + $0x30] ss:$8 sps:$4 sm:$0xff]   ;;  %v3906_v24 = vld [vmem:[%s8137_s11] sm:$0x3] }
 0x977   :  { %5212 = vmatpush3.bf16.msra.mxu1 %v5905_v13  ;;  %v3911_v8 = vrot.slane %v3906_v24, %v8155_v41  ;;  %v3915_v52 = vrot.slane %v3906_v24, %v8156_v59 }
 0x978   :  { %5213 = vmatprep.subr.bf16.mxu1 %v6081_v14  ;;  %v3739_v7 = vpack.c.bf16 %v3734_v55, %v3733_v11 }
 0x97b   :  { %5214 = vmatpush3.bf16.msra.mxu1 %v5906_v22 }
 0x97c   :  { %3998 = vmatprep.subr.bf16.mxu1 %v5909_v31 }
 0x97e   :  { %5216 = vmatmul.mubr.msk.bf16.vlgmr.msra.gmra.mrb[180].mxu1 %vm2994_vm11, %v3739_v7 }
 0x97f   :  { %3999 = vmatpush1.bf16.msra.mxu1 %v5907_v51  ;;  %4030 = vmatprep.mubr.bf16.mxu1 %v8154_v15 }
 0x980   :  { %4000 = vmatprep.subr.bf16.mxu1 %v5912_v36 }
 0x983   :  { %4001 = vmatpush1.bf16.msra.mxu1 %v5910_v50 }
 0x984   :  { %4002 = vmatprep.subr.bf16.mxu1 %v5915_v37 }
 0x987   :  { %4003 = vmatpush1.bf16.msra.mxu1 %v5913_v42 }
 0x988   :  { %4004 = vmatprep.subr.bf16.mxu1 %v5918_v56 }
 0x98b   :  { %4005 = vmatpush1.bf16.msra.mxu1 %v5916_v54 }
 0x98c   :  { %4006 = vmatprep.subr.bf16.mxu1 %v5921_v9 }
 0x98f   :  { %4007 = vmatpush1.bf16.msra.mxu1 %v5919_v26 }
 0x990   :  { %4008 = vmatprep.subr.bf16.mxu1 %v5924_v61 }
 0x993   :  { %4009 = vmatpush1.bf16.msra.mxu1 %v5922_v19 }
 0x994   :  { %4010 = vmatprep.subr.bf16.mxu1 %v5927_v23 }
 0x997   :  { %4011 = vmatpush1.bf16.msra.mxu1 %v5925_v5 }
 0x998   :  { %4012 = vmatprep.subr.bf16.mxu1 %v5930_v35 }
 0x99b   :  { %4013 = vmatpush1.bf16.msra.mxu1 %v5928_v30 }
 0x99c   :  { %4092 = vmatprep.subr.bf16.mxu1 %v7924_v39 }
 0xa45   :  { %v3809_v6 = vpop.f32.mrb[176].mxu1 }
 0xa46   :  { %v5207_v40 = vpop.f32.mrb[177].mxu1 }
 0xa47   :  { %v3812_v2 = vpop.f32.mrb[178].mxu1 }
 0xa48   :  { %v5208_v20 = vpop.f32.mrb[179].mxu1 }
 0xa51   :  { %v3871_v60 = vpop.f32.mrb[180].mxu1 }
 0xa52   :  { %v3872_v44 = vadd.f32 %v3871_v60, %v3809_v6  ;;  %v5217_v17 = vpop.f32.mrb[181].mxu1 }
 0xa53   :  { %v3874_v34 = vpop.f32.mrb[182].mxu1 }
 0xa54   :  { %v3885_v58 = vadd.f32 %v5084_v10, %v3872_v44  ;;  %v3875_v32 = vadd.f32 %v3874_v34, %v3812_v2  ;;  %v5218_v62 = vpop.f32.mrb[183].mxu1 }
 0xa56   :  { %v3886_v4 = vadd.f32 %v5084_v10, %v3875_v32  ;;  %v3887_v49 = vmax.f32 %v3885_v58, 0.0 }
 0xa58   :  { %v3888_v18 = vmax.f32 %v3886_v4, 0.0 }
 0xa5a   :  { %v3889_v0 = vpack.c.bf16 %v3888_v18, %v3887_v49 }
 0xa5c   :  { %4031 = vmatmul.mubr.bf16.vlgmr.msra.gmra.mrb[184].mxu1 %v3889_v0 }
 0xa5d   :  { %4093 = vmatpush1.bf16.msra.mxu1 %v7933_v47  ;;  %4124 = vmatprep.mubr.bf16.mxu1 %v8154_v15 }
 0xa5e   :  { %4094 = vmatprep.subr.bf16.mxu1 %v7938_v48 }
 0xa61   :  { %4095 = vmatpush1.bf16.msra.mxu1 %v7944_v25 }
 0xa62   :  { %4096 = vmatprep.subr.bf16.mxu1 %v7951_v53 }
 0xa65   :  { %4097 = vmatpush1.bf16.msra.mxu1 %v7957_v1 }
 0xa66   :  { %4098 = vmatprep.subr.bf16.mxu1 %v7963_v57 }
 0xa69   :  { %4099 = vmatpush1.bf16.msra.mxu1 %v7969_v27 }
 0xa6a   :  { %4164 = vmatprep.subr.bf16.mxu1 %v7924_v39 }
 0xa6c   :  { %4125 = vmatmul.mubr.bf16.vlgmr.msra.gmra.mrb[188].mxu1 %v8154_v15 }
 0xa6d   :  { %4165 = vmatpush1.bf16.msra.mxu1 %v7933_v47  ;;  %4196 = vmatprep.mubr.bf16.mxu1 %v8154_v15 }
 0xa6e   :  { %4166 = vmatprep.subr.bf16.mxu1 %v7938_v48 }
 0xa71   :  { %4167 = vmatpush1.bf16.msra.mxu1 %v7944_v25 }
 0xa72   :  { %4168 = vmatprep.subr.bf16.mxu1 %v7951_v53 }
 0xa75   :  { %4169 = vmatpush1.bf16.msra.mxu1 %v7957_v1 }
 0xa76   :  { %4170 = vmatprep.subr.bf16.mxu1 %v7963_v57 }
 0xa79   :  { %4171 = vmatpush1.bf16.msra.mxu1 %v7969_v27 }
 0xa7a   :  { %4246 = vmatprep.subr.bf16.mxu1 %v7924_v39 }
 0xb2f   :  { %v4032_v46 = vpop.f32.mrb[184].mxu1 }
 0xb30   :  { %v4034_v29 = vpop.f32.mrb[185].mxu1  ;;  %v7993_v21 = vadd.f32 %v4032_v46, %v3911_v8 }
 0xb31   :  { %v4036_v63 = vpop.f32.mrb[186].mxu1  ;;  %v7996_v22 = vadd.f32 %v4034_v29, %v3915_v52 }
 0xb32   :  { %v7989_v43 = vadd.f32 %v4036_v63, %v3911_v8  ;;  %v4038_v12 = vpop.f32.mrb[187].mxu1 }
 0xb33   :  { %v7991_v33 = vadd.f32 %v4038_v12, %v3915_v52 }
 0xb3f   :  { %v4126_v3 = vpop.f32.mrb[188].mxu1 }
 0xb40   :  { %v4133_v16 = vadd.f32 %v4126_v3, %v7993_v21  ;;  %v4128_v45 = vpop.f32.mrb[189].mxu1 }
 0xb41   :  { %v4130_v13 = vpop.f32.mrb[190].mxu1  ;;  %v4134_v11 = vadd.f32 %v4128_v45, %v7996_v22 }
 0xb42   :  { %v5109_v38 = vmul.f32 -1.442695, %v4133_v16  ;;  %v4131_v28 = vpop.f32.mrb[191].mxu1 }
 0xb43   :  { %v5110_v50 = vmul.f32 -1.442695, %v4134_v11 }
 0xb44   :  { %5947 = vpow2.f32 %v5109_v38 }
 0xb45   :  { %5949 = vtanh.f32 %v4134_v11 }
 0xb4e   :  { %v5948_v55 = vpop.eup %5947 }
 0xb4f   :  { %v4138_v31 = vadd.f32 1.0, %v5948_v55  ;;  %v5950_v51 = vpop.eup %5949 }
 0xb51   :  { %5951 = vrcp.f32 %v4138_v31 }
 0xb52   :  { %5953 = vpow2.f32 %v5110_v50 }
 0xb5b   :  { %v5952_v7 = vpop.eup %5951 }
 0xb5c   :  { %v4149_v36 = vmul.f32 %v5952_v7, %v5950_v51  ;;  %v5954_v37 = vpop.eup %5953  ;;  %v4148_v56 = vmul.f32 0.0, %v5952_v7 }
 0xb5d   :  { %v4145_v42 = vadd.f32 1.0, %v5954_v37 }
 0xb5e   :  { %4151 = vrot.lane.b32.xlu0 %v4149_v36, %s6076_s26 }
 0xb5f   :  { %5955 = vrcp.f32 %v4145_v42 }
 0xb69   :  { %v5956_v9 = vpop.eup %5955 }
 0xbd0   :  { %v4152_v54 = vpop.permute.xlu0 %4151 }
 0xbd1   :  { %v4154_v26 = vadd.f32 %v4152_v54, %v4148_v56 }
 0xbd3   :  { %5957 = vtanh.f32 %v4154_v26  ;;  %v4227_v32 = vrot.slane %v4154_v26, 6 }
 0xbdd   :  { %v5958_v61 = vpop.eup %5957 }
 0xbde   :  { %v4156_v19 = vmul.f32 %v5958_v61, %v5956_v9 }
 0xbe0   :  { %v4157_v23 = vpack.c.bf16 %v4156_v19, %v4156_v19 }
 0xbe2   :  { %4159 = vrot.lane.b32.xlu1 %v4157_v23, %s6076_s26 }
 0xc54   :  { %v4160_v5 = vpop.permute.xlu1 %4159 }
 0xc55   :  { %5111 = vmatmul.mubr.msk.bf16.vlgmr.msra.gmra.mrb[192].mxu1 %vm2627_vm9, %v4160_v5 }
 0xc56   :  { %4247 = vmatpush1.bf16.msra.mxu1 %v7933_v47  ;;  %4278 = vmatprep.mubr.bf16.mxu1 %v8154_v15 }
 0xc57   :  { %4248 = vmatprep.subr.bf16.mxu1 %v7938_v48 }
 0xc5a   :  { %4249 = vmatpush1.bf16.msra.mxu1 %v7944_v25 }
 0xc5b   :  { %4250 = vmatprep.subr.bf16.mxu1 %v7951_v53 }
 0xc5e   :  { %4251 = vmatpush1.bf16.msra.mxu1 %v7957_v1 }
 0xc5f   :  { %4252 = vmatprep.subr.bf16.mxu1 %v7963_v57 }
 0xc62   :  { %4253 = vmatpush1.bf16.msra.mxu1 %v7969_v27 }
 0xc63   :  { %4328 = vmatprep.subr.bf16.mxu1 %v7924_v39 }
 0xd28   :  { %v4198_v35 = vpop.f32.mrb[192].mxu1 }
 0xd29   :  { %v4207_v30 = vrot.slane %v4198_v35, 6  ;;  %v4200_v6 = vpop.f32.mrb[193].mxu1 }
 0xd2a   :  { %v4202_v40 = vpop.f32.mrb[194].mxu1  ;;  %v4208_v10 = vrot.slane %v4200_v6, 6 }
 0xd2b   :  { %v4211_v2 = vadd.f32 %v4207_v30, %v7993_v21  ;;  %v4203_v20 = vpop.f32.mrb[195].mxu1 }
 0xd2c   :  { %v4212_v44 = vadd.f32 %v4208_v10, %v7996_v22 }
 0xd2d   :  { %v5112_v60 = vmul.f32 -1.442695, %v4211_v2 }
 0xd2e   :  { %v5113_v18 = vmul.f32 -1.442695, %v4212_v44 }
 0xd2f   :  { %5959 = vpow2.f32 %v5112_v60 }
 0xd30   :  { %5961 = vtanh.f32 %v4212_v44 }
 0xd39   :  { %v5960_v17 = vpop.eup %5959 }
 0xd3a   :  { %v4216_v34 = vadd.f32 1.0, %v5960_v17  ;;  %v5962_v58 = vpop.eup %5961 }
 0xd3c   :  { %5963 = vrcp.f32 %v4216_v34 }
 0xd3d   :  { %5965 = vpow2.f32 %v5113_v18 }
 0xd46   :  { %v5964_v62 = vpop.eup %5963 }
 0xd47   :  { %v4230_v4 = vmul.f32 %v5964_v62, %v5962_v58  ;;  %v4229_v49 = vmul.f32 %v5964_v62, %v4227_v32  ;;  %v5966_v0 = vpop.eup %5965 }
 0xd48   :  { %v4223_v24 = vadd.f32 1.0, %v5966_v0 }
 0xd49   :  { %4232 = vrot.lane.b32.xlu0 %v4230_v4, %s6076_s26 }
 0xd4a   :  { %5967 = vrcp.f32 %v4223_v24 }
 0xd54   :  { %v5968_v8 = vpop.eup %5967 }
 0xdbb   :  { %v4233_v46 = vpop.permute.xlu0 %4232 }
 0xdbc   :  { %v4235_v41 = vadd.f32 %v4233_v46, %v4229_v49 }
 0xdbe   :  { %5969 = vtanh.f32 %v4235_v41  ;;  %v4309_v50 = vrot.slane %v4235_v41, 6 }
 0xdc8   :  { %v5970_v29 = vpop.eup %5969 }
 0xdc9   :  { %v4237_v59 = vmul.f32 %v5970_v29, %v5968_v8 }
 0xdcb   :  { %v4238_v52 = vpack.c.bf16 %v4237_v59, %v4237_v59 }
 0xdcd   :  { %v4240_v63 = vrot.slane %v4238_v52, 1 }
 0xdcf   :  { %4241 = vrot.lane.b32.xlu1 %v4240_v63, %s6076_s26 }
 0xe41   :  { %v4242_v12 = vpop.permute.xlu1 %4241 }
 0xe42   :  { %5114 = vmatmul.mubr.msk.bf16.vlgmr.msra.gmra.mrb[196].mxu1 %vm2627_vm9, %v4242_v12 }
 0xe43   :  { %4329 = vmatpush1.bf16.msra.mxu1 %v7933_v47  ;;  %4360 = vmatprep.mubr.bf16.mxu1 %v8154_v15 }
 0xe44   :  { %4330 = vmatprep.subr.bf16.mxu1 %v7938_v48 }
 0xe47   :  { %4331 = vmatpush1.bf16.msra.mxu1 %v7944_v25 }
 0xe48   :  { %4332 = vmatprep.subr.bf16.mxu1 %v7951_v53 }
 0xe4b   :  { %4333 = vmatpush1.bf16.msra.mxu1 %v7957_v1 }
 0xe4c   :  { %4334 = vmatprep.subr.bf16.mxu1 %v7963_v57 }
 0xe4f   :  { %4335 = vmatpush1.bf16.msra.mxu1 %v7969_v27 }
 0xe50   :  { %4410 = vmatprep.subr.bf16.mxu1 %v7924_v39 }
 0xf15   :  { %v4280_v3 = vpop.f32.mrb[196].mxu1 }
 0xf16   :  { %v4289_v16 = vrot.slane %v4280_v3, 4  ;;  %v4282_v45 = vpop.f32.mrb[197].mxu1 }
 0xf17   :  { %v4284_v13 = vpop.f32.mrb[198].mxu1  ;;  %v4290_v55 = vrot.slane %v4282_v45, 4 }
 0xf18   :  { %v4293_v38 = vadd.f32 %v4289_v16, %v7993_v21  ;;  %v4285_v28 = vpop.f32.mrb[199].mxu1 }
 0xf19   :  { %v4294_v31 = vadd.f32 %v4290_v55, %v7996_v22 }
 0xf1a   :  { %v5115_v11 = vmul.f32 -1.442695, %v4293_v38 }
 0xf1b   :  { %v5116_v54 = vmul.f32 -1.442695, %v4294_v31 }
 0xf1c   :  { %5971 = vpow2.f32 %v5115_v11 }
 0xf1d   :  { %5973 = vtanh.f32 %v4294_v31 }
 0xf26   :  { %v5972_v51 = vpop.eup %5971 }
 0xf27   :  { %v4298_v7 = vadd.f32 1.0, %v5972_v51  ;;  %v5974_v36 = vpop.eup %5973 }
 0xf29   :  { %5975 = vrcp.f32 %v4298_v7 }
 0xf2a   :  { %5977 = vpow2.f32 %v5116_v54 }
 0xf33   :  { %v5976_v37 = vpop.eup %5975 }
 0xf34   :  { %v4312_v42 = vmul.f32 %v5976_v37, %v5974_v36  ;;  %v4311_v56 = vmul.f32 %v5976_v37, %v4309_v50  ;;  %v5978_v26 = vpop.eup %5977 }
 0xf35   :  { %v4305_v9 = vadd.f32 1.0, %v5978_v26 }
 0xf36   :  { %4314 = vrot.lane.b32.xlu0 %v4312_v42, %s6076_s26 }
 0xf37   :  { %5979 = vrcp.f32 %v4305_v9 }
 0xf41   :  { %v5980_v23 = vpop.eup %5979 }
 0xfa8   :  { %v4315_v61 = vpop.permute.xlu0 %4314 }
 0xfa9   :  { %v4317_v19 = vadd.f32 %v4315_v61, %v4311_v56 }
 0xfab   :  { %5981 = vtanh.f32 %v4317_v19  ;;  %v4391_v18 = vrot.slane %v4317_v19, 6 }
 0xfb5   :  { %v5982_v5 = vpop.eup %5981 }
 0xfb6   :  { %v4319_v35 = vmul.f32 %v5982_v5, %v5980_v23 }
 0xfb8   :  { %v4320_v30 = vpack.c.bf16 %v4319_v35, %v4319_v35 }
 0xfba   :  { %v4322_v6 = vrot.slane %v4320_v30, 2 }
 0xfbc   :  { %4323 = vrot.lane.b32.xlu1 %v4322_v6, %s6076_s26 }
0x102e   :  { %v4324_v40 = vpop.permute.xlu1 %4323 }
0x102f   :  { %5117 = vmatmul.mubr.msk.bf16.vlgmr.msra.gmra.mrb[200].mxu1 %vm2627_vm9, %v4324_v40 }
0x1030   :  { %4411 = vmatpush1.bf16.msra.mxu1 %v7933_v47  ;;  %4442 = vmatprep.mubr.bf16.mxu1 %v8154_v15 }
0x1031   :  { %4412 = vmatprep.subr.bf16.mxu1 %v7938_v48 }
0x1034   :  { %4413 = vmatpush1.bf16.msra.mxu1 %v7944_v25 }
0x1035   :  { %4414 = vmatprep.subr.bf16.mxu1 %v7951_v53 }
0x1038   :  { %4415 = vmatpush1.bf16.msra.mxu1 %v7957_v1 }
0x1039   :  { %4416 = vmatprep.subr.bf16.mxu1 %v7963_v57 }
0x103c   :  { %4417 = vmatpush1.bf16.msra.mxu1 %v7969_v27 }
0x103d   :  { %4485 = vmatprep.subr.bf16.mxu1 %v7924_v39 }
0x1102   :  { %v4362_v2 = vpop.f32.mrb[200].mxu1 }
0x1103   :  { %v4371_v20 = vrot.slane %v4362_v2, 2  ;;  %v4364_v60 = vpop.f32.mrb[201].mxu1 }
0x1104   :  { %v4366_v10 = vpop.f32.mrb[202].mxu1  ;;  %v4372_v58 = vrot.slane %v4364_v60, 2 }
0x1105   :  { %v4375_v44 = vadd.f32 %v4371_v20, %v7993_v21  ;;  %v4367_v17 = vpop.f32.mrb[203].mxu1 }
0x1106   :  { %v4376_v32 = vadd.f32 %v4372_v58, %v7996_v22 }
0x1107   :  { %v5118_v34 = vmul.f32 -1.442695, %v4375_v44 }
0x1108   :  { %v5119_v41 = vmul.f32 -1.442695, %v4376_v32 }
0x1109   :  { %5983 = vpow2.f32 %v5118_v34 }
0x110a   :  { %5985 = vtanh.f32 %v4376_v32 }
0x1113   :  { %v5984_v62 = vpop.eup %5983 }
0x1114   :  { %v4380_v4 = vadd.f32 1.0, %v5984_v62  ;;  %v5986_v49 = vpop.eup %5985 }
0x1116   :  { %5987 = vrcp.f32 %v4380_v4 }
0x1117   :  { %5989 = vpow2.f32 %v5119_v41 }
0x1120   :  { %v5988_v0 = vpop.eup %5987 }
0x1121   :  { %v4394_v24 = vmul.f32 %v5988_v0, %v5986_v49  ;;  %v4393_v46 = vmul.f32 %v5988_v0, %v4391_v18  ;;  %v5990_v21 = vpop.eup %5989 }
0x1122   :  { %v4387_v8 = vadd.f32 1.0, %v5990_v21 }
0x1123   :  { %4396 = vrot.lane.b32.xlu0 %v4394_v24, %s6076_s26 }
0x1124   :  { %5991 = vrcp.f32 %v4387_v8 }
0x112e   :  { %v5992_v22 = vpop.eup %5991 }
0x1195   :  { %v4397_v29 = vpop.permute.xlu0 %4396 }
0x1196   :  { %v4399_v59 = vadd.f32 %v4397_v29, %v4393_v46 }
0x1198   :  { %5993 = vtanh.f32 %v4399_v59  ;;  %v4467_v50 = vrot.slane %v4399_v59, 6 }
0x11a2   :  { %v5994_v52 = vpop.eup %5993 }
0x11a3   :  { %v4401_v63 = vmul.f32 %v5994_v52, %v5992_v22 }
0x11a5   :  { %v4402_v12 = vpack.c.bf16 %v4401_v63, %v4401_v63 }
0x11a7   :  { %v4404_v3 = vrot.slane %v4402_v12, 3 }
0x11a9   :  { %4405 = vrot.lane.b32.xlu1 %v4404_v3, %s6076_s26 }
0x121b   :  { %v4406_v16 = vpop.permute.xlu1 %4405 }
0x121c   :  { %5120 = vmatmul.mubr.msk.bf16.vlgmr.msra.gmra.mrb[204].mxu1 %vm2627_vm9, %v4406_v16 }
0x121d   :  { %4486 = vmatpush1.bf16.msra.mxu1 %v7933_v47  ;;  %4517 = vmatprep.mubr.bf16.mxu1 %v8154_v15 }
0x121e   :  { %4487 = vmatprep.subr.bf16.mxu1 %v7938_v48 }
0x1221   :  { %4488 = vmatpush1.bf16.msra.mxu1 %v7944_v25 }
0x1222   :  { %4489 = vmatprep.subr.bf16.mxu1 %v7951_v53 }
0x1225   :  { %4490 = vmatpush1.bf16.msra.mxu1 %v7957_v1 }
0x1226   :  { %4491 = vmatprep.subr.bf16.mxu1 %v7963_v57 }
0x1229   :  { %4492 = vmatpush1.bf16.msra.mxu1 %v7969_v27 }
0x122a   :  { %4567 = vmatprep.subr.bf16.mxu1 %v7924_v39 }
0x12ef   :  { %v4444_v45 = vpop.f32.mrb[204].mxu1 }
0x12f0   :  { %v4451_v13 = vadd.f32 %v4444_v45, %v7989_v43  ;;  %v4446_v38 = vpop.f32.mrb[205].mxu1 }
0x12f1   :  { %v4448_v28 = vpop.f32.mrb[206].mxu1  ;;  %v4452_v31 = vadd.f32 %v4446_v38, %v7991_v33 }
0x12f2   :  { %v5121_v11 = vmul.f32 -1.442695, %v4451_v13  ;;  %v4449_v55 = vpop.f32.mrb[207].mxu1 }
0x12f3   :  { %v5122_v54 = vmul.f32 -1.442695, %v4452_v31 }
0x12f4   :  { %5995 = vpow2.f32 %v5121_v11 }
0x12f5   :  { %5997 = vtanh.f32 %v4452_v31 }
0x12fe   :  { %v5996_v51 = vpop.eup %5995 }
0x12ff   :  { %v4456_v7 = vadd.f32 1.0, %v5996_v51  ;;  %v5998_v36 = vpop.eup %5997 }
0x1301   :  { %5999 = vrcp.f32 %v4456_v7 }
0x1302   :  { %6001 = vpow2.f32 %v5122_v54 }
0x130b   :  { %v6000_v37 = vpop.eup %5999 }
0x130c   :  { %v4470_v42 = vmul.f32 %v6000_v37, %v5998_v36  ;;  %v4469_v56 = vmul.f32 %v6000_v37, %v4467_v50  ;;  %v6002_v26 = vpop.eup %6001 }
0x130d   :  { %v4463_v9 = vadd.f32 1.0, %v6002_v26 }
0x130e   :  { %4472 = vrot.lane.b32.xlu0 %v4470_v42, %s6076_s26 }
0x130f   :  { %6003 = vrcp.f32 %v4463_v9 }
0x1319   :  { %v6004_v23 = vpop.eup %6003 }
0x1380   :  { %v4473_v61 = vpop.permute.xlu0 %4472 }
0x1381   :  { %v4475_v19 = vadd.f32 %v4473_v61, %v4469_v56 }
0x1383   :  { %6005 = vtanh.f32 %v4475_v19  ;;  %v4548_v49 = vrot.slane %v4475_v19, 6 }
0x138d   :  { %v6006_v5 = vpop.eup %6005 }
0x138e   :  { %v4477_v35 = vmul.f32 %v6006_v5, %v6004_v23 }
0x1390   :  { %v4478_v30 = vpack.c.bf16 %v4477_v35, %v4477_v35 }
0x1392   :  { %4480 = vrot.lane.b32.xlu1 %v4478_v30, %s6076_s26 }
0x1404   :  { %v4481_v6 = vpop.permute.xlu1 %4480 }
0x1405   :  { %5123 = vmatmul.mubr.msk.bf16.vlgmr.msra.gmra.mrb[208].mxu1 %vm2627_vm9, %v4481_v6 }
0x1406   :  { %4568 = vmatpush1.bf16.msra.mxu1 %v7933_v47  ;;  %4599 = vmatprep.mubr.bf16.mxu1 %v8154_v15 }
0x1407   :  { %4569 = vmatprep.subr.bf16.mxu1 %v7938_v48 }
0x140a   :  { %4570 = vmatpush1.bf16.msra.mxu1 %v7944_v25 }
0x140b   :  { %4571 = vmatprep.subr.bf16.mxu1 %v7951_v53 }
0x140e   :  { %4572 = vmatpush1.bf16.msra.mxu1 %v7957_v1 }
0x140f   :  { %4573 = vmatprep.subr.bf16.mxu1 %v7963_v57 }
0x1412   :  { %4574 = vmatpush1.bf16.msra.mxu1 %v7969_v27 }
0x1413   :  { %4649 = vmatprep.subr.bf16.mxu1 %v7924_v39 }
0x14d8   :  { %v4519_v40 = vpop.f32.mrb[208].mxu1 }
0x14d9   :  { %v4528_v2 = vrot.slane %v4519_v40, 6  ;;  %v4521_v20 = vpop.f32.mrb[209].mxu1 }
0x14da   :  { %v4523_v60 = vpop.f32.mrb[210].mxu1  ;;  %v4529_v34 = vrot.slane %v4521_v20, 6 }
0x14db   :  { %v4532_v10 = vadd.f32 %v4528_v2, %v7989_v43  ;;  %v4524_v44 = vpop.f32.mrb[211].mxu1 }
0x14dc   :  { %v4533_v58 = vadd.f32 %v4529_v34, %v7991_v33 }
0x14dd   :  { %v5124_v17 = vmul.f32 -1.442695, %v4532_v10 }
0x14de   :  { %v5125_v24 = vmul.f32 -1.442695, %v4533_v58 }
0x14df   :  { %6007 = vpow2.f32 %v5124_v17 }
0x14e0   :  { %6009 = vtanh.f32 %v4533_v58 }
0x14e9   :  { %v6008_v32 = vpop.eup %6007 }
0x14ea   :  { %v4537_v62 = vadd.f32 1.0, %v6008_v32  ;;  %v6010_v4 = vpop.eup %6009  ;;  %v5945_v32 = vld [vmem:[%s8138_s12 + $0x10] sm:$0xff]  }
0x14ec   :  { %6011 = vrcp.f32 %v4537_v62  ;;  %v5946_v62 = vld [vmem:[%s8138_s12 + $0x18] sm:$0xff]  }
0x14ed   :  { %6013 = vpow2.f32 %v5125_v24 }
0x14f6   :  { %v6012_v18 = vpop.eup %6011 }
0x14f7   :  { %v4551_v39 = vmul.f32 %v6012_v18, %v6010_v4  ;;  %v4550_v0 = vmul.f32 %v6012_v18, %v4548_v49  ;;  %v6014_v46 = vpop.eup %6013 }
0x14f8   :  { %v4544_v41 = vadd.f32 1.0, %v6014_v46 }
0x14f9   :  { %4553 = vrot.lane.b32.xlu0 %v4551_v39, %s6076_s26 }
0x14fa   :  { %6015 = vrcp.f32 %v4544_v41 }
0x1504   :  { %v6016_v29 = vpop.eup %6015 }
0x156b   :  { %v4554_v21 = vpop.permute.xlu0 %4553 }
0x156c   :  { %v4556_v8 = vadd.f32 %v4554_v21, %v4550_v0 }
0x156e   :  { %6017 = vtanh.f32 %v4556_v8 }
0x1578   :  { %v6018_v59 = vpop.eup %6017 }
0x1579   :  { %v4558_v22 = vmul.f32 %v6018_v59, %v6016_v29 }
0x157b   :  { %v4559_v52 = vpack.c.bf16 %v4558_v22, %v4558_v22 }
0x157d   :  { %v4561_v63 = vrot.slane %v4559_v52, 1 }
0x157f   :  { %4562 = vrot.lane.b32.xlu1 %v4561_v63, %s6076_s26 }
0x15f1   :  { %v4563_v12 = vpop.permute.xlu1 %4562 }
0x15f2   :  { %5126 = vmatmul.mubr.msk.bf16.vlgmr.msra.gmra.mrb[212].mxu1 %vm2627_vm9, %v4563_v12 }
0x15f3   :  { %4650 = vmatpush1.bf16.msra.mxu1 %v7933_v47  ;;  %4681 = vmatprep.mubr.bf16.mxu1 %v8154_v15 }
0x15f4   :  { %4651 = vmatprep.subr.bf16.mxu1 %v7938_v48 }
0x15f7   :  { %4652 = vmatpush1.bf16.msra.mxu1 %v7944_v25 }
0x15f8   :  { %4653 = vmatprep.subr.bf16.mxu1 %v7951_v53 }
0x15fb   :  { %4654 = vmatpush1.bf16.msra.mxu1 %v7957_v1 }
0x15fc   :  { %4655 = vmatprep.subr.bf16.mxu1 %v7963_v57 }
0x15ff   :  { %4656 = vmatpush1.bf16.msra.mxu1 %v7969_v27  ;;  %v4630_v27 = vrot.slane %v4556_v8, 6 }
0x1600   :  { %5219 = vmatprep.subr.bf16.mxu1 %v6081_v14 }
0x16c5   :  { %v4601_v3 = vpop.f32.mrb[212].mxu1 }
0x16c6   :  { %v4610_v16 = vrot.slane %v4601_v3, 4  ;;  %v4603_v45 = vpop.f32.mrb[213].mxu1 }
0x16c7   :  { %v4605_v47 = vpop.f32.mrb[214].mxu1  ;;  %v4611_v25 = vrot.slane %v4603_v45, 4 }
0x16c8   :  { %v4614_v15 = vadd.f32 %v4610_v16, %v7989_v43  ;;  %v4606_v13 = vpop.f32.mrb[215].mxu1 }
0x16c9   :  { %v4615_v53 = vadd.f32 %v4611_v25, %v7991_v33 }
0x16ca   :  { %v5127_v48 = vmul.f32 -1.442695, %v4614_v15 }
0x16cb   :  { %v5128_v31 = vmul.f32 -1.442695, %v4615_v53 }
0x16cc   :  { %6019 = vpow2.f32 %v5127_v48 }
0x16cd   :  { %6021 = vtanh.f32 %v4615_v53 }
0x16d6   :  { %v6020_v38 = vpop.eup %6019 }
0x16d7   :  { %v4619_v1 = vadd.f32 1.0, %v6020_v38  ;;  %v6022_v57 = vpop.eup %6021 }
0x16d9   :  { %6023 = vrcp.f32 %v4619_v1 }
0x16da   :  { %6025 = vpow2.f32 %v5128_v31 }
0x16e3   :  { %v6024_v28 = vpop.eup %6023 }
0x16e4   :  { %v4633_v11 = vmul.f32 %v6024_v28, %v6022_v57  ;;  %v4632_v55 = vmul.f32 %v6024_v28, %v4630_v27  ;;  %v6026_v51 = vpop.eup %6025 }
0x16e5   :  { %v4626_v7 = vadd.f32 1.0, %v6026_v51 }
0x16e6   :  { %4635 = vrot.lane.b32.xlu0 %v4633_v11, %s6076_s26 }
0x16e7   :  { %6027 = vrcp.f32 %v4626_v7 }
0x16f1   :  { %v6028_v37 = vpop.eup %6027 }
0x1758   :  { %v4636_v36 = vpop.permute.xlu0 %4635 }
0x1759   :  { %v4638_v50 = vadd.f32 %v4636_v36, %v4632_v55 }
0x175b   :  { %6029 = vtanh.f32 %v4638_v50  ;;  %v4712_v44 = vrot.slane %v4638_v50, 6 }
0x1765   :  { %v6030_v42 = vpop.eup %6029 }
0x1766   :  { %v4640_v56 = vmul.f32 %v6030_v42, %v6028_v37 }
0x1768   :  { %v4641_v54 = vpack.c.bf16 %v4640_v56, %v4640_v56 }
0x176a   :  { %v4643_v26 = vrot.slane %v4641_v54, 2 }
0x176c   :  { %4644 = vrot.lane.b32.xlu1 %v4643_v26, %s6076_s26 }
0x17de   :  { %v4645_v9 = vpop.permute.xlu1 %4644 }
0x17df   :  { %5129 = vmatmul.mubr.msk.bf16.vlgmr.msra.gmra.mrb[216].mxu1 %vm2627_vm9, %v4645_v9 }
0x17e0   :  { %5227 = vmatprep.mubr.msk.bf16.mxu1 %vm6084_vm0, %v6081_v14 }
0x18b2   :  { %v4683_v61 = vpop.f32.mrb[216].mxu1 }
0x18b3   :  { %v4692_v19 = vrot.slane %v4683_v61, 2  ;;  %v4685_v23 = vpop.f32.mrb[217].mxu1 }
0x18b4   :  { %v4687_v5 = vpop.f32.mrb[218].mxu1  ;;  %v4693_v40 = vrot.slane %v4685_v23, 2 }
0x18b5   :  { %v4696_v35 = vadd.f32 %v4692_v19, %v7989_v43  ;;  %v4688_v30 = vpop.f32.mrb[219].mxu1  ;;  %v5943_v43 = vld [vmem:[%s8138_s12] sm:$0xff]  }
0x18b6   :  { %v4697_v2 = vadd.f32 %v4693_v40, %v7991_v33  ;;  %5220 = vmatpush3.bf16.msra.mxu1 %v5943_v43  ;;  %v5944_v33 = vld [vmem:[%s8138_s12 + $0x8] sm:$0xff]  }
0x18b7   :  { %v5130_v6 = vmul.f32 -1.442695, %v4696_v35  ;;  %5221 = vmatprep.subr.bf16.mxu1 %v6081_v14 }
0x18b8   :  { %v5131_v4 = vmul.f32 -1.442695, %v4697_v2 }
0x18b9   :  { %6031 = vpow2.f32 %v5130_v6 }
0x18ba   :  { %6033 = vtanh.f32 %v4697_v2  ;;  %5222 = vmatpush3.bf16.msra.mxu1 %v5944_v33 }
0x18bb   :  { %5223 = vmatprep.subr.bf16.mxu1 %v6081_v14 }
0x18be   :  { %5224 = vmatpush3.bf16.msra.mxu1 %v5945_v32 }
0x18bf   :  { %5225 = vmatprep.subr.bf16.mxu1 %v6081_v14  ;;  %v5132_v14 = vld [vmem:[%s8139_s13] ss:$0 sm:$0xff]  ;;  %s6085_s13 = smov [#allocation2]  }
0x18c2   :  { %5226 = vmatpush3.bf16.msra.mxu1 %v5946_v62 }
0x18c3   :  { %v6032_v20 = vpop.eup %6031 }
0x18c4   :  { %v4701_v60 = vadd.f32 1.0, %v6032_v20  ;;  %v6034_v10 = vpop.eup %6033 }
0x18c6   :  { %6035 = vrcp.f32 %v4701_v60 }
0x18c7   :  { %6037 = vpow2.f32 %v5131_v4 }
0x18d0   :  { %v6036_v17 = vpop.eup %6035 }
0x18d1   :  { %v4715_v34 = vmul.f32 %v6036_v17, %v6034_v10  ;;  %v4714_v58 = vmul.f32 %v6036_v17, %v4712_v44  ;;  %v6038_v49 = vpop.eup %6037 }
0x18d2   :  { %v4708_v18 = vadd.f32 1.0, %v6038_v49 }
0x18d3   :  { %4717 = vrot.lane.b32.xlu0 %v4715_v34, %s6076_s26 }
0x18d4   :  { %6039 = vrcp.f32 %v4708_v18 }
0x18de   :  { %v6040_v24 = vpop.eup %6039 }
0x1945   :  { %v4718_v39 = vpop.permute.xlu0 %4717 }
0x1946   :  { %v4720_v0 = vadd.f32 %v4718_v39, %v4714_v58 }
0x1948   :  { %6041 = vtanh.f32 %v4720_v0 }
0x1952   :  { %v6042_v46 = vpop.eup %6041 }
0x1953   :  { %v4722_v41 = vmul.f32 %v6042_v46, %v6040_v24 }
0x1955   :  { %v4723_v21 = vpack.c.bf16 %v4722_v41, %v4722_v41 }
0x1957   :  { %v4740_v8 = vrot.slane %v4723_v21, 3 }
0x1959   :  { %4741 = vrot.lane.b32.xlu1 %v4740_v8, %s6076_s26  ;;  %s4829_s26 = sshll.u32 %s6085_s13, 4  ;;  %s4830_s26 = int_to_ptr.vmem [resolvable:$true] %s4829_s26 }
0x195a   :  { %s6047_s22 = scalar_lea.vmem %s4830_s26, 32  ;;  %p6052_p1 = scmp.lt.s32.totalorder %s4830_s26, %s4830_s26 }
0x195b   :  { %p6048_p0 = scmp.ne.s32.totalorder %s4830_s26, %s6047_s22  ;;  %p6053_p2 = scmp.lt.s32.totalorder %s6047_s22, %s6047_s22 }
0x195d   :  { %p6054_p3 = por %p6053_p2, %p6052_p1 }
0x195f   :  { %p6055_p4 = pnand %p6054_p3, %p6048_p0 }
0x19cb   :  { %v4742_v29 = vpop.permute.xlu1 %4741 }
0x19cc   :  { %5228 = vmatmul.mubr.msk.bf16.vlgmr.msra.gmra.mrb[220].mxu1 %vm2627_vm9, %v4742_v29 }
0x1a9f   :  { %v4804_v59 = vpop.f32.mrb[220].mxu1 }
0x1aa0   :  { %v4805_v22 = vadd.f32 %v5132_v14, %v4804_v59  ;;  %v5229_v52 = vpop.f32.mrb[221].mxu1 }
0x1aa1   :  { %v4807_v63 = vpop.f32.mrb[222].mxu1 }
0x1aa2   :  { %v5230_v12 = vpop.f32.mrb[223].mxu1  ;;  %v4811_v3 = vsel %vm4810_vm2, %v4805_v22, -inf }
0x1aa3   :  { %4812 = vmax.xlane.f32.xlu0 %v4811_v3 }
0x1b30   :  { %v4813_v16 = vpop.xlane.xlu0 %4812 }
0x1b31   :  { %v4814_v45 = vsub.f32 %v4805_v22, %v4813_v16 }
0x1b33   :  { %v4815_v47 = vmul.f32 1.442695, %v4814_v45 }
0x1b35   :  { %6043 = vpow2.f32 %v4815_v47 }
0x1b3f   :  { %v6044_v15 = vpop.eup %6043 }
0x1b40   :  { %v4817_v13 = vsel %vm4810_vm2, %v6044_v15, 0.0 }
0x1b41   :  { %4818 = vadd.xlane.f32.xlu1 %v4817_v13 }
0x1bce   :  { %v4819_v48 = vpop.xlane.xlu1 %4818 }
0x1bcf   :  { %6045 = vrcp.f32 %v4819_v48 }
0x1bd9   :  { %v6046_v25 = vpop.eup %6045 }
0x1bda   :  { %v4821_v53 = vmul.f32 %v6046_v25, %v6044_v15 }
0x1bdc   :  { %4822 = vst.msk [vmem:[#allocation2] sm:$0x3] %vm4810_vm2, %v4821_v53 }
0x1bdd   :  { %6058 = shalt.err (!%p6055_p4)
}
0x1bde   :  { %s6059_s6 = scalar_lea.hbm %s8140_s14, 32 }
0x1bdf   :  { %p6060_p5 = scmp.ne.s32.totalorder %s8140_s14, %s6059_s6  ;;  %p6063_p6 = scmp.lt.u32.totalorder %s6059_s6, %s8140_s14 }
0x1be1   :  { %p6065_p7 = pnand %p6063_p6, %p6060_p5 }
0x1be3   :  { %6068 = shalt.err (!%p6065_p7)
}
0x1be4   :  { %4832 = dma.vmem_to_hbm [thread:$0]  %s4830_s26, 32, %s8140_s14, [#allocation3]  }
0x1be5   :  { %6069 = dma.done.wait [#allocation3], 32  }
0x1be6   :  { %6070 = vsyncadd [#allocation3], 4294967264 }
0x1be7   :  { %4836 = vsyncpa [#allocation3], 1 }

</bundles_post_ra>
